<compile_context>
chip_gen: v5e
topology: v5e:2x2
jax: 0.10.0
libtpu: 0.0.40
codegen_flags: <defaults>
</compile_context>

<pallas_src>
import functools

import jax
import jax.numpy as jnp
import numpy as np
from jax.experimental import pallas as pl
from jax.experimental.pallas import tpu as pltpu


# ----------------------------------------------------------------------------
# Fused Pallas kernel: the entire RFB3 forward pass for one image per grid step
# ----------------------------------------------------------------------------
def _rfb3_kernel(*refs, branch_cfg, H, W, scale_resid):
    """refs = (x_ref, [w, scale, bias] * 11 layers ..., o_ref).

    x_ref : [1, Cin, H*W]           input image, channels-major
    w     : [Cout, k*k*Cin]         conv weight as a single matmul matrix
    scale : [Cout, 1]               folded-BN scale (gamma / sqrt(var+eps))
    bias  : [Cout, 1]               folded-BN bias  ((conv_b - mean)*scale + beta)
    o_ref : [1, Cout, H*W]          final RFB3 output (NCHW-ordered, lane-dense)
    """
    x_ref, param_refs, o_ref = refs[0], refs[1:-1], refs[-1]
    HW = H * W
    x = x_ref[0].astype(jnp.float32)                       # [Cin, HW]

    # Hoisted iotas for the conv boundary masks (shared by all 3x3 layers).
    lane = jax.lax.broadcasted_iota(jnp.int32, (1, HW), 1)
    w_idx = lane % W
    tap_cache = {}                                         # dil -> [(off, mask)] * 9

    def taps_for(dil):
        if dil not in tap_cache:
            entries = []
            for di in range(3):
                for dj in range(3):
                    ci = (di - 1) * dil                    # padding == dilation
                    cj = (dj - 1) * dil
                    off = ci * W + cj
                    valid = ((w_idx + cj >= 0) & (w_idx + cj < W)
                             & (lane + off >= 0) & (lane + off < HW))
                    entries.append((off, valid))
            tap_cache[dil] = entries
        return tap_cache[dil]

    idx = [0]

    def next_params():
        w = param_refs[idx[0]][...]
        s = param_refs[idx[0] + 1][...]
        b = param_refs[idx[0] + 2][...]
        idx[0] += 3
        return w, s, b

    def conv_bn(h, k, dil, relu):
        """Conv(k, stride=1, padding=dil*(k-1)//2, dilation=dil) + folded BN (+ReLU)."""
        wm, s, b = next_params()
        if k == 1:
            rhs = h                                        # [Cin, HW]
        else:
            taps = []
            for off, valid in taps_for(dil):
                shifted = h if off == 0 else pltpu.roll(h, (-off) % HW, axis=1)
                taps.append(jnp.where(valid, shifted, 0.0))
            rhs = jnp.concatenate(taps, axis=0)            # [9*Cin, HW] im2col
        acc = jnp.dot(wm, rhs, preferred_element_type=jnp.float32)  # one MXU dot
        out = acc * s + b                                  # folded BatchNorm
        return jnp.maximum(out, 0.0) if relu else out

    branch_outs = []
    for layers in branch_cfg:
        h = x
        for (k, dil, relu) in layers:
            h = conv_bn(h, k, dil, relu)
        branch_outs.append(h)
    cat = jnp.concatenate(branch_outs, axis=0)             # channel concat (sublanes)
    out = conv_bn(cat, 1, 1, False)                        # out_conv
    short = conv_bn(x, 1, 1, False)                        # shortcut
    o_ref[0] = jnp.maximum(out * scale_resid + short, 0.0).astype(o_ref.dtype)


# ----------------------------------------------------------------------------
# Wrapper around pallas_call
# ----------------------------------------------------------------------------
def rfb3_forward(x_nchw, params, branch_cfg, scale=0.1):
    """x_nchw: [N, C, H, W] -> [N, out_planes, H, W]."""
    # TODO(synk): stride > 1 not implemented (RFB3 default config uses stride=1).
    n, c, h, w = x_nchw.shape
    hw = h * w
    cout = params[-1]["w"].shape[0]        # shortcut Cout == out_planes

    x_flat = x_nchw.reshape(n, c, hw)      # NCHW -> (N, C, H*W): memory-order preserving
    flat_args = []
    in_specs = [pl.BlockSpec((1, c, hw), lambda b: (b, 0, 0))]
    for p in params:
        for arr in (p["w"], p["scale"], p["bias"]):
            flat_args.append(arr)
            in_specs.append(pl.BlockSpec(arr.shape, lambda b: (0, 0)))

    kernel = functools.partial(_rfb3_kernel, branch_cfg=branch_cfg, H=h, W=w,
                               scale_resid=scale)
    out = pl.pallas_call(
        kernel,
        out_shape=jax.ShapeDtypeStruct((n, cout, hw), x_nchw.dtype),
        grid=(n,),
        in_specs=in_specs,
        out_specs=pl.BlockSpec((1, cout, hw), lambda b: (b, 0, 0)),
        compiler_params=pltpu.CompilerParams(dimension_semantics=("parallel",)),
    )(x_flat, *flat_args)
    return out.reshape(n, cout, h, w)      # (N, Cout, H*W) -> NCHW, free reshape


# ----------------------------------------------------------------------------
# Parameter construction (deterministic, synthetic — no checkpoint)
# ----------------------------------------------------------------------------
def init_basic_conv(key, cin, cout, k):
    k1, k2, k3, k4, k5, k6 = jax.random.split(key, 6)
    w_hwio = jax.random.normal(k1, (k, k, cin, cout), jnp.float32) / np.sqrt(k * k * cin)
    conv_b = 0.1 * jax.random.normal(k2, (cout,), jnp.float32)
    gamma = jax.random.uniform(k3, (cout,), jnp.float32, 0.5, 1.5)
    beta = 0.1 * jax.random.normal(k4, (cout,), jnp.float32)
    rmean = 0.1 * jax.random.normal(k5, (cout,), jnp.float32)
    rvar = jax.random.uniform(k6, (cout,), jnp.float32, 0.5, 1.5)
    scale = gamma / jnp.sqrt(rvar + 1e-5)
    bias = (conv_b - rmean) * scale + beta
    # Kernel layout: one matmul per conv -> weight as [Cout, k*k*Cin], tap-major
    # (di, dj, cin) ordering to match the im2col rows built in the kernel.
    w_mat = jnp.transpose(w_hwio, (3, 0, 1, 2)).reshape(cout, k * k * cin)
    return {"w": w_mat, "w_hwio": w_hwio,
            "scale": scale.reshape(cout, 1), "bias": bias.reshape(cout, 1)}


def build_rfb3_params(key, in_planes, out_planes, visual=1):
    inter = in_planes // 8
    # Static graph config: per branch, tuples of (kernel_size, dilation, relu).
    # Every 3x3 layer in RFB3 has padding == dilation, so spatial size is preserved.
    branch_cfg = (
        ((1, 1, True), (3, visual, False)),
        ((1, 1, True), (3, 1, True), (3, visual + 1, False)),
        ((1, 1, True), (3, 1, True), (3, 1, True), (3, 2 * visual + 1, False)),
    )
    # (cin, cout, k) per layer, in kernel consumption order.
    layer_io = [
        (in_planes, 2 * inter, 1), (2 * inter, 2 * inter, 3),
        (in_planes, inter, 1), (inter, 2 * inter, 3), (2 * inter, 2 * inter, 3),
        (in_planes, inter, 1), (inter, inter // 2 * 3, 3),
        (inter // 2 * 3, 2 * inter, 3), (2 * inter, 2 * inter, 3),
        (6 * inter, out_planes, 1),          # out_conv
        (in_planes, out_planes, 1),          # shortcut
    ]
    keys = jax.random.split(key, len(layer_io))
    params = [init_basic_conv(keys[i], cin, cout, k)
              for i, (cin, cout, k) in enumerate(layer_io)]
    return branch_cfg, params


# ----------------------------------------------------------------------------
# Pure-JAX reference (lax conv) for validation
# ----------------------------------------------------------------------------
def _ref_conv_bn(x, p, k, dil, relu):
    pad = dil * (k - 1) // 2
    out = jax.lax.conv_general_dilated(
        x, p["w_hwio"], window_strides=(1, 1),
        padding=[(pad, pad), (pad, pad)], rhs_dilation=(dil, dil),
        dimension_numbers=("NHWC", "HWIO", "NHWC"))
    out = out * p["scale"][:, 0] + p["bias"][:, 0]
    return jnp.maximum(out, 0.0) if relu else out


def rfb3_reference(x_nchw, params, branch_cfg, scale=0.1):
    x = jnp.transpose(x_nchw, (0, 2, 3, 1))
    outs, idx = [], 0
    for layers in branch_cfg:
        h = x
        for (k, dil, relu) in layers:
            h = _ref_conv_bn(h, params[idx], k, dil, relu)
            idx += 1
        outs.append(h)
    cat = jnp.concatenate(outs, axis=-1)
    out = _ref_conv_bn(cat, params[idx], 1, 1, False)
    short = _ref_conv_bn(x, params[idx + 1], 1, 1, False)
    out = jnp.maximum(out * scale + short, 0.0)
    return jnp.transpose(out, (0, 3, 1, 2))


# ----------------------------------------------------------------------------
if __name__ == "__main__":
    key = jax.random.PRNGKey(0)
    k_param, k_x = jax.random.split(key)

    N, C, H, W = 2, 16, 16, 16          # in_planes=16 -> inter_planes=2
    OUT_PLANES = 16
    x = jax.random.normal(k_x, (N, C, H, W), jnp.float32)
    branch_cfg, params = build_rfb3_params(k_param, C, OUT_PLANES, visual=1)

    fwd = jax.jit(functools.partial(rfb3_forward, branch_cfg=branch_cfg, scale=0.1))
    out = jax.block_until_ready(fwd(x, params))

    ref = jax.block_until_ready(rfb3_reference(x, params, branch_cfg, scale=0.1))
    np.testing.assert_allclose(np.asarray(out), np.asarray(ref), rtol=2e-3, atol=2e-3)
    assert out.shape == (N, OUT_PLANES, H, W)

    print("KERNEL_OK")
</pallas_src>

<mosaic_0001>
module attributes {stable_mosaic.version = 11 : i64} {
  func.func @_rfb3_kernel(%arg0: i32, %arg1: memref<1x16x256xf32, #tpu.memory_space<vmem>>, %arg2: memref<4x16xf32, #tpu.memory_space<vmem>>, %arg3: memref<4x1xf32, #tpu.memory_space<vmem>>, %arg4: memref<4x1xf32, #tpu.memory_space<vmem>>, %arg5: memref<4x36xf32, #tpu.memory_space<vmem>>, %arg6: memref<4x1xf32, #tpu.memory_space<vmem>>, %arg7: memref<4x1xf32, #tpu.memory_space<vmem>>, %arg8: memref<2x16xf32, #tpu.memory_space<vmem>>, %arg9: memref<2x1xf32, #tpu.memory_space<vmem>>, %arg10: memref<2x1xf32, #tpu.memory_space<vmem>>, %arg11: memref<4x18xf32, #tpu.memory_space<vmem>>, %arg12: memref<4x1xf32, #tpu.memory_space<vmem>>, %arg13: memref<4x1xf32, #tpu.memory_space<vmem>>, %arg14: memref<4x36xf32, #tpu.memory_space<vmem>>, %arg15: memref<4x1xf32, #tpu.memory_space<vmem>>, %arg16: memref<4x1xf32, #tpu.memory_space<vmem>>, %arg17: memref<2x16xf32, #tpu.memory_space<vmem>>, %arg18: memref<2x1xf32, #tpu.memory_space<vmem>>, %arg19: memref<2x1xf32, #tpu.memory_space<vmem>>, %arg20: memref<3x18xf32, #tpu.memory_space<vmem>>, %arg21: memref<3x1xf32, #tpu.memory_space<vmem>>, %arg22: memref<3x1xf32, #tpu.memory_space<vmem>>, %arg23: memref<4x27xf32, #tpu.memory_space<vmem>>, %arg24: memref<4x1xf32, #tpu.memory_space<vmem>>, %arg25: memref<4x1xf32, #tpu.memory_space<vmem>>, %arg26: memref<4x36xf32, #tpu.memory_space<vmem>>, %arg27: memref<4x1xf32, #tpu.memory_space<vmem>>, %arg28: memref<4x1xf32, #tpu.memory_space<vmem>>, %arg29: memref<16x12xf32, #tpu.memory_space<vmem>>, %arg30: memref<16x1xf32, #tpu.memory_space<vmem>>, %arg31: memref<16x1xf32, #tpu.memory_space<vmem>>, %arg32: memref<16x16xf32, #tpu.memory_space<vmem>>, %arg33: memref<16x1xf32, #tpu.memory_space<vmem>>, %arg34: memref<16x1xf32, #tpu.memory_space<vmem>>, %arg35: memref<1x16x256xf32, #tpu.memory_space<vmem>>) attributes {dimension_semantics = [#tpu.dimension_semantics<parallel>], iteration_bounds = array<i64: 2>, scalar_prefetch = 0 : i64, scratch_operands = 0 : i64, tpu.core_type = #tpu.core_type<tc>, window_params = [{transform_indices = @transform_0, window_bounds = array<i64: 1, 16, 256>}, {pipeline_mode = #tpu.pipeline_mode<synchronous>, transform_indices = @transform_1, window_bounds = array<i64: 4, 16>}, {pipeline_mode = #tpu.pipeline_mode<synchronous>, transform_indices = @transform_2, window_bounds = array<i64: 4, 1>}, {pipeline_mode = #tpu.pipeline_mode<synchronous>, transform_indices = @transform_3, window_bounds = array<i64: 4, 1>}, {pipeline_mode = #tpu.pipeline_mode<synchronous>, transform_indices = @transform_4, window_bounds = array<i64: 4, 36>}, {pipeline_mode = #tpu.pipeline_mode<synchronous>, transform_indices = @transform_5, window_bounds = array<i64: 4, 1>}, {pipeline_mode = #tpu.pipeline_mode<synchronous>, transform_indices = @transform_6, window_bounds = array<i64: 4, 1>}, {pipeline_mode = #tpu.pipeline_mode<synchronous>, transform_indices = @transform_7, window_bounds = array<i64: 2, 16>}, {pipeline_mode = #tpu.pipeline_mode<synchronous>, transform_indices = @transform_8, window_bounds = array<i64: 2, 1>}, {pipeline_mode = #tpu.pipeline_mode<synchronous>, transform_indices = @transform_9, window_bounds = array<i64: 2, 1>}, {pipeline_mode = #tpu.pipeline_mode<synchronous>, transform_indices = @transform_10, window_bounds = array<i64: 4, 18>}, {pipeline_mode = #tpu.pipeline_mode<synchronous>, transform_indices = @transform_11, window_bounds = array<i64: 4, 1>}, {pipeline_mode = #tpu.pipeline_mode<synchronous>, transform_indices = @transform_12, window_bounds = array<i64: 4, 1>}, {pipeline_mode = #tpu.pipeline_mode<synchronous>, transform_indices = @transform_13, window_bounds = array<i64: 4, 36>}, {pipeline_mode = #tpu.pipeline_mode<synchronous>, transform_indices = @transform_14, window_bounds = array<i64: 4, 1>}, {pipeline_mode = #tpu.pipeline_mode<synchronous>, transform_indices = @transform_15, window_bounds = array<i64: 4, 1>}, {pipeline_mode = #tpu.pipeline_mode<synchronous>, transform_indices = @transform_16, window_bounds = array<i64: 2, 16>}, {pipeline_mode = #tpu.pipeline_mode<synchronous>, transform_indices = @transform_17, window_bounds = array<i64: 2, 1>}, {pipeline_mode = #tpu.pipeline_mode<synchronous>, transform_indices = @transform_18, window_bounds = array<i64: 2, 1>}, {pipeline_mode = #tpu.pipeline_mode<synchronous>, transform_indices = @transform_19, window_bounds = array<i64: 3, 18>}, {pipeline_mode = #tpu.pipeline_mode<synchronous>, transform_indices = @transform_20, window_bounds = array<i64: 3, 1>}, {pipeline_mode = #tpu.pipeline_mode<synchronous>, transform_indices = @transform_21, window_bounds = array<i64: 3, 1>}, {pipeline_mode = #tpu.pipeline_mode<synchronous>, transform_indices = @transform_22, window_bounds = array<i64: 4, 27>}, {pipeline_mode = #tpu.pipeline_mode<synchronous>, transform_indices = @transform_23, window_bounds = array<i64: 4, 1>}, {pipeline_mode = #tpu.pipeline_mode<synchronous>, transform_indices = @transform_24, window_bounds = array<i64: 4, 1>}, {pipeline_mode = #tpu.pipeline_mode<synchronous>, transform_indices = @transform_25, window_bounds = array<i64: 4, 36>}, {pipeline_mode = #tpu.pipeline_mode<synchronous>, transform_indices = @transform_26, window_bounds = array<i64: 4, 1>}, {pipeline_mode = #tpu.pipeline_mode<synchronous>, transform_indices = @transform_27, window_bounds = array<i64: 4, 1>}, {pipeline_mode = #tpu.pipeline_mode<synchronous>, transform_indices = @transform_28, window_bounds = array<i64: 16, 12>}, {pipeline_mode = #tpu.pipeline_mode<synchronous>, transform_indices = @transform_29, window_bounds = array<i64: 16, 1>}, {pipeline_mode = #tpu.pipeline_mode<synchronous>, transform_indices = @transform_30, window_bounds = array<i64: 16, 1>}, {pipeline_mode = #tpu.pipeline_mode<synchronous>, transform_indices = @transform_31, window_bounds = array<i64: 16, 16>}, {pipeline_mode = #tpu.pipeline_mode<synchronous>, transform_indices = @transform_32, window_bounds = array<i64: 16, 1>}, {pipeline_mode = #tpu.pipeline_mode<synchronous>, transform_indices = @transform_33, window_bounds = array<i64: 16, 1>}, {transform_indices = @transform_34, window_bounds = array<i64: 1, 16, 256>}]} {
    %c0 = arith.constant 0 : index
    %c0_0 = arith.constant 0 : index
    %c0_1 = arith.constant 0 : index
    %0 = vector.load %arg1[%c0, %c0_0, %c0_1] : memref<1x16x256xf32, #tpu.memory_space<vmem>>, vector<1x16x256xf32>
    %1 = vector.shape_cast %0 : vector<1x16x256xf32> to vector<16x256xf32>
    %2 = tpu.iota {dimensions = array<i32: 1>} : vector<1x256xi32>
    %c16_i32 = arith.constant 16 : i32
    %c0_i32 = arith.constant 0 : i32
    %3 = arith.cmpi eq, %c16_i32, %c0_i32 : i32
    %c1_i32 = arith.constant 1 : i32
    %4 = arith.select %3, %c1_i32, %c16_i32 : i32
    %5 = vector.broadcast %4 : i32 to vector<1x256xi32>
    %6 = arith.remsi %2, %5 : vector<1x256xi32>
    %c0_i32_2 = arith.constant 0 : i32
    %7 = vector.broadcast %c0_i32_2 : i32 to vector<1x256xi32>
    %8 = arith.cmpi ne, %6, %7 : vector<1x256xi32>
    %c0_i32_3 = arith.constant 0 : i32
    %9 = vector.broadcast %c0_i32_3 : i32 to vector<1x256xi32>
    %10 = arith.cmpi slt, %6, %9 : vector<1x256xi32>
    %c0_i32_4 = arith.constant 0 : i32
    %11 = arith.cmpi slt, %4, %c0_i32_4 : i32
    %12 = vector.broadcast %11 : i1 to vector<1x256xi1>
    %13 = vector.broadcast %12 : vector<1x256xi1> to vector<1x256xi1>
    %14 = arith.xori %10, %13 : vector<1x256xi1>
    %15 = arith.andi %14, %8 : vector<1x256xi1>
    %16 = vector.broadcast %4 : i32 to vector<1x256xi32>
    %17 = arith.addi %6, %16 : vector<1x256xi32>
    %18 = arith.select %15, %17, %6 : vector<1x256xi1>, vector<1x256xi32>
    %c0_5 = arith.constant 0 : index
    %c0_6 = arith.constant 0 : index
    %19 = vector.load %arg2[%c0_5, %c0_6] : memref<4x16xf32, #tpu.memory_space<vmem>>, vector<4x16xf32>
    %c0_7 = arith.constant 0 : index
    %c0_8 = arith.constant 0 : index
    %20 = vector.load %arg3[%c0_7, %c0_8] : memref<4x1xf32, #tpu.memory_space<vmem>>, vector<4x1xf32>
    %c0_9 = arith.constant 0 : index
    %c0_10 = arith.constant 0 : index
    %21 = vector.load %arg4[%c0_9, %c0_10] : memref<4x1xf32, #tpu.memory_space<vmem>>, vector<4x1xf32>
    %cst = arith.constant dense<0.000000e+00> : vector<4x256xf32>
    %22 = tpu.matmul %19, %1, %cst {dimension_numbers = #tpu.dot_dimension_numbers<[1], [0], [0], [1], [0, 0, 1, 1], [], []>} : vector<4x16xf32>, vector<16x256xf32>, vector<4x256xf32> -> vector<4x256xf32>
    %23 = vector.broadcast %20 : vector<4x1xf32> to vector<4x256xf32>
    %24 = arith.mulf %22, %23 : vector<4x256xf32>
    %25 = vector.broadcast %21 : vector<4x1xf32> to vector<4x256xf32>
    %26 = arith.addf %24, %25 : vector<4x256xf32>
    %cst_11 = arith.constant 0.000000e+00 : f32
    %27 = vector.broadcast %cst_11 : f32 to vector<4x256xf32>
    %28 = arith.maximumf %26, %27 : vector<4x256xf32>
    %c0_12 = arith.constant 0 : index
    %c0_13 = arith.constant 0 : index
    %29 = vector.load %arg5[%c0_12, %c0_13] : memref<4x36xf32, #tpu.memory_space<vmem>>, vector<4x36xf32>
    %c0_14 = arith.constant 0 : index
    %c0_15 = arith.constant 0 : index
    %30 = vector.load %arg6[%c0_14, %c0_15] : memref<4x1xf32, #tpu.memory_space<vmem>>, vector<4x1xf32>
    %c0_16 = arith.constant 0 : index
    %c0_17 = arith.constant 0 : index
    %31 = vector.load %arg7[%c0_16, %c0_17] : memref<4x1xf32, #tpu.memory_space<vmem>>, vector<4x1xf32>
    %c-1_i32 = arith.constant -1 : i32
    %32 = vector.broadcast %c-1_i32 : i32 to vector<1x256xi32>
    %33 = arith.addi %18, %32 : vector<1x256xi32>
    %c0_i32_18 = arith.constant 0 : i32
    %34 = vector.broadcast %c0_i32_18 : i32 to vector<1x256xi32>
    %35 = arith.cmpi sge, %33, %34 : vector<1x256xi32>
    %c-1_i32_19 = arith.constant -1 : i32
    %36 = vector.broadcast %c-1_i32_19 : i32 to vector<1x256xi32>
    %37 = arith.addi %18, %36 : vector<1x256xi32>
    %c16_i32_20 = arith.constant 16 : i32
    %38 = vector.broadcast %c16_i32_20 : i32 to vector<1x256xi32>
    %39 = arith.cmpi slt, %37, %38 : vector<1x256xi32>
    %40 = arith.andi %35, %39 : vector<1x256xi1>
    %c-17_i32 = arith.constant -17 : i32
    %41 = vector.broadcast %c-17_i32 : i32 to vector<1x256xi32>
    %42 = arith.addi %2, %41 : vector<1x256xi32>
    %c0_i32_21 = arith.constant 0 : i32
    %43 = vector.broadcast %c0_i32_21 : i32 to vector<1x256xi32>
    %44 = arith.cmpi sge, %42, %43 : vector<1x256xi32>
    %45 = arith.andi %40, %44 : vector<1x256xi1>
    %c-17_i32_22 = arith.constant -17 : i32
    %46 = vector.broadcast %c-17_i32_22 : i32 to vector<1x256xi32>
    %47 = arith.addi %2, %46 : vector<1x256xi32>
    %c256_i32 = arith.constant 256 : i32
    %48 = vector.broadcast %c256_i32 : i32 to vector<1x256xi32>
    %49 = arith.cmpi slt, %47, %48 : vector<1x256xi32>
    %50 = arith.andi %45, %49 : vector<1x256xi1>
    %c0_i32_23 = arith.constant 0 : i32
    %51 = vector.broadcast %c0_i32_23 : i32 to vector<1x256xi32>
    %52 = arith.addi %18, %51 : vector<1x256xi32>
    %c0_i32_24 = arith.constant 0 : i32
    %53 = vector.broadcast %c0_i32_24 : i32 to vector<1x256xi32>
    %54 = arith.cmpi sge, %52, %53 : vector<1x256xi32>
    %c0_i32_25 = arith.constant 0 : i32
    %55 = vector.broadcast %c0_i32_25 : i32 to vector<1x256xi32>
    %56 = arith.addi %18, %55 : vector<1x256xi32>
    %c16_i32_26 = arith.constant 16 : i32
    %57 = vector.broadcast %c16_i32_26 : i32 to vector<1x256xi32>
    %58 = arith.cmpi slt, %56, %57 : vector<1x256xi32>
    %59 = arith.andi %54, %58 : vector<1x256xi1>
    %c-16_i32 = arith.constant -16 : i32
    %60 = vector.broadcast %c-16_i32 : i32 to vector<1x256xi32>
    %61 = arith.addi %2, %60 : vector<1x256xi32>
    %c0_i32_27 = arith.constant 0 : i32
    %62 = vector.broadcast %c0_i32_27 : i32 to vector<1x256xi32>
    %63 = arith.cmpi sge, %61, %62 : vector<1x256xi32>
    %64 = arith.andi %59, %63 : vector<1x256xi1>
    %c-16_i32_28 = arith.constant -16 : i32
    %65 = vector.broadcast %c-16_i32_28 : i32 to vector<1x256xi32>
    %66 = arith.addi %2, %65 : vector<1x256xi32>
    %c256_i32_29 = arith.constant 256 : i32
    %67 = vector.broadcast %c256_i32_29 : i32 to vector<1x256xi32>
    %68 = arith.cmpi slt, %66, %67 : vector<1x256xi32>
    %69 = arith.andi %64, %68 : vector<1x256xi1>
    %c1_i32_30 = arith.constant 1 : i32
    %70 = vector.broadcast %c1_i32_30 : i32 to vector<1x256xi32>
    %71 = arith.addi %18, %70 : vector<1x256xi32>
    %c0_i32_31 = arith.constant 0 : i32
    %72 = vector.broadcast %c0_i32_31 : i32 to vector<1x256xi32>
    %73 = arith.cmpi sge, %71, %72 : vector<1x256xi32>
    %c1_i32_32 = arith.constant 1 : i32
    %74 = vector.broadcast %c1_i32_32 : i32 to vector<1x256xi32>
    %75 = arith.addi %18, %74 : vector<1x256xi32>
    %c16_i32_33 = arith.constant 16 : i32
    %76 = vector.broadcast %c16_i32_33 : i32 to vector<1x256xi32>
    %77 = arith.cmpi slt, %75, %76 : vector<1x256xi32>
    %78 = arith.andi %73, %77 : vector<1x256xi1>
    %c-15_i32 = arith.constant -15 : i32
    %79 = vector.broadcast %c-15_i32 : i32 to vector<1x256xi32>
    %80 = arith.addi %2, %79 : vector<1x256xi32>
    %c0_i32_34 = arith.constant 0 : i32
    %81 = vector.broadcast %c0_i32_34 : i32 to vector<1x256xi32>
    %82 = arith.cmpi sge, %80, %81 : vector<1x256xi32>
    %83 = arith.andi %78, %82 : vector<1x256xi1>
    %c-15_i32_35 = arith.constant -15 : i32
    %84 = vector.broadcast %c-15_i32_35 : i32 to vector<1x256xi32>
    %85 = arith.addi %2, %84 : vector<1x256xi32>
    %c256_i32_36 = arith.constant 256 : i32
    %86 = vector.broadcast %c256_i32_36 : i32 to vector<1x256xi32>
    %87 = arith.cmpi slt, %85, %86 : vector<1x256xi32>
    %88 = arith.andi %83, %87 : vector<1x256xi1>
    %c-1_i32_37 = arith.constant -1 : i32
    %89 = vector.broadcast %c-1_i32_37 : i32 to vector<1x256xi32>
    %90 = arith.addi %18, %89 : vector<1x256xi32>
    %c0_i32_38 = arith.constant 0 : i32
    %91 = vector.broadcast %c0_i32_38 : i32 to vector<1x256xi32>
    %92 = arith.cmpi sge, %90, %91 : vector<1x256xi32>
    %c-1_i32_39 = arith.constant -1 : i32
    %93 = vector.broadcast %c-1_i32_39 : i32 to vector<1x256xi32>
    %94 = arith.addi %18, %93 : vector<1x256xi32>
    %c16_i32_40 = arith.constant 16 : i32
    %95 = vector.broadcast %c16_i32_40 : i32 to vector<1x256xi32>
    %96 = arith.cmpi slt, %94, %95 : vector<1x256xi32>
    %97 = arith.andi %92, %96 : vector<1x256xi1>
    %c-1_i32_41 = arith.constant -1 : i32
    %98 = vector.broadcast %c-1_i32_41 : i32 to vector<1x256xi32>
    %99 = arith.addi %2, %98 : vector<1x256xi32>
    %c0_i32_42 = arith.constant 0 : i32
    %100 = vector.broadcast %c0_i32_42 : i32 to vector<1x256xi32>
    %101 = arith.cmpi sge, %99, %100 : vector<1x256xi32>
    %102 = arith.andi %97, %101 : vector<1x256xi1>
    %c-1_i32_43 = arith.constant -1 : i32
    %103 = vector.broadcast %c-1_i32_43 : i32 to vector<1x256xi32>
    %104 = arith.addi %2, %103 : vector<1x256xi32>
    %c256_i32_44 = arith.constant 256 : i32
    %105 = vector.broadcast %c256_i32_44 : i32 to vector<1x256xi32>
    %106 = arith.cmpi slt, %104, %105 : vector<1x256xi32>
    %107 = arith.andi %102, %106 : vector<1x256xi1>
    %c0_i32_45 = arith.constant 0 : i32
    %108 = vector.broadcast %c0_i32_45 : i32 to vector<1x256xi32>
    %109 = arith.addi %18, %108 : vector<1x256xi32>
    %c0_i32_46 = arith.constant 0 : i32
    %110 = vector.broadcast %c0_i32_46 : i32 to vector<1x256xi32>
    %111 = arith.cmpi sge, %109, %110 : vector<1x256xi32>
    %c0_i32_47 = arith.constant 0 : i32
    %112 = vector.broadcast %c0_i32_47 : i32 to vector<1x256xi32>
    %113 = arith.addi %18, %112 : vector<1x256xi32>
    %c16_i32_48 = arith.constant 16 : i32
    %114 = vector.broadcast %c16_i32_48 : i32 to vector<1x256xi32>
    %115 = arith.cmpi slt, %113, %114 : vector<1x256xi32>
    %116 = arith.andi %111, %115 : vector<1x256xi1>
    %c0_i32_49 = arith.constant 0 : i32
    %117 = vector.broadcast %c0_i32_49 : i32 to vector<1x256xi32>
    %118 = arith.addi %2, %117 : vector<1x256xi32>
    %c0_i32_50 = arith.constant 0 : i32
    %119 = vector.broadcast %c0_i32_50 : i32 to vector<1x256xi32>
    %120 = arith.cmpi sge, %118, %119 : vector<1x256xi32>
    %121 = arith.andi %116, %120 : vector<1x256xi1>
    %c0_i32_51 = arith.constant 0 : i32
    %122 = vector.broadcast %c0_i32_51 : i32 to vector<1x256xi32>
    %123 = arith.addi %2, %122 : vector<1x256xi32>
    %c256_i32_52 = arith.constant 256 : i32
    %124 = vector.broadcast %c256_i32_52 : i32 to vector<1x256xi32>
    %125 = arith.cmpi slt, %123, %124 : vector<1x256xi32>
    %126 = arith.andi %121, %125 : vector<1x256xi1>
    %c1_i32_53 = arith.constant 1 : i32
    %127 = vector.broadcast %c1_i32_53 : i32 to vector<1x256xi32>
    %128 = arith.addi %18, %127 : vector<1x256xi32>
    %c0_i32_54 = arith.constant 0 : i32
    %129 = vector.broadcast %c0_i32_54 : i32 to vector<1x256xi32>
    %130 = arith.cmpi sge, %128, %129 : vector<1x256xi32>
    %c1_i32_55 = arith.constant 1 : i32
    %131 = vector.broadcast %c1_i32_55 : i32 to vector<1x256xi32>
    %132 = arith.addi %18, %131 : vector<1x256xi32>
    %c16_i32_56 = arith.constant 16 : i32
    %133 = vector.broadcast %c16_i32_56 : i32 to vector<1x256xi32>
    %134 = arith.cmpi slt, %132, %133 : vector<1x256xi32>
    %135 = arith.andi %130, %134 : vector<1x256xi1>
    %c1_i32_57 = arith.constant 1 : i32
    %136 = vector.broadcast %c1_i32_57 : i32 to vector<1x256xi32>
    %137 = arith.addi %2, %136 : vector<1x256xi32>
    %c0_i32_58 = arith.constant 0 : i32
    %138 = vector.broadcast %c0_i32_58 : i32 to vector<1x256xi32>
    %139 = arith.cmpi sge, %137, %138 : vector<1x256xi32>
    %140 = arith.andi %135, %139 : vector<1x256xi1>
    %c1_i32_59 = arith.constant 1 : i32
    %141 = vector.broadcast %c1_i32_59 : i32 to vector<1x256xi32>
    %142 = arith.addi %2, %141 : vector<1x256xi32>
    %c256_i32_60 = arith.constant 256 : i32
    %143 = vector.broadcast %c256_i32_60 : i32 to vector<1x256xi32>
    %144 = arith.cmpi slt, %142, %143 : vector<1x256xi32>
    %145 = arith.andi %140, %144 : vector<1x256xi1>
    %c-1_i32_61 = arith.constant -1 : i32
    %146 = vector.broadcast %c-1_i32_61 : i32 to vector<1x256xi32>
    %147 = arith.addi %18, %146 : vector<1x256xi32>
    %c0_i32_62 = arith.constant 0 : i32
    %148 = vector.broadcast %c0_i32_62 : i32 to vector<1x256xi32>
    %149 = arith.cmpi sge, %147, %148 : vector<1x256xi32>
    %c-1_i32_63 = arith.constant -1 : i32
    %150 = vector.broadcast %c-1_i32_63 : i32 to vector<1x256xi32>
    %151 = arith.addi %18, %150 : vector<1x256xi32>
    %c16_i32_64 = arith.constant 16 : i32
    %152 = vector.broadcast %c16_i32_64 : i32 to vector<1x256xi32>
    %153 = arith.cmpi slt, %151, %152 : vector<1x256xi32>
    %154 = arith.andi %149, %153 : vector<1x256xi1>
    %c15_i32 = arith.constant 15 : i32
    %155 = vector.broadcast %c15_i32 : i32 to vector<1x256xi32>
    %156 = arith.addi %2, %155 : vector<1x256xi32>
    %c0_i32_65 = arith.constant 0 : i32
    %157 = vector.broadcast %c0_i32_65 : i32 to vector<1x256xi32>
    %158 = arith.cmpi sge, %156, %157 : vector<1x256xi32>
    %159 = arith.andi %154, %158 : vector<1x256xi1>
    %c15_i32_66 = arith.constant 15 : i32
    %160 = vector.broadcast %c15_i32_66 : i32 to vector<1x256xi32>
    %161 = arith.addi %2, %160 : vector<1x256xi32>
    %c256_i32_67 = arith.constant 256 : i32
    %162 = vector.broadcast %c256_i32_67 : i32 to vector<1x256xi32>
    %163 = arith.cmpi slt, %161, %162 : vector<1x256xi32>
    %164 = arith.andi %159, %163 : vector<1x256xi1>
    %c0_i32_68 = arith.constant 0 : i32
    %165 = vector.broadcast %c0_i32_68 : i32 to vector<1x256xi32>
    %166 = arith.addi %18, %165 : vector<1x256xi32>
    %c0_i32_69 = arith.constant 0 : i32
    %167 = vector.broadcast %c0_i32_69 : i32 to vector<1x256xi32>
    %168 = arith.cmpi sge, %166, %167 : vector<1x256xi32>
    %c0_i32_70 = arith.constant 0 : i32
    %169 = vector.broadcast %c0_i32_70 : i32 to vector<1x256xi32>
    %170 = arith.addi %18, %169 : vector<1x256xi32>
    %c16_i32_71 = arith.constant 16 : i32
    %171 = vector.broadcast %c16_i32_71 : i32 to vector<1x256xi32>
    %172 = arith.cmpi slt, %170, %171 : vector<1x256xi32>
    %173 = arith.andi %168, %172 : vector<1x256xi1>
    %c16_i32_72 = arith.constant 16 : i32
    %174 = vector.broadcast %c16_i32_72 : i32 to vector<1x256xi32>
    %175 = arith.addi %2, %174 : vector<1x256xi32>
    %c0_i32_73 = arith.constant 0 : i32
    %176 = vector.broadcast %c0_i32_73 : i32 to vector<1x256xi32>
    %177 = arith.cmpi sge, %175, %176 : vector<1x256xi32>
    %178 = arith.andi %173, %177 : vector<1x256xi1>
    %c16_i32_74 = arith.constant 16 : i32
    %179 = vector.broadcast %c16_i32_74 : i32 to vector<1x256xi32>
    %180 = arith.addi %2, %179 : vector<1x256xi32>
    %c256_i32_75 = arith.constant 256 : i32
    %181 = vector.broadcast %c256_i32_75 : i32 to vector<1x256xi32>
    %182 = arith.cmpi slt, %180, %181 : vector<1x256xi32>
    %183 = arith.andi %178, %182 : vector<1x256xi1>
    %c1_i32_76 = arith.constant 1 : i32
    %184 = vector.broadcast %c1_i32_76 : i32 to vector<1x256xi32>
    %185 = arith.addi %18, %184 : vector<1x256xi32>
    %c0_i32_77 = arith.constant 0 : i32
    %186 = vector.broadcast %c0_i32_77 : i32 to vector<1x256xi32>
    %187 = arith.cmpi sge, %185, %186 : vector<1x256xi32>
    %c1_i32_78 = arith.constant 1 : i32
    %188 = vector.broadcast %c1_i32_78 : i32 to vector<1x256xi32>
    %189 = arith.addi %18, %188 : vector<1x256xi32>
    %c16_i32_79 = arith.constant 16 : i32
    %190 = vector.broadcast %c16_i32_79 : i32 to vector<1x256xi32>
    %191 = arith.cmpi slt, %189, %190 : vector<1x256xi32>
    %192 = arith.andi %187, %191 : vector<1x256xi1>
    %c17_i32 = arith.constant 17 : i32
    %193 = vector.broadcast %c17_i32 : i32 to vector<1x256xi32>
    %194 = arith.addi %2, %193 : vector<1x256xi32>
    %c0_i32_80 = arith.constant 0 : i32
    %195 = vector.broadcast %c0_i32_80 : i32 to vector<1x256xi32>
    %196 = arith.cmpi sge, %194, %195 : vector<1x256xi32>
    %197 = arith.andi %192, %196 : vector<1x256xi1>
    %c17_i32_81 = arith.constant 17 : i32
    %198 = vector.broadcast %c17_i32_81 : i32 to vector<1x256xi32>
    %199 = arith.addi %2, %198 : vector<1x256xi32>
    %c256_i32_82 = arith.constant 256 : i32
    %200 = vector.broadcast %c256_i32_82 : i32 to vector<1x256xi32>
    %201 = arith.cmpi slt, %199, %200 : vector<1x256xi32>
    %202 = arith.andi %197, %201 : vector<1x256xi1>
    %c17_i32_83 = arith.constant 17 : i32
    %203 = tpu.dynamic_rotate %28 by %c17_i32_83 dim 1 : vector<4x256xf32>, i32 -> vector<4x256xf32>
    %cst_84 = arith.constant 0.000000e+00 : f32
    %204 = vector.shape_cast %50 : vector<1x256xi1> to vector<1x256xi1>
    %205 = vector.broadcast %204 : vector<1x256xi1> to vector<4x256xi1>
    %206 = vector.broadcast %cst_84 : f32 to vector<4x256xf32>
    %207 = arith.select %205, %203, %206 : vector<4x256xi1>, vector<4x256xf32>
    %c16_i32_85 = arith.constant 16 : i32
    %208 = tpu.dynamic_rotate %28 by %c16_i32_85 dim 1 : vector<4x256xf32>, i32 -> vector<4x256xf32>
    %cst_86 = arith.constant 0.000000e+00 : f32
    %209 = vector.shape_cast %69 : vector<1x256xi1> to vector<1x256xi1>
    %210 = vector.broadcast %209 : vector<1x256xi1> to vector<4x256xi1>
    %211 = vector.broadcast %cst_86 : f32 to vector<4x256xf32>
    %212 = arith.select %210, %208, %211 : vector<4x256xi1>, vector<4x256xf32>
    %c15_i32_87 = arith.constant 15 : i32
    %213 = tpu.dynamic_rotate %28 by %c15_i32_87 dim 1 : vector<4x256xf32>, i32 -> vector<4x256xf32>
    %cst_88 = arith.constant 0.000000e+00 : f32
    %214 = vector.shape_cast %88 : vector<1x256xi1> to vector<1x256xi1>
    %215 = vector.broadcast %214 : vector<1x256xi1> to vector<4x256xi1>
    %216 = vector.broadcast %cst_88 : f32 to vector<4x256xf32>
    %217 = arith.select %215, %213, %216 : vector<4x256xi1>, vector<4x256xf32>
    %c1_i32_89 = arith.constant 1 : i32
    %218 = tpu.dynamic_rotate %28 by %c1_i32_89 dim 1 : vector<4x256xf32>, i32 -> vector<4x256xf32>
    %cst_90 = arith.constant 0.000000e+00 : f32
    %219 = vector.shape_cast %107 : vector<1x256xi1> to vector<1x256xi1>
    %220 = vector.broadcast %219 : vector<1x256xi1> to vector<4x256xi1>
    %221 = vector.broadcast %cst_90 : f32 to vector<4x256xf32>
    %222 = arith.select %220, %218, %221 : vector<4x256xi1>, vector<4x256xf32>
    %cst_91 = arith.constant 0.000000e+00 : f32
    %223 = vector.shape_cast %126 : vector<1x256xi1> to vector<1x256xi1>
    %224 = vector.broadcast %223 : vector<1x256xi1> to vector<4x256xi1>
    %225 = vector.broadcast %cst_91 : f32 to vector<4x256xf32>
    %226 = arith.select %224, %28, %225 : vector<4x256xi1>, vector<4x256xf32>
    %c255_i32 = arith.constant 255 : i32
    %227 = tpu.dynamic_rotate %28 by %c255_i32 dim 1 : vector<4x256xf32>, i32 -> vector<4x256xf32>
    %cst_92 = arith.constant 0.000000e+00 : f32
    %228 = vector.shape_cast %145 : vector<1x256xi1> to vector<1x256xi1>
    %229 = vector.broadcast %228 : vector<1x256xi1> to vector<4x256xi1>
    %230 = vector.broadcast %cst_92 : f32 to vector<4x256xf32>
    %231 = arith.select %229, %227, %230 : vector<4x256xi1>, vector<4x256xf32>
    %c241_i32 = arith.constant 241 : i32
    %232 = tpu.dynamic_rotate %28 by %c241_i32 dim 1 : vector<4x256xf32>, i32 -> vector<4x256xf32>
    %cst_93 = arith.constant 0.000000e+00 : f32
    %233 = vector.shape_cast %164 : vector<1x256xi1> to vector<1x256xi1>
    %234 = vector.broadcast %233 : vector<1x256xi1> to vector<4x256xi1>
    %235 = vector.broadcast %cst_93 : f32 to vector<4x256xf32>
    %236 = arith.select %234, %232, %235 : vector<4x256xi1>, vector<4x256xf32>
    %c240_i32 = arith.constant 240 : i32
    %237 = tpu.dynamic_rotate %28 by %c240_i32 dim 1 : vector<4x256xf32>, i32 -> vector<4x256xf32>
    %cst_94 = arith.constant 0.000000e+00 : f32
    %238 = vector.shape_cast %183 : vector<1x256xi1> to vector<1x256xi1>
    %239 = vector.broadcast %238 : vector<1x256xi1> to vector<4x256xi1>
    %240 = vector.broadcast %cst_94 : f32 to vector<4x256xf32>
    %241 = arith.select %239, %237, %240 : vector<4x256xi1>, vector<4x256xf32>
    %c239_i32 = arith.constant 239 : i32
    %242 = tpu.dynamic_rotate %28 by %c239_i32 dim 1 : vector<4x256xf32>, i32 -> vector<4x256xf32>
    %cst_95 = arith.constant 0.000000e+00 : f32
    %243 = vector.shape_cast %202 : vector<1x256xi1> to vector<1x256xi1>
    %244 = vector.broadcast %243 : vector<1x256xi1> to vector<4x256xi1>
    %245 = vector.broadcast %cst_95 : f32 to vector<4x256xf32>
    %246 = arith.select %244, %242, %245 : vector<4x256xi1>, vector<4x256xf32>
    %247 = tpu.concatenate %207, %212, %217, %222, %226, %231, %236, %241, %246 in 0 : vector<4x256xf32>, vector<4x256xf32>, vector<4x256xf32>, vector<4x256xf32>, vector<4x256xf32>, vector<4x256xf32>, vector<4x256xf32>, vector<4x256xf32>, vector<4x256xf32> -> vector<36x256xf32>
    %cst_96 = arith.constant dense<0.000000e+00> : vector<4x256xf32>
    %248 = tpu.matmul %29, %247, %cst_96 {dimension_numbers = #tpu.dot_dimension_numbers<[1], [0], [0], [1], [0, 0, 1, 1], [], []>} : vector<4x36xf32>, vector<36x256xf32>, vector<4x256xf32> -> vector<4x256xf32>
    %249 = vector.broadcast %30 : vector<4x1xf32> to vector<4x256xf32>
    %250 = arith.mulf %248, %249 : vector<4x256xf32>
    %251 = vector.broadcast %31 : vector<4x1xf32> to vector<4x256xf32>
    %252 = arith.addf %250, %251 : vector<4x256xf32>
    %c0_97 = arith.constant 0 : index
    %c0_98 = arith.constant 0 : index
    %253 = vector.load %arg8[%c0_97, %c0_98] : memref<2x16xf32, #tpu.memory_space<vmem>>, vector<2x16xf32>
    %c0_99 = arith.constant 0 : index
    %c0_100 = arith.constant 0 : index
    %254 = vector.load %arg9[%c0_99, %c0_100] : memref<2x1xf32, #tpu.memory_space<vmem>>, vector<2x1xf32>
    %c0_101 = arith.constant 0 : index
    %c0_102 = arith.constant 0 : index
    %255 = vector.load %arg10[%c0_101, %c0_102] : memref<2x1xf32, #tpu.memory_space<vmem>>, vector<2x1xf32>
    %cst_103 = arith.constant dense<0.000000e+00> : vector<2x256xf32>
    %256 = tpu.matmul %253, %1, %cst_103 {dimension_numbers = #tpu.dot_dimension_numbers<[1], [0], [0], [1], [0, 0, 1, 1], [], []>} : vector<2x16xf32>, vector<16x256xf32>, vector<2x256xf32> -> vector<2x256xf32>
    %257 = vector.broadcast %254 : vector<2x1xf32> to vector<2x256xf32>
    %258 = arith.mulf %256, %257 : vector<2x256xf32>
    %259 = vector.broadcast %255 : vector<2x1xf32> to vector<2x256xf32>
    %260 = arith.addf %258, %259 : vector<2x256xf32>
    %cst_104 = arith.constant 0.000000e+00 : f32
    %261 = vector.broadcast %cst_104 : f32 to vector<2x256xf32>
    %262 = arith.maximumf %260, %261 : vector<2x256xf32>
    %c0_105 = arith.constant 0 : index
    %c0_106 = arith.constant 0 : index
    %263 = vector.load %arg11[%c0_105, %c0_106] : memref<4x18xf32, #tpu.memory_space<vmem>>, vector<4x18xf32>
    %c0_107 = arith.constant 0 : index
    %c0_108 = arith.constant 0 : index
    %264 = vector.load %arg12[%c0_107, %c0_108] : memref<4x1xf32, #tpu.memory_space<vmem>>, vector<4x1xf32>
    %c0_109 = arith.constant 0 : index
    %c0_110 = arith.constant 0 : index
    %265 = vector.load %arg13[%c0_109, %c0_110] : memref<4x1xf32, #tpu.memory_space<vmem>>, vector<4x1xf32>
    %c17_i32_111 = arith.constant 17 : i32
    %266 = tpu.dynamic_rotate %262 by %c17_i32_111 dim 1 : vector<2x256xf32>, i32 -> vector<2x256xf32>
    %cst_112 = arith.constant 0.000000e+00 : f32
    %267 = vector.shape_cast %50 : vector<1x256xi1> to vector<1x256xi1>
    %268 = vector.broadcast %267 : vector<1x256xi1> to vector<2x256xi1>
    %269 = vector.broadcast %cst_112 : f32 to vector<2x256xf32>
    %270 = arith.select %268, %266, %269 : vector<2x256xi1>, vector<2x256xf32>
    %c16_i32_113 = arith.constant 16 : i32
    %271 = tpu.dynamic_rotate %262 by %c16_i32_113 dim 1 : vector<2x256xf32>, i32 -> vector<2x256xf32>
    %cst_114 = arith.constant 0.000000e+00 : f32
    %272 = vector.shape_cast %69 : vector<1x256xi1> to vector<1x256xi1>
    %273 = vector.broadcast %272 : vector<1x256xi1> to vector<2x256xi1>
    %274 = vector.broadcast %cst_114 : f32 to vector<2x256xf32>
    %275 = arith.select %273, %271, %274 : vector<2x256xi1>, vector<2x256xf32>
    %c15_i32_115 = arith.constant 15 : i32
    %276 = tpu.dynamic_rotate %262 by %c15_i32_115 dim 1 : vector<2x256xf32>, i32 -> vector<2x256xf32>
    %cst_116 = arith.constant 0.000000e+00 : f32
    %277 = vector.shape_cast %88 : vector<1x256xi1> to vector<1x256xi1>
    %278 = vector.broadcast %277 : vector<1x256xi1> to vector<2x256xi1>
    %279 = vector.broadcast %cst_116 : f32 to vector<2x256xf32>
    %280 = arith.select %278, %276, %279 : vector<2x256xi1>, vector<2x256xf32>
    %c1_i32_117 = arith.constant 1 : i32
    %281 = tpu.dynamic_rotate %262 by %c1_i32_117 dim 1 : vector<2x256xf32>, i32 -> vector<2x256xf32>
    %cst_118 = arith.constant 0.000000e+00 : f32
    %282 = vector.shape_cast %107 : vector<1x256xi1> to vector<1x256xi1>
    %283 = vector.broadcast %282 : vector<1x256xi1> to vector<2x256xi1>
    %284 = vector.broadcast %cst_118 : f32 to vector<2x256xf32>
    %285 = arith.select %283, %281, %284 : vector<2x256xi1>, vector<2x256xf32>
    %cst_119 = arith.constant 0.000000e+00 : f32
    %286 = vector.shape_cast %126 : vector<1x256xi1> to vector<1x256xi1>
    %287 = vector.broadcast %286 : vector<1x256xi1> to vector<2x256xi1>
    %288 = vector.broadcast %cst_119 : f32 to vector<2x256xf32>
    %289 = arith.select %287, %262, %288 : vector<2x256xi1>, vector<2x256xf32>
    %c255_i32_120 = arith.constant 255 : i32
    %290 = tpu.dynamic_rotate %262 by %c255_i32_120 dim 1 : vector<2x256xf32>, i32 -> vector<2x256xf32>
    %cst_121 = arith.constant 0.000000e+00 : f32
    %291 = vector.shape_cast %145 : vector<1x256xi1> to vector<1x256xi1>
    %292 = vector.broadcast %291 : vector<1x256xi1> to vector<2x256xi1>
    %293 = vector.broadcast %cst_121 : f32 to vector<2x256xf32>
    %294 = arith.select %292, %290, %293 : vector<2x256xi1>, vector<2x256xf32>
    %c241_i32_122 = arith.constant 241 : i32
    %295 = tpu.dynamic_rotate %262 by %c241_i32_122 dim 1 : vector<2x256xf32>, i32 -> vector<2x256xf32>
    %cst_123 = arith.constant 0.000000e+00 : f32
    %296 = vector.shape_cast %164 : vector<1x256xi1> to vector<1x256xi1>
    %297 = vector.broadcast %296 : vector<1x256xi1> to vector<2x256xi1>
    %298 = vector.broadcast %cst_123 : f32 to vector<2x256xf32>
    %299 = arith.select %297, %295, %298 : vector<2x256xi1>, vector<2x256xf32>
    %c240_i32_124 = arith.constant 240 : i32
    %300 = tpu.dynamic_rotate %262 by %c240_i32_124 dim 1 : vector<2x256xf32>, i32 -> vector<2x256xf32>
    %cst_125 = arith.constant 0.000000e+00 : f32
    %301 = vector.shape_cast %183 : vector<1x256xi1> to vector<1x256xi1>
    %302 = vector.broadcast %301 : vector<1x256xi1> to vector<2x256xi1>
    %303 = vector.broadcast %cst_125 : f32 to vector<2x256xf32>
    %304 = arith.select %302, %300, %303 : vector<2x256xi1>, vector<2x256xf32>
    %c239_i32_126 = arith.constant 239 : i32
    %305 = tpu.dynamic_rotate %262 by %c239_i32_126 dim 1 : vector<2x256xf32>, i32 -> vector<2x256xf32>
    %cst_127 = arith.constant 0.000000e+00 : f32
    %306 = vector.shape_cast %202 : vector<1x256xi1> to vector<1x256xi1>
    %307 = vector.broadcast %306 : vector<1x256xi1> to vector<2x256xi1>
    %308 = vector.broadcast %cst_127 : f32 to vector<2x256xf32>
    %309 = arith.select %307, %305, %308 : vector<2x256xi1>, vector<2x256xf32>
    %310 = tpu.concatenate %270, %275, %280, %285, %289, %294, %299, %304, %309 in 0 : vector<2x256xf32>, vector<2x256xf32>, vector<2x256xf32>, vector<2x256xf32>, vector<2x256xf32>, vector<2x256xf32>, vector<2x256xf32>, vector<2x256xf32>, vector<2x256xf32> -> vector<18x256xf32>
    %cst_128 = arith.constant dense<0.000000e+00> : vector<4x256xf32>
    %311 = tpu.matmul %263, %310, %cst_128 {dimension_numbers = #tpu.dot_dimension_numbers<[1], [0], [0], [1], [0, 0, 1, 1], [], []>} : vector<4x18xf32>, vector<18x256xf32>, vector<4x256xf32> -> vector<4x256xf32>
    %312 = vector.broadcast %264 : vector<4x1xf32> to vector<4x256xf32>
    %313 = arith.mulf %311, %312 : vector<4x256xf32>
    %314 = vector.broadcast %265 : vector<4x1xf32> to vector<4x256xf32>
    %315 = arith.addf %313, %314 : vector<4x256xf32>
    %cst_129 = arith.constant 0.000000e+00 : f32
    %316 = vector.broadcast %cst_129 : f32 to vector<4x256xf32>
    %317 = arith.maximumf %315, %316 : vector<4x256xf32>
    %c0_130 = arith.constant 0 : index
    %c0_131 = arith.constant 0 : index
    %318 = vector.load %arg14[%c0_130, %c0_131] : memref<4x36xf32, #tpu.memory_space<vmem>>, vector<4x36xf32>
    %c0_132 = arith.constant 0 : index
    %c0_133 = arith.constant 0 : index
    %319 = vector.load %arg15[%c0_132, %c0_133] : memref<4x1xf32, #tpu.memory_space<vmem>>, vector<4x1xf32>
    %c0_134 = arith.constant 0 : index
    %c0_135 = arith.constant 0 : index
    %320 = vector.load %arg16[%c0_134, %c0_135] : memref<4x1xf32, #tpu.memory_space<vmem>>, vector<4x1xf32>
    %c-2_i32 = arith.constant -2 : i32
    %321 = vector.broadcast %c-2_i32 : i32 to vector<1x256xi32>
    %322 = arith.addi %18, %321 : vector<1x256xi32>
    %c0_i32_136 = arith.constant 0 : i32
    %323 = vector.broadcast %c0_i32_136 : i32 to vector<1x256xi32>
    %324 = arith.cmpi sge, %322, %323 : vector<1x256xi32>
    %c-2_i32_137 = arith.constant -2 : i32
    %325 = vector.broadcast %c-2_i32_137 : i32 to vector<1x256xi32>
    %326 = arith.addi %18, %325 : vector<1x256xi32>
    %c16_i32_138 = arith.constant 16 : i32
    %327 = vector.broadcast %c16_i32_138 : i32 to vector<1x256xi32>
    %328 = arith.cmpi slt, %326, %327 : vector<1x256xi32>
    %329 = arith.andi %324, %328 : vector<1x256xi1>
    %c-34_i32 = arith.constant -34 : i32
    %330 = vector.broadcast %c-34_i32 : i32 to vector<1x256xi32>
    %331 = arith.addi %2, %330 : vector<1x256xi32>
    %c0_i32_139 = arith.constant 0 : i32
    %332 = vector.broadcast %c0_i32_139 : i32 to vector<1x256xi32>
    %333 = arith.cmpi sge, %331, %332 : vector<1x256xi32>
    %334 = arith.andi %329, %333 : vector<1x256xi1>
    %c-34_i32_140 = arith.constant -34 : i32
    %335 = vector.broadcast %c-34_i32_140 : i32 to vector<1x256xi32>
    %336 = arith.addi %2, %335 : vector<1x256xi32>
    %c256_i32_141 = arith.constant 256 : i32
    %337 = vector.broadcast %c256_i32_141 : i32 to vector<1x256xi32>
    %338 = arith.cmpi slt, %336, %337 : vector<1x256xi32>
    %339 = arith.andi %334, %338 : vector<1x256xi1>
    %c0_i32_142 = arith.constant 0 : i32
    %340 = vector.broadcast %c0_i32_142 : i32 to vector<1x256xi32>
    %341 = arith.addi %18, %340 : vector<1x256xi32>
    %c0_i32_143 = arith.constant 0 : i32
    %342 = vector.broadcast %c0_i32_143 : i32 to vector<1x256xi32>
    %343 = arith.cmpi sge, %341, %342 : vector<1x256xi32>
    %c0_i32_144 = arith.constant 0 : i32
    %344 = vector.broadcast %c0_i32_144 : i32 to vector<1x256xi32>
    %345 = arith.addi %18, %344 : vector<1x256xi32>
    %c16_i32_145 = arith.constant 16 : i32
    %346 = vector.broadcast %c16_i32_145 : i32 to vector<1x256xi32>
    %347 = arith.cmpi slt, %345, %346 : vector<1x256xi32>
    %348 = arith.andi %343, %347 : vector<1x256xi1>
    %c-32_i32 = arith.constant -32 : i32
    %349 = vector.broadcast %c-32_i32 : i32 to vector<1x256xi32>
    %350 = arith.addi %2, %349 : vector<1x256xi32>
    %c0_i32_146 = arith.constant 0 : i32
    %351 = vector.broadcast %c0_i32_146 : i32 to vector<1x256xi32>
    %352 = arith.cmpi sge, %350, %351 : vector<1x256xi32>
    %353 = arith.andi %348, %352 : vector<1x256xi1>
    %c-32_i32_147 = arith.constant -32 : i32
    %354 = vector.broadcast %c-32_i32_147 : i32 to vector<1x256xi32>
    %355 = arith.addi %2, %354 : vector<1x256xi32>
    %c256_i32_148 = arith.constant 256 : i32
    %356 = vector.broadcast %c256_i32_148 : i32 to vector<1x256xi32>
    %357 = arith.cmpi slt, %355, %356 : vector<1x256xi32>
    %358 = arith.andi %353, %357 : vector<1x256xi1>
    %c2_i32 = arith.constant 2 : i32
    %359 = vector.broadcast %c2_i32 : i32 to vector<1x256xi32>
    %360 = arith.addi %18, %359 : vector<1x256xi32>
    %c0_i32_149 = arith.constant 0 : i32
    %361 = vector.broadcast %c0_i32_149 : i32 to vector<1x256xi32>
    %362 = arith.cmpi sge, %360, %361 : vector<1x256xi32>
    %c2_i32_150 = arith.constant 2 : i32
    %363 = vector.broadcast %c2_i32_150 : i32 to vector<1x256xi32>
    %364 = arith.addi %18, %363 : vector<1x256xi32>
    %c16_i32_151 = arith.constant 16 : i32
    %365 = vector.broadcast %c16_i32_151 : i32 to vector<1x256xi32>
    %366 = arith.cmpi slt, %364, %365 : vector<1x256xi32>
    %367 = arith.andi %362, %366 : vector<1x256xi1>
    %c-30_i32 = arith.constant -30 : i32
    %368 = vector.broadcast %c-30_i32 : i32 to vector<1x256xi32>
    %369 = arith.addi %2, %368 : vector<1x256xi32>
    %c0_i32_152 = arith.constant 0 : i32
    %370 = vector.broadcast %c0_i32_152 : i32 to vector<1x256xi32>
    %371 = arith.cmpi sge, %369, %370 : vector<1x256xi32>
    %372 = arith.andi %367, %371 : vector<1x256xi1>
    %c-30_i32_153 = arith.constant -30 : i32
    %373 = vector.broadcast %c-30_i32_153 : i32 to vector<1x256xi32>
    %374 = arith.addi %2, %373 : vector<1x256xi32>
    %c256_i32_154 = arith.constant 256 : i32
    %375 = vector.broadcast %c256_i32_154 : i32 to vector<1x256xi32>
    %376 = arith.cmpi slt, %374, %375 : vector<1x256xi32>
    %377 = arith.andi %372, %376 : vector<1x256xi1>
    %c-2_i32_155 = arith.constant -2 : i32
    %378 = vector.broadcast %c-2_i32_155 : i32 to vector<1x256xi32>
    %379 = arith.addi %18, %378 : vector<1x256xi32>
    %c0_i32_156 = arith.constant 0 : i32
    %380 = vector.broadcast %c0_i32_156 : i32 to vector<1x256xi32>
    %381 = arith.cmpi sge, %379, %380 : vector<1x256xi32>
    %c-2_i32_157 = arith.constant -2 : i32
    %382 = vector.broadcast %c-2_i32_157 : i32 to vector<1x256xi32>
    %383 = arith.addi %18, %382 : vector<1x256xi32>
    %c16_i32_158 = arith.constant 16 : i32
    %384 = vector.broadcast %c16_i32_158 : i32 to vector<1x256xi32>
    %385 = arith.cmpi slt, %383, %384 : vector<1x256xi32>
    %386 = arith.andi %381, %385 : vector<1x256xi1>
    %c-2_i32_159 = arith.constant -2 : i32
    %387 = vector.broadcast %c-2_i32_159 : i32 to vector<1x256xi32>
    %388 = arith.addi %2, %387 : vector<1x256xi32>
    %c0_i32_160 = arith.constant 0 : i32
    %389 = vector.broadcast %c0_i32_160 : i32 to vector<1x256xi32>
    %390 = arith.cmpi sge, %388, %389 : vector<1x256xi32>
    %391 = arith.andi %386, %390 : vector<1x256xi1>
    %c-2_i32_161 = arith.constant -2 : i32
    %392 = vector.broadcast %c-2_i32_161 : i32 to vector<1x256xi32>
    %393 = arith.addi %2, %392 : vector<1x256xi32>
    %c256_i32_162 = arith.constant 256 : i32
    %394 = vector.broadcast %c256_i32_162 : i32 to vector<1x256xi32>
    %395 = arith.cmpi slt, %393, %394 : vector<1x256xi32>
    %396 = arith.andi %391, %395 : vector<1x256xi1>
    %c0_i32_163 = arith.constant 0 : i32
    %397 = vector.broadcast %c0_i32_163 : i32 to vector<1x256xi32>
    %398 = arith.addi %18, %397 : vector<1x256xi32>
    %c0_i32_164 = arith.constant 0 : i32
    %399 = vector.broadcast %c0_i32_164 : i32 to vector<1x256xi32>
    %400 = arith.cmpi sge, %398, %399 : vector<1x256xi32>
    %c0_i32_165 = arith.constant 0 : i32
    %401 = vector.broadcast %c0_i32_165 : i32 to vector<1x256xi32>
    %402 = arith.addi %18, %401 : vector<1x256xi32>
    %c16_i32_166 = arith.constant 16 : i32
    %403 = vector.broadcast %c16_i32_166 : i32 to vector<1x256xi32>
    %404 = arith.cmpi slt, %402, %403 : vector<1x256xi32>
    %405 = arith.andi %400, %404 : vector<1x256xi1>
    %c0_i32_167 = arith.constant 0 : i32
    %406 = vector.broadcast %c0_i32_167 : i32 to vector<1x256xi32>
    %407 = arith.addi %2, %406 : vector<1x256xi32>
    %c0_i32_168 = arith.constant 0 : i32
    %408 = vector.broadcast %c0_i32_168 : i32 to vector<1x256xi32>
    %409 = arith.cmpi sge, %407, %408 : vector<1x256xi32>
    %410 = arith.andi %405, %409 : vector<1x256xi1>
    %c0_i32_169 = arith.constant 0 : i32
    %411 = vector.broadcast %c0_i32_169 : i32 to vector<1x256xi32>
    %412 = arith.addi %2, %411 : vector<1x256xi32>
    %c256_i32_170 = arith.constant 256 : i32
    %413 = vector.broadcast %c256_i32_170 : i32 to vector<1x256xi32>
    %414 = arith.cmpi slt, %412, %413 : vector<1x256xi32>
    %415 = arith.andi %410, %414 : vector<1x256xi1>
    %c2_i32_171 = arith.constant 2 : i32
    %416 = vector.broadcast %c2_i32_171 : i32 to vector<1x256xi32>
    %417 = arith.addi %18, %416 : vector<1x256xi32>
    %c0_i32_172 = arith.constant 0 : i32
    %418 = vector.broadcast %c0_i32_172 : i32 to vector<1x256xi32>
    %419 = arith.cmpi sge, %417, %418 : vector<1x256xi32>
    %c2_i32_173 = arith.constant 2 : i32
    %420 = vector.broadcast %c2_i32_173 : i32 to vector<1x256xi32>
    %421 = arith.addi %18, %420 : vector<1x256xi32>
    %c16_i32_174 = arith.constant 16 : i32
    %422 = vector.broadcast %c16_i32_174 : i32 to vector<1x256xi32>
    %423 = arith.cmpi slt, %421, %422 : vector<1x256xi32>
    %424 = arith.andi %419, %423 : vector<1x256xi1>
    %c2_i32_175 = arith.constant 2 : i32
    %425 = vector.broadcast %c2_i32_175 : i32 to vector<1x256xi32>
    %426 = arith.addi %2, %425 : vector<1x256xi32>
    %c0_i32_176 = arith.constant 0 : i32
    %427 = vector.broadcast %c0_i32_176 : i32 to vector<1x256xi32>
    %428 = arith.cmpi sge, %426, %427 : vector<1x256xi32>
    %429 = arith.andi %424, %428 : vector<1x256xi1>
    %c2_i32_177 = arith.constant 2 : i32
    %430 = vector.broadcast %c2_i32_177 : i32 to vector<1x256xi32>
    %431 = arith.addi %2, %430 : vector<1x256xi32>
    %c256_i32_178 = arith.constant 256 : i32
    %432 = vector.broadcast %c256_i32_178 : i32 to vector<1x256xi32>
    %433 = arith.cmpi slt, %431, %432 : vector<1x256xi32>
    %434 = arith.andi %429, %433 : vector<1x256xi1>
    %c-2_i32_179 = arith.constant -2 : i32
    %435 = vector.broadcast %c-2_i32_179 : i32 to vector<1x256xi32>
    %436 = arith.addi %18, %435 : vector<1x256xi32>
    %c0_i32_180 = arith.constant 0 : i32
    %437 = vector.broadcast %c0_i32_180 : i32 to vector<1x256xi32>
    %438 = arith.cmpi sge, %436, %437 : vector<1x256xi32>
    %c-2_i32_181 = arith.constant -2 : i32
    %439 = vector.broadcast %c-2_i32_181 : i32 to vector<1x256xi32>
    %440 = arith.addi %18, %439 : vector<1x256xi32>
    %c16_i32_182 = arith.constant 16 : i32
    %441 = vector.broadcast %c16_i32_182 : i32 to vector<1x256xi32>
    %442 = arith.cmpi slt, %440, %441 : vector<1x256xi32>
    %443 = arith.andi %438, %442 : vector<1x256xi1>
    %c30_i32 = arith.constant 30 : i32
    %444 = vector.broadcast %c30_i32 : i32 to vector<1x256xi32>
    %445 = arith.addi %2, %444 : vector<1x256xi32>
    %c0_i32_183 = arith.constant 0 : i32
    %446 = vector.broadcast %c0_i32_183 : i32 to vector<1x256xi32>
    %447 = arith.cmpi sge, %445, %446 : vector<1x256xi32>
    %448 = arith.andi %443, %447 : vector<1x256xi1>
    %c30_i32_184 = arith.constant 30 : i32
    %449 = vector.broadcast %c30_i32_184 : i32 to vector<1x256xi32>
    %450 = arith.addi %2, %449 : vector<1x256xi32>
    %c256_i32_185 = arith.constant 256 : i32
    %451 = vector.broadcast %c256_i32_185 : i32 to vector<1x256xi32>
    %452 = arith.cmpi slt, %450, %451 : vector<1x256xi32>
    %453 = arith.andi %448, %452 : vector<1x256xi1>
    %c0_i32_186 = arith.constant 0 : i32
    %454 = vector.broadcast %c0_i32_186 : i32 to vector<1x256xi32>
    %455 = arith.addi %18, %454 : vector<1x256xi32>
    %c0_i32_187 = arith.constant 0 : i32
    %456 = vector.broadcast %c0_i32_187 : i32 to vector<1x256xi32>
    %457 = arith.cmpi sge, %455, %456 : vector<1x256xi32>
    %c0_i32_188 = arith.constant 0 : i32
    %458 = vector.broadcast %c0_i32_188 : i32 to vector<1x256xi32>
    %459 = arith.addi %18, %458 : vector<1x256xi32>
    %c16_i32_189 = arith.constant 16 : i32
    %460 = vector.broadcast %c16_i32_189 : i32 to vector<1x256xi32>
    %461 = arith.cmpi slt, %459, %460 : vector<1x256xi32>
    %462 = arith.andi %457, %461 : vector<1x256xi1>
    %c32_i32 = arith.constant 32 : i32
    %463 = vector.broadcast %c32_i32 : i32 to vector<1x256xi32>
    %464 = arith.addi %2, %463 : vector<1x256xi32>
    %c0_i32_190 = arith.constant 0 : i32
    %465 = vector.broadcast %c0_i32_190 : i32 to vector<1x256xi32>
    %466 = arith.cmpi sge, %464, %465 : vector<1x256xi32>
    %467 = arith.andi %462, %466 : vector<1x256xi1>
    %c32_i32_191 = arith.constant 32 : i32
    %468 = vector.broadcast %c32_i32_191 : i32 to vector<1x256xi32>
    %469 = arith.addi %2, %468 : vector<1x256xi32>
    %c256_i32_192 = arith.constant 256 : i32
    %470 = vector.broadcast %c256_i32_192 : i32 to vector<1x256xi32>
    %471 = arith.cmpi slt, %469, %470 : vector<1x256xi32>
    %472 = arith.andi %467, %471 : vector<1x256xi1>
    %c2_i32_193 = arith.constant 2 : i32
    %473 = vector.broadcast %c2_i32_193 : i32 to vector<1x256xi32>
    %474 = arith.addi %18, %473 : vector<1x256xi32>
    %c0_i32_194 = arith.constant 0 : i32
    %475 = vector.broadcast %c0_i32_194 : i32 to vector<1x256xi32>
    %476 = arith.cmpi sge, %474, %475 : vector<1x256xi32>
    %c2_i32_195 = arith.constant 2 : i32
    %477 = vector.broadcast %c2_i32_195 : i32 to vector<1x256xi32>
    %478 = arith.addi %18, %477 : vector<1x256xi32>
    %c16_i32_196 = arith.constant 16 : i32
    %479 = vector.broadcast %c16_i32_196 : i32 to vector<1x256xi32>
    %480 = arith.cmpi slt, %478, %479 : vector<1x256xi32>
    %481 = arith.andi %476, %480 : vector<1x256xi1>
    %c34_i32 = arith.constant 34 : i32
    %482 = vector.broadcast %c34_i32 : i32 to vector<1x256xi32>
    %483 = arith.addi %2, %482 : vector<1x256xi32>
    %c0_i32_197 = arith.constant 0 : i32
    %484 = vector.broadcast %c0_i32_197 : i32 to vector<1x256xi32>
    %485 = arith.cmpi sge, %483, %484 : vector<1x256xi32>
    %486 = arith.andi %481, %485 : vector<1x256xi1>
    %c34_i32_198 = arith.constant 34 : i32
    %487 = vector.broadcast %c34_i32_198 : i32 to vector<1x256xi32>
    %488 = arith.addi %2, %487 : vector<1x256xi32>
    %c256_i32_199 = arith.constant 256 : i32
    %489 = vector.broadcast %c256_i32_199 : i32 to vector<1x256xi32>
    %490 = arith.cmpi slt, %488, %489 : vector<1x256xi32>
    %491 = arith.andi %486, %490 : vector<1x256xi1>
    %c34_i32_200 = arith.constant 34 : i32
    %492 = tpu.dynamic_rotate %317 by %c34_i32_200 dim 1 : vector<4x256xf32>, i32 -> vector<4x256xf32>
    %cst_201 = arith.constant 0.000000e+00 : f32
    %493 = vector.shape_cast %339 : vector<1x256xi1> to vector<1x256xi1>
    %494 = vector.broadcast %493 : vector<1x256xi1> to vector<4x256xi1>
    %495 = vector.broadcast %cst_201 : f32 to vector<4x256xf32>
    %496 = arith.select %494, %492, %495 : vector<4x256xi1>, vector<4x256xf32>
    %c32_i32_202 = arith.constant 32 : i32
    %497 = tpu.dynamic_rotate %317 by %c32_i32_202 dim 1 : vector<4x256xf32>, i32 -> vector<4x256xf32>
    %cst_203 = arith.constant 0.000000e+00 : f32
    %498 = vector.shape_cast %358 : vector<1x256xi1> to vector<1x256xi1>
    %499 = vector.broadcast %498 : vector<1x256xi1> to vector<4x256xi1>
    %500 = vector.broadcast %cst_203 : f32 to vector<4x256xf32>
    %501 = arith.select %499, %497, %500 : vector<4x256xi1>, vector<4x256xf32>
    %c30_i32_204 = arith.constant 30 : i32
    %502 = tpu.dynamic_rotate %317 by %c30_i32_204 dim 1 : vector<4x256xf32>, i32 -> vector<4x256xf32>
    %cst_205 = arith.constant 0.000000e+00 : f32
    %503 = vector.shape_cast %377 : vector<1x256xi1> to vector<1x256xi1>
    %504 = vector.broadcast %503 : vector<1x256xi1> to vector<4x256xi1>
    %505 = vector.broadcast %cst_205 : f32 to vector<4x256xf32>
    %506 = arith.select %504, %502, %505 : vector<4x256xi1>, vector<4x256xf32>
    %c2_i32_206 = arith.constant 2 : i32
    %507 = tpu.dynamic_rotate %317 by %c2_i32_206 dim 1 : vector<4x256xf32>, i32 -> vector<4x256xf32>
    %cst_207 = arith.constant 0.000000e+00 : f32
    %508 = vector.shape_cast %396 : vector<1x256xi1> to vector<1x256xi1>
    %509 = vector.broadcast %508 : vector<1x256xi1> to vector<4x256xi1>
    %510 = vector.broadcast %cst_207 : f32 to vector<4x256xf32>
    %511 = arith.select %509, %507, %510 : vector<4x256xi1>, vector<4x256xf32>
    %cst_208 = arith.constant 0.000000e+00 : f32
    %512 = vector.shape_cast %415 : vector<1x256xi1> to vector<1x256xi1>
    %513 = vector.broadcast %512 : vector<1x256xi1> to vector<4x256xi1>
    %514 = vector.broadcast %cst_208 : f32 to vector<4x256xf32>
    %515 = arith.select %513, %317, %514 : vector<4x256xi1>, vector<4x256xf32>
    %c254_i32 = arith.constant 254 : i32
    %516 = tpu.dynamic_rotate %317 by %c254_i32 dim 1 : vector<4x256xf32>, i32 -> vector<4x256xf32>
    %cst_209 = arith.constant 0.000000e+00 : f32
    %517 = vector.shape_cast %434 : vector<1x256xi1> to vector<1x256xi1>
    %518 = vector.broadcast %517 : vector<1x256xi1> to vector<4x256xi1>
    %519 = vector.broadcast %cst_209 : f32 to vector<4x256xf32>
    %520 = arith.select %518, %516, %519 : vector<4x256xi1>, vector<4x256xf32>
    %c226_i32 = arith.constant 226 : i32
    %521 = tpu.dynamic_rotate %317 by %c226_i32 dim 1 : vector<4x256xf32>, i32 -> vector<4x256xf32>
    %cst_210 = arith.constant 0.000000e+00 : f32
    %522 = vector.shape_cast %453 : vector<1x256xi1> to vector<1x256xi1>
    %523 = vector.broadcast %522 : vector<1x256xi1> to vector<4x256xi1>
    %524 = vector.broadcast %cst_210 : f32 to vector<4x256xf32>
    %525 = arith.select %523, %521, %524 : vector<4x256xi1>, vector<4x256xf32>
    %c224_i32 = arith.constant 224 : i32
    %526 = tpu.dynamic_rotate %317 by %c224_i32 dim 1 : vector<4x256xf32>, i32 -> vector<4x256xf32>
    %cst_211 = arith.constant 0.000000e+00 : f32
    %527 = vector.shape_cast %472 : vector<1x256xi1> to vector<1x256xi1>
    %528 = vector.broadcast %527 : vector<1x256xi1> to vector<4x256xi1>
    %529 = vector.broadcast %cst_211 : f32 to vector<4x256xf32>
    %530 = arith.select %528, %526, %529 : vector<4x256xi1>, vector<4x256xf32>
    %c222_i32 = arith.constant 222 : i32
    %531 = tpu.dynamic_rotate %317 by %c222_i32 dim 1 : vector<4x256xf32>, i32 -> vector<4x256xf32>
    %cst_212 = arith.constant 0.000000e+00 : f32
    %532 = vector.shape_cast %491 : vector<1x256xi1> to vector<1x256xi1>
    %533 = vector.broadcast %532 : vector<1x256xi1> to vector<4x256xi1>
    %534 = vector.broadcast %cst_212 : f32 to vector<4x256xf32>
    %535 = arith.select %533, %531, %534 : vector<4x256xi1>, vector<4x256xf32>
    %536 = tpu.concatenate %496, %501, %506, %511, %515, %520, %525, %530, %535 in 0 : vector<4x256xf32>, vector<4x256xf32>, vector<4x256xf32>, vector<4x256xf32>, vector<4x256xf32>, vector<4x256xf32>, vector<4x256xf32>, vector<4x256xf32>, vector<4x256xf32> -> vector<36x256xf32>
    %cst_213 = arith.constant dense<0.000000e+00> : vector<4x256xf32>
    %537 = tpu.matmul %318, %536, %cst_213 {dimension_numbers = #tpu.dot_dimension_numbers<[1], [0], [0], [1], [0, 0, 1, 1], [], []>} : vector<4x36xf32>, vector<36x256xf32>, vector<4x256xf32> -> vector<4x256xf32>
    %538 = vector.broadcast %319 : vector<4x1xf32> to vector<4x256xf32>
    %539 = arith.mulf %537, %538 : vector<4x256xf32>
    %540 = vector.broadcast %320 : vector<4x1xf32> to vector<4x256xf32>
    %541 = arith.addf %539, %540 : vector<4x256xf32>
    %c0_214 = arith.constant 0 : index
    %c0_215 = arith.constant 0 : index
    %542 = vector.load %arg17[%c0_214, %c0_215] : memref<2x16xf32, #tpu.memory_space<vmem>>, vector<2x16xf32>
    %c0_216 = arith.constant 0 : index
    %c0_217 = arith.constant 0 : index
    %543 = vector.load %arg18[%c0_216, %c0_217] : memref<2x1xf32, #tpu.memory_space<vmem>>, vector<2x1xf32>
    %c0_218 = arith.constant 0 : index
    %c0_219 = arith.constant 0 : index
    %544 = vector.load %arg19[%c0_218, %c0_219] : memref<2x1xf32, #tpu.memory_space<vmem>>, vector<2x1xf32>
    %cst_220 = arith.constant dense<0.000000e+00> : vector<2x256xf32>
    %545 = tpu.matmul %542, %1, %cst_220 {dimension_numbers = #tpu.dot_dimension_numbers<[1], [0], [0], [1], [0, 0, 1, 1], [], []>} : vector<2x16xf32>, vector<16x256xf32>, vector<2x256xf32> -> vector<2x256xf32>
    %546 = vector.broadcast %543 : vector<2x1xf32> to vector<2x256xf32>
    %547 = arith.mulf %545, %546 : vector<2x256xf32>
    %548 = vector.broadcast %544 : vector<2x1xf32> to vector<2x256xf32>
    %549 = arith.addf %547, %548 : vector<2x256xf32>
    %cst_221 = arith.constant 0.000000e+00 : f32
    %550 = vector.broadcast %cst_221 : f32 to vector<2x256xf32>
    %551 = arith.maximumf %549, %550 : vector<2x256xf32>
    %c0_222 = arith.constant 0 : index
    %c0_223 = arith.constant 0 : index
    %552 = vector.load %arg20[%c0_222, %c0_223] : memref<3x18xf32, #tpu.memory_space<vmem>>, vector<3x18xf32>
    %c0_224 = arith.constant 0 : index
    %c0_225 = arith.constant 0 : index
    %553 = vector.load %arg21[%c0_224, %c0_225] : memref<3x1xf32, #tpu.memory_space<vmem>>, vector<3x1xf32>
    %c0_226 = arith.constant 0 : index
    %c0_227 = arith.constant 0 : index
    %554 = vector.load %arg22[%c0_226, %c0_227] : memref<3x1xf32, #tpu.memory_space<vmem>>, vector<3x1xf32>
    %c17_i32_228 = arith.constant 17 : i32
    %555 = tpu.dynamic_rotate %551 by %c17_i32_228 dim 1 : vector<2x256xf32>, i32 -> vector<2x256xf32>
    %cst_229 = arith.constant 0.000000e+00 : f32
    %556 = vector.shape_cast %50 : vector<1x256xi1> to vector<1x256xi1>
    %557 = vector.broadcast %556 : vector<1x256xi1> to vector<2x256xi1>
    %558 = vector.broadcast %cst_229 : f32 to vector<2x256xf32>
    %559 = arith.select %557, %555, %558 : vector<2x256xi1>, vector<2x256xf32>
    %c16_i32_230 = arith.constant 16 : i32
    %560 = tpu.dynamic_rotate %551 by %c16_i32_230 dim 1 : vector<2x256xf32>, i32 -> vector<2x256xf32>
    %cst_231 = arith.constant 0.000000e+00 : f32
    %561 = vector.shape_cast %69 : vector<1x256xi1> to vector<1x256xi1>
    %562 = vector.broadcast %561 : vector<1x256xi1> to vector<2x256xi1>
    %563 = vector.broadcast %cst_231 : f32 to vector<2x256xf32>
    %564 = arith.select %562, %560, %563 : vector<2x256xi1>, vector<2x256xf32>
    %c15_i32_232 = arith.constant 15 : i32
    %565 = tpu.dynamic_rotate %551 by %c15_i32_232 dim 1 : vector<2x256xf32>, i32 -> vector<2x256xf32>
    %cst_233 = arith.constant 0.000000e+00 : f32
    %566 = vector.shape_cast %88 : vector<1x256xi1> to vector<1x256xi1>
    %567 = vector.broadcast %566 : vector<1x256xi1> to vector<2x256xi1>
    %568 = vector.broadcast %cst_233 : f32 to vector<2x256xf32>
    %569 = arith.select %567, %565, %568 : vector<2x256xi1>, vector<2x256xf32>
    %c1_i32_234 = arith.constant 1 : i32
    %570 = tpu.dynamic_rotate %551 by %c1_i32_234 dim 1 : vector<2x256xf32>, i32 -> vector<2x256xf32>
    %cst_235 = arith.constant 0.000000e+00 : f32
    %571 = vector.shape_cast %107 : vector<1x256xi1> to vector<1x256xi1>
    %572 = vector.broadcast %571 : vector<1x256xi1> to vector<2x256xi1>
    %573 = vector.broadcast %cst_235 : f32 to vector<2x256xf32>
    %574 = arith.select %572, %570, %573 : vector<2x256xi1>, vector<2x256xf32>
    %cst_236 = arith.constant 0.000000e+00 : f32
    %575 = vector.shape_cast %126 : vector<1x256xi1> to vector<1x256xi1>
    %576 = vector.broadcast %575 : vector<1x256xi1> to vector<2x256xi1>
    %577 = vector.broadcast %cst_236 : f32 to vector<2x256xf32>
    %578 = arith.select %576, %551, %577 : vector<2x256xi1>, vector<2x256xf32>
    %c255_i32_237 = arith.constant 255 : i32
    %579 = tpu.dynamic_rotate %551 by %c255_i32_237 dim 1 : vector<2x256xf32>, i32 -> vector<2x256xf32>
    %cst_238 = arith.constant 0.000000e+00 : f32
    %580 = vector.shape_cast %145 : vector<1x256xi1> to vector<1x256xi1>
    %581 = vector.broadcast %580 : vector<1x256xi1> to vector<2x256xi1>
    %582 = vector.broadcast %cst_238 : f32 to vector<2x256xf32>
    %583 = arith.select %581, %579, %582 : vector<2x256xi1>, vector<2x256xf32>
    %c241_i32_239 = arith.constant 241 : i32
    %584 = tpu.dynamic_rotate %551 by %c241_i32_239 dim 1 : vector<2x256xf32>, i32 -> vector<2x256xf32>
    %cst_240 = arith.constant 0.000000e+00 : f32
    %585 = vector.shape_cast %164 : vector<1x256xi1> to vector<1x256xi1>
    %586 = vector.broadcast %585 : vector<1x256xi1> to vector<2x256xi1>
    %587 = vector.broadcast %cst_240 : f32 to vector<2x256xf32>
    %588 = arith.select %586, %584, %587 : vector<2x256xi1>, vector<2x256xf32>
    %c240_i32_241 = arith.constant 240 : i32
    %589 = tpu.dynamic_rotate %551 by %c240_i32_241 dim 1 : vector<2x256xf32>, i32 -> vector<2x256xf32>
    %cst_242 = arith.constant 0.000000e+00 : f32
    %590 = vector.shape_cast %183 : vector<1x256xi1> to vector<1x256xi1>
    %591 = vector.broadcast %590 : vector<1x256xi1> to vector<2x256xi1>
    %592 = vector.broadcast %cst_242 : f32 to vector<2x256xf32>
    %593 = arith.select %591, %589, %592 : vector<2x256xi1>, vector<2x256xf32>
    %c239_i32_243 = arith.constant 239 : i32
    %594 = tpu.dynamic_rotate %551 by %c239_i32_243 dim 1 : vector<2x256xf32>, i32 -> vector<2x256xf32>
    %cst_244 = arith.constant 0.000000e+00 : f32
    %595 = vector.shape_cast %202 : vector<1x256xi1> to vector<1x256xi1>
    %596 = vector.broadcast %595 : vector<1x256xi1> to vector<2x256xi1>
    %597 = vector.broadcast %cst_244 : f32 to vector<2x256xf32>
    %598 = arith.select %596, %594, %597 : vector<2x256xi1>, vector<2x256xf32>
    %599 = tpu.concatenate %559, %564, %569, %574, %578, %583, %588, %593, %598 in 0 : vector<2x256xf32>, vector<2x256xf32>, vector<2x256xf32>, vector<2x256xf32>, vector<2x256xf32>, vector<2x256xf32>, vector<2x256xf32>, vector<2x256xf32>, vector<2x256xf32> -> vector<18x256xf32>
    %cst_245 = arith.constant dense<0.000000e+00> : vector<3x256xf32>
    %600 = tpu.matmul %552, %599, %cst_245 {dimension_numbers = #tpu.dot_dimension_numbers<[1], [0], [0], [1], [0, 0, 1, 1], [], []>} : vector<3x18xf32>, vector<18x256xf32>, vector<3x256xf32> -> vector<3x256xf32>
    %601 = vector.broadcast %553 : vector<3x1xf32> to vector<3x256xf32>
    %602 = arith.mulf %600, %601 : vector<3x256xf32>
    %603 = vector.broadcast %554 : vector<3x1xf32> to vector<3x256xf32>
    %604 = arith.addf %602, %603 : vector<3x256xf32>
    %cst_246 = arith.constant 0.000000e+00 : f32
    %605 = vector.broadcast %cst_246 : f32 to vector<3x256xf32>
    %606 = arith.maximumf %604, %605 : vector<3x256xf32>
    %c0_247 = arith.constant 0 : index
    %c0_248 = arith.constant 0 : index
    %607 = vector.load %arg23[%c0_247, %c0_248] : memref<4x27xf32, #tpu.memory_space<vmem>>, vector<4x27xf32>
    %c0_249 = arith.constant 0 : index
    %c0_250 = arith.constant 0 : index
    %608 = vector.load %arg24[%c0_249, %c0_250] : memref<4x1xf32, #tpu.memory_space<vmem>>, vector<4x1xf32>
    %c0_251 = arith.constant 0 : index
    %c0_252 = arith.constant 0 : index
    %609 = vector.load %arg25[%c0_251, %c0_252] : memref<4x1xf32, #tpu.memory_space<vmem>>, vector<4x1xf32>
    %c17_i32_253 = arith.constant 17 : i32
    %610 = tpu.dynamic_rotate %606 by %c17_i32_253 dim 1 : vector<3x256xf32>, i32 -> vector<3x256xf32>
    %cst_254 = arith.constant 0.000000e+00 : f32
    %611 = vector.shape_cast %50 : vector<1x256xi1> to vector<1x256xi1>
    %612 = vector.broadcast %611 : vector<1x256xi1> to vector<3x256xi1>
    %613 = vector.broadcast %cst_254 : f32 to vector<3x256xf32>
    %614 = arith.select %612, %610, %613 : vector<3x256xi1>, vector<3x256xf32>
    %c16_i32_255 = arith.constant 16 : i32
    %615 = tpu.dynamic_rotate %606 by %c16_i32_255 dim 1 : vector<3x256xf32>, i32 -> vector<3x256xf32>
    %cst_256 = arith.constant 0.000000e+00 : f32
    %616 = vector.shape_cast %69 : vector<1x256xi1> to vector<1x256xi1>
    %617 = vector.broadcast %616 : vector<1x256xi1> to vector<3x256xi1>
    %618 = vector.broadcast %cst_256 : f32 to vector<3x256xf32>
    %619 = arith.select %617, %615, %618 : vector<3x256xi1>, vector<3x256xf32>
    %c15_i32_257 = arith.constant 15 : i32
    %620 = tpu.dynamic_rotate %606 by %c15_i32_257 dim 1 : vector<3x256xf32>, i32 -> vector<3x256xf32>
    %cst_258 = arith.constant 0.000000e+00 : f32
    %621 = vector.shape_cast %88 : vector<1x256xi1> to vector<1x256xi1>
    %622 = vector.broadcast %621 : vector<1x256xi1> to vector<3x256xi1>
    %623 = vector.broadcast %cst_258 : f32 to vector<3x256xf32>
    %624 = arith.select %622, %620, %623 : vector<3x256xi1>, vector<3x256xf32>
    %c1_i32_259 = arith.constant 1 : i32
    %625 = tpu.dynamic_rotate %606 by %c1_i32_259 dim 1 : vector<3x256xf32>, i32 -> vector<3x256xf32>
    %cst_260 = arith.constant 0.000000e+00 : f32
    %626 = vector.shape_cast %107 : vector<1x256xi1> to vector<1x256xi1>
    %627 = vector.broadcast %626 : vector<1x256xi1> to vector<3x256xi1>
    %628 = vector.broadcast %cst_260 : f32 to vector<3x256xf32>
    %629 = arith.select %627, %625, %628 : vector<3x256xi1>, vector<3x256xf32>
    %cst_261 = arith.constant 0.000000e+00 : f32
    %630 = vector.shape_cast %126 : vector<1x256xi1> to vector<1x256xi1>
    %631 = vector.broadcast %630 : vector<1x256xi1> to vector<3x256xi1>
    %632 = vector.broadcast %cst_261 : f32 to vector<3x256xf32>
    %633 = arith.select %631, %606, %632 : vector<3x256xi1>, vector<3x256xf32>
    %c255_i32_262 = arith.constant 255 : i32
    %634 = tpu.dynamic_rotate %606 by %c255_i32_262 dim 1 : vector<3x256xf32>, i32 -> vector<3x256xf32>
    %cst_263 = arith.constant 0.000000e+00 : f32
    %635 = vector.shape_cast %145 : vector<1x256xi1> to vector<1x256xi1>
    %636 = vector.broadcast %635 : vector<1x256xi1> to vector<3x256xi1>
    %637 = vector.broadcast %cst_263 : f32 to vector<3x256xf32>
    %638 = arith.select %636, %634, %637 : vector<3x256xi1>, vector<3x256xf32>
    %c241_i32_264 = arith.constant 241 : i32
    %639 = tpu.dynamic_rotate %606 by %c241_i32_264 dim 1 : vector<3x256xf32>, i32 -> vector<3x256xf32>
    %cst_265 = arith.constant 0.000000e+00 : f32
    %640 = vector.shape_cast %164 : vector<1x256xi1> to vector<1x256xi1>
    %641 = vector.broadcast %640 : vector<1x256xi1> to vector<3x256xi1>
    %642 = vector.broadcast %cst_265 : f32 to vector<3x256xf32>
    %643 = arith.select %641, %639, %642 : vector<3x256xi1>, vector<3x256xf32>
    %c240_i32_266 = arith.constant 240 : i32
    %644 = tpu.dynamic_rotate %606 by %c240_i32_266 dim 1 : vector<3x256xf32>, i32 -> vector<3x256xf32>
    %cst_267 = arith.constant 0.000000e+00 : f32
    %645 = vector.shape_cast %183 : vector<1x256xi1> to vector<1x256xi1>
    %646 = vector.broadcast %645 : vector<1x256xi1> to vector<3x256xi1>
    %647 = vector.broadcast %cst_267 : f32 to vector<3x256xf32>
    %648 = arith.select %646, %644, %647 : vector<3x256xi1>, vector<3x256xf32>
    %c239_i32_268 = arith.constant 239 : i32
    %649 = tpu.dynamic_rotate %606 by %c239_i32_268 dim 1 : vector<3x256xf32>, i32 -> vector<3x256xf32>
    %cst_269 = arith.constant 0.000000e+00 : f32
    %650 = vector.shape_cast %202 : vector<1x256xi1> to vector<1x256xi1>
    %651 = vector.broadcast %650 : vector<1x256xi1> to vector<3x256xi1>
    %652 = vector.broadcast %cst_269 : f32 to vector<3x256xf32>
    %653 = arith.select %651, %649, %652 : vector<3x256xi1>, vector<3x256xf32>
    %654 = tpu.concatenate %614, %619, %624, %629, %633, %638, %643, %648, %653 in 0 : vector<3x256xf32>, vector<3x256xf32>, vector<3x256xf32>, vector<3x256xf32>, vector<3x256xf32>, vector<3x256xf32>, vector<3x256xf32>, vector<3x256xf32>, vector<3x256xf32> -> vector<27x256xf32>
    %cst_270 = arith.constant dense<0.000000e+00> : vector<4x256xf32>
    %655 = tpu.matmul %607, %654, %cst_270 {dimension_numbers = #tpu.dot_dimension_numbers<[1], [0], [0], [1], [0, 0, 1, 1], [], []>} : vector<4x27xf32>, vector<27x256xf32>, vector<4x256xf32> -> vector<4x256xf32>
    %656 = vector.broadcast %608 : vector<4x1xf32> to vector<4x256xf32>
    %657 = arith.mulf %655, %656 : vector<4x256xf32>
    %658 = vector.broadcast %609 : vector<4x1xf32> to vector<4x256xf32>
    %659 = arith.addf %657, %658 : vector<4x256xf32>
    %cst_271 = arith.constant 0.000000e+00 : f32
    %660 = vector.broadcast %cst_271 : f32 to vector<4x256xf32>
    %661 = arith.maximumf %659, %660 : vector<4x256xf32>
    %c0_272 = arith.constant 0 : index
    %c0_273 = arith.constant 0 : index
    %662 = vector.load %arg26[%c0_272, %c0_273] : memref<4x36xf32, #tpu.memory_space<vmem>>, vector<4x36xf32>
    %c0_274 = arith.constant 0 : index
    %c0_275 = arith.constant 0 : index
    %663 = vector.load %arg27[%c0_274, %c0_275] : memref<4x1xf32, #tpu.memory_space<vmem>>, vector<4x1xf32>
    %c0_276 = arith.constant 0 : index
    %c0_277 = arith.constant 0 : index
    %664 = vector.load %arg28[%c0_276, %c0_277] : memref<4x1xf32, #tpu.memory_space<vmem>>, vector<4x1xf32>
    %c-3_i32 = arith.constant -3 : i32
    %665 = vector.broadcast %c-3_i32 : i32 to vector<1x256xi32>
    %666 = arith.addi %18, %665 : vector<1x256xi32>
    %c0_i32_278 = arith.constant 0 : i32
    %667 = vector.broadcast %c0_i32_278 : i32 to vector<1x256xi32>
    %668 = arith.cmpi sge, %666, %667 : vector<1x256xi32>
    %c-3_i32_279 = arith.constant -3 : i32
    %669 = vector.broadcast %c-3_i32_279 : i32 to vector<1x256xi32>
    %670 = arith.addi %18, %669 : vector<1x256xi32>
    %c16_i32_280 = arith.constant 16 : i32
    %671 = vector.broadcast %c16_i32_280 : i32 to vector<1x256xi32>
    %672 = arith.cmpi slt, %670, %671 : vector<1x256xi32>
    %673 = arith.andi %668, %672 : vector<1x256xi1>
    %c-51_i32 = arith.constant -51 : i32
    %674 = vector.broadcast %c-51_i32 : i32 to vector<1x256xi32>
    %675 = arith.addi %2, %674 : vector<1x256xi32>
    %c0_i32_281 = arith.constant 0 : i32
    %676 = vector.broadcast %c0_i32_281 : i32 to vector<1x256xi32>
    %677 = arith.cmpi sge, %675, %676 : vector<1x256xi32>
    %678 = arith.andi %673, %677 : vector<1x256xi1>
    %c-51_i32_282 = arith.constant -51 : i32
    %679 = vector.broadcast %c-51_i32_282 : i32 to vector<1x256xi32>
    %680 = arith.addi %2, %679 : vector<1x256xi32>
    %c256_i32_283 = arith.constant 256 : i32
    %681 = vector.broadcast %c256_i32_283 : i32 to vector<1x256xi32>
    %682 = arith.cmpi slt, %680, %681 : vector<1x256xi32>
    %683 = arith.andi %678, %682 : vector<1x256xi1>
    %c0_i32_284 = arith.constant 0 : i32
    %684 = vector.broadcast %c0_i32_284 : i32 to vector<1x256xi32>
    %685 = arith.addi %18, %684 : vector<1x256xi32>
    %c0_i32_285 = arith.constant 0 : i32
    %686 = vector.broadcast %c0_i32_285 : i32 to vector<1x256xi32>
    %687 = arith.cmpi sge, %685, %686 : vector<1x256xi32>
    %c0_i32_286 = arith.constant 0 : i32
    %688 = vector.broadcast %c0_i32_286 : i32 to vector<1x256xi32>
    %689 = arith.addi %18, %688 : vector<1x256xi32>
    %c16_i32_287 = arith.constant 16 : i32
    %690 = vector.broadcast %c16_i32_287 : i32 to vector<1x256xi32>
    %691 = arith.cmpi slt, %689, %690 : vector<1x256xi32>
    %692 = arith.andi %687, %691 : vector<1x256xi1>
    %c-48_i32 = arith.constant -48 : i32
    %693 = vector.broadcast %c-48_i32 : i32 to vector<1x256xi32>
    %694 = arith.addi %2, %693 : vector<1x256xi32>
    %c0_i32_288 = arith.constant 0 : i32
    %695 = vector.broadcast %c0_i32_288 : i32 to vector<1x256xi32>
    %696 = arith.cmpi sge, %694, %695 : vector<1x256xi32>
    %697 = arith.andi %692, %696 : vector<1x256xi1>
    %c-48_i32_289 = arith.constant -48 : i32
    %698 = vector.broadcast %c-48_i32_289 : i32 to vector<1x256xi32>
    %699 = arith.addi %2, %698 : vector<1x256xi32>
    %c256_i32_290 = arith.constant 256 : i32
    %700 = vector.broadcast %c256_i32_290 : i32 to vector<1x256xi32>
    %701 = arith.cmpi slt, %699, %700 : vector<1x256xi32>
    %702 = arith.andi %697, %701 : vector<1x256xi1>
    %c3_i32 = arith.constant 3 : i32
    %703 = vector.broadcast %c3_i32 : i32 to vector<1x256xi32>
    %704 = arith.addi %18, %703 : vector<1x256xi32>
    %c0_i32_291 = arith.constant 0 : i32
    %705 = vector.broadcast %c0_i32_291 : i32 to vector<1x256xi32>
    %706 = arith.cmpi sge, %704, %705 : vector<1x256xi32>
    %c3_i32_292 = arith.constant 3 : i32
    %707 = vector.broadcast %c3_i32_292 : i32 to vector<1x256xi32>
    %708 = arith.addi %18, %707 : vector<1x256xi32>
    %c16_i32_293 = arith.constant 16 : i32
    %709 = vector.broadcast %c16_i32_293 : i32 to vector<1x256xi32>
    %710 = arith.cmpi slt, %708, %709 : vector<1x256xi32>
    %711 = arith.andi %706, %710 : vector<1x256xi1>
    %c-45_i32 = arith.constant -45 : i32
    %712 = vector.broadcast %c-45_i32 : i32 to vector<1x256xi32>
    %713 = arith.addi %2, %712 : vector<1x256xi32>
    %c0_i32_294 = arith.constant 0 : i32
    %714 = vector.broadcast %c0_i32_294 : i32 to vector<1x256xi32>
    %715 = arith.cmpi sge, %713, %714 : vector<1x256xi32>
    %716 = arith.andi %711, %715 : vector<1x256xi1>
    %c-45_i32_295 = arith.constant -45 : i32
    %717 = vector.broadcast %c-45_i32_295 : i32 to vector<1x256xi32>
    %718 = arith.addi %2, %717 : vector<1x256xi32>
    %c256_i32_296 = arith.constant 256 : i32
    %719 = vector.broadcast %c256_i32_296 : i32 to vector<1x256xi32>
    %720 = arith.cmpi slt, %718, %719 : vector<1x256xi32>
    %721 = arith.andi %716, %720 : vector<1x256xi1>
    %c-3_i32_297 = arith.constant -3 : i32
    %722 = vector.broadcast %c-3_i32_297 : i32 to vector<1x256xi32>
    %723 = arith.addi %18, %722 : vector<1x256xi32>
    %c0_i32_298 = arith.constant 0 : i32
    %724 = vector.broadcast %c0_i32_298 : i32 to vector<1x256xi32>
    %725 = arith.cmpi sge, %723, %724 : vector<1x256xi32>
    %c-3_i32_299 = arith.constant -3 : i32
    %726 = vector.broadcast %c-3_i32_299 : i32 to vector<1x256xi32>
    %727 = arith.addi %18, %726 : vector<1x256xi32>
    %c16_i32_300 = arith.constant 16 : i32
    %728 = vector.broadcast %c16_i32_300 : i32 to vector<1x256xi32>
    %729 = arith.cmpi slt, %727, %728 : vector<1x256xi32>
    %730 = arith.andi %725, %729 : vector<1x256xi1>
    %c-3_i32_301 = arith.constant -3 : i32
    %731 = vector.broadcast %c-3_i32_301 : i32 to vector<1x256xi32>
    %732 = arith.addi %2, %731 : vector<1x256xi32>
    %c0_i32_302 = arith.constant 0 : i32
    %733 = vector.broadcast %c0_i32_302 : i32 to vector<1x256xi32>
    %734 = arith.cmpi sge, %732, %733 : vector<1x256xi32>
    %735 = arith.andi %730, %734 : vector<1x256xi1>
    %c-3_i32_303 = arith.constant -3 : i32
    %736 = vector.broadcast %c-3_i32_303 : i32 to vector<1x256xi32>
    %737 = arith.addi %2, %736 : vector<1x256xi32>
    %c256_i32_304 = arith.constant 256 : i32
    %738 = vector.broadcast %c256_i32_304 : i32 to vector<1x256xi32>
    %739 = arith.cmpi slt, %737, %738 : vector<1x256xi32>
    %740 = arith.andi %735, %739 : vector<1x256xi1>
    %c0_i32_305 = arith.constant 0 : i32
    %741 = vector.broadcast %c0_i32_305 : i32 to vector<1x256xi32>
    %742 = arith.addi %18, %741 : vector<1x256xi32>
    %c0_i32_306 = arith.constant 0 : i32
    %743 = vector.broadcast %c0_i32_306 : i32 to vector<1x256xi32>
    %744 = arith.cmpi sge, %742, %743 : vector<1x256xi32>
    %c0_i32_307 = arith.constant 0 : i32
    %745 = vector.broadcast %c0_i32_307 : i32 to vector<1x256xi32>
    %746 = arith.addi %18, %745 : vector<1x256xi32>
    %c16_i32_308 = arith.constant 16 : i32
    %747 = vector.broadcast %c16_i32_308 : i32 to vector<1x256xi32>
    %748 = arith.cmpi slt, %746, %747 : vector<1x256xi32>
    %749 = arith.andi %744, %748 : vector<1x256xi1>
    %c0_i32_309 = arith.constant 0 : i32
    %750 = vector.broadcast %c0_i32_309 : i32 to vector<1x256xi32>
    %751 = arith.addi %2, %750 : vector<1x256xi32>
    %c0_i32_310 = arith.constant 0 : i32
    %752 = vector.broadcast %c0_i32_310 : i32 to vector<1x256xi32>
    %753 = arith.cmpi sge, %751, %752 : vector<1x256xi32>
    %754 = arith.andi %749, %753 : vector<1x256xi1>
    %c0_i32_311 = arith.constant 0 : i32
    %755 = vector.broadcast %c0_i32_311 : i32 to vector<1x256xi32>
    %756 = arith.addi %2, %755 : vector<1x256xi32>
    %c256_i32_312 = arith.constant 256 : i32
    %757 = vector.broadcast %c256_i32_312 : i32 to vector<1x256xi32>
    %758 = arith.cmpi slt, %756, %757 : vector<1x256xi32>
    %759 = arith.andi %754, %758 : vector<1x256xi1>
    %c3_i32_313 = arith.constant 3 : i32
    %760 = vector.broadcast %c3_i32_313 : i32 to vector<1x256xi32>
    %761 = arith.addi %18, %760 : vector<1x256xi32>
    %c0_i32_314 = arith.constant 0 : i32
    %762 = vector.broadcast %c0_i32_314 : i32 to vector<1x256xi32>
    %763 = arith.cmpi sge, %761, %762 : vector<1x256xi32>
    %c3_i32_315 = arith.constant 3 : i32
    %764 = vector.broadcast %c3_i32_315 : i32 to vector<1x256xi32>
    %765 = arith.addi %18, %764 : vector<1x256xi32>
    %c16_i32_316 = arith.constant 16 : i32
    %766 = vector.broadcast %c16_i32_316 : i32 to vector<1x256xi32>
    %767 = arith.cmpi slt, %765, %766 : vector<1x256xi32>
    %768 = arith.andi %763, %767 : vector<1x256xi1>
    %c3_i32_317 = arith.constant 3 : i32
    %769 = vector.broadcast %c3_i32_317 : i32 to vector<1x256xi32>
    %770 = arith.addi %2, %769 : vector<1x256xi32>
    %c0_i32_318 = arith.constant 0 : i32
    %771 = vector.broadcast %c0_i32_318 : i32 to vector<1x256xi32>
    %772 = arith.cmpi sge, %770, %771 : vector<1x256xi32>
    %773 = arith.andi %768, %772 : vector<1x256xi1>
    %c3_i32_319 = arith.constant 3 : i32
    %774 = vector.broadcast %c3_i32_319 : i32 to vector<1x256xi32>
    %775 = arith.addi %2, %774 : vector<1x256xi32>
    %c256_i32_320 = arith.constant 256 : i32
    %776 = vector.broadcast %c256_i32_320 : i32 to vector<1x256xi32>
    %777 = arith.cmpi slt, %775, %776 : vector<1x256xi32>
    %778 = arith.andi %773, %777 : vector<1x256xi1>
    %c-3_i32_321 = arith.constant -3 : i32
    %779 = vector.broadcast %c-3_i32_321 : i32 to vector<1x256xi32>
    %780 = arith.addi %18, %779 : vector<1x256xi32>
    %c0_i32_322 = arith.constant 0 : i32
    %781 = vector.broadcast %c0_i32_322 : i32 to vector<1x256xi32>
    %782 = arith.cmpi sge, %780, %781 : vector<1x256xi32>
    %c-3_i32_323 = arith.constant -3 : i32
    %783 = vector.broadcast %c-3_i32_323 : i32 to vector<1x256xi32>
    %784 = arith.addi %18, %783 : vector<1x256xi32>
    %c16_i32_324 = arith.constant 16 : i32
    %785 = vector.broadcast %c16_i32_324 : i32 to vector<1x256xi32>
    %786 = arith.cmpi slt, %784, %785 : vector<1x256xi32>
    %787 = arith.andi %782, %786 : vector<1x256xi1>
    %c45_i32 = arith.constant 45 : i32
    %788 = vector.broadcast %c45_i32 : i32 to vector<1x256xi32>
    %789 = arith.addi %2, %788 : vector<1x256xi32>
    %c0_i32_325 = arith.constant 0 : i32
    %790 = vector.broadcast %c0_i32_325 : i32 to vector<1x256xi32>
    %791 = arith.cmpi sge, %789, %790 : vector<1x256xi32>
    %792 = arith.andi %787, %791 : vector<1x256xi1>
    %c45_i32_326 = arith.constant 45 : i32
    %793 = vector.broadcast %c45_i32_326 : i32 to vector<1x256xi32>
    %794 = arith.addi %2, %793 : vector<1x256xi32>
    %c256_i32_327 = arith.constant 256 : i32
    %795 = vector.broadcast %c256_i32_327 : i32 to vector<1x256xi32>
    %796 = arith.cmpi slt, %794, %795 : vector<1x256xi32>
    %797 = arith.andi %792, %796 : vector<1x256xi1>
    %c0_i32_328 = arith.constant 0 : i32
    %798 = vector.broadcast %c0_i32_328 : i32 to vector<1x256xi32>
    %799 = arith.addi %18, %798 : vector<1x256xi32>
    %c0_i32_329 = arith.constant 0 : i32
    %800 = vector.broadcast %c0_i32_329 : i32 to vector<1x256xi32>
    %801 = arith.cmpi sge, %799, %800 : vector<1x256xi32>
    %c0_i32_330 = arith.constant 0 : i32
    %802 = vector.broadcast %c0_i32_330 : i32 to vector<1x256xi32>
    %803 = arith.addi %18, %802 : vector<1x256xi32>
    %c16_i32_331 = arith.constant 16 : i32
    %804 = vector.broadcast %c16_i32_331 : i32 to vector<1x256xi32>
    %805 = arith.cmpi slt, %803, %804 : vector<1x256xi32>
    %806 = arith.andi %801, %805 : vector<1x256xi1>
    %c48_i32 = arith.constant 48 : i32
    %807 = vector.broadcast %c48_i32 : i32 to vector<1x256xi32>
    %808 = arith.addi %2, %807 : vector<1x256xi32>
    %c0_i32_332 = arith.constant 0 : i32
    %809 = vector.broadcast %c0_i32_332 : i32 to vector<1x256xi32>
    %810 = arith.cmpi sge, %808, %809 : vector<1x256xi32>
    %811 = arith.andi %806, %810 : vector<1x256xi1>
    %c48_i32_333 = arith.constant 48 : i32
    %812 = vector.broadcast %c48_i32_333 : i32 to vector<1x256xi32>
    %813 = arith.addi %2, %812 : vector<1x256xi32>
    %c256_i32_334 = arith.constant 256 : i32
    %814 = vector.broadcast %c256_i32_334 : i32 to vector<1x256xi32>
    %815 = arith.cmpi slt, %813, %814 : vector<1x256xi32>
    %816 = arith.andi %811, %815 : vector<1x256xi1>
    %c3_i32_335 = arith.constant 3 : i32
    %817 = vector.broadcast %c3_i32_335 : i32 to vector<1x256xi32>
    %818 = arith.addi %18, %817 : vector<1x256xi32>
    %c0_i32_336 = arith.constant 0 : i32
    %819 = vector.broadcast %c0_i32_336 : i32 to vector<1x256xi32>
    %820 = arith.cmpi sge, %818, %819 : vector<1x256xi32>
    %c3_i32_337 = arith.constant 3 : i32
    %821 = vector.broadcast %c3_i32_337 : i32 to vector<1x256xi32>
    %822 = arith.addi %18, %821 : vector<1x256xi32>
    %c16_i32_338 = arith.constant 16 : i32
    %823 = vector.broadcast %c16_i32_338 : i32 to vector<1x256xi32>
    %824 = arith.cmpi slt, %822, %823 : vector<1x256xi32>
    %825 = arith.andi %820, %824 : vector<1x256xi1>
    %c51_i32 = arith.constant 51 : i32
    %826 = vector.broadcast %c51_i32 : i32 to vector<1x256xi32>
    %827 = arith.addi %2, %826 : vector<1x256xi32>
    %c0_i32_339 = arith.constant 0 : i32
    %828 = vector.broadcast %c0_i32_339 : i32 to vector<1x256xi32>
    %829 = arith.cmpi sge, %827, %828 : vector<1x256xi32>
    %830 = arith.andi %825, %829 : vector<1x256xi1>
    %c51_i32_340 = arith.constant 51 : i32
    %831 = vector.broadcast %c51_i32_340 : i32 to vector<1x256xi32>
    %832 = arith.addi %2, %831 : vector<1x256xi32>
    %c256_i32_341 = arith.constant 256 : i32
    %833 = vector.broadcast %c256_i32_341 : i32 to vector<1x256xi32>
    %834 = arith.cmpi slt, %832, %833 : vector<1x256xi32>
    %835 = arith.andi %830, %834 : vector<1x256xi1>
    %c51_i32_342 = arith.constant 51 : i32
    %836 = tpu.dynamic_rotate %661 by %c51_i32_342 dim 1 : vector<4x256xf32>, i32 -> vector<4x256xf32>
    %cst_343 = arith.constant 0.000000e+00 : f32
    %837 = vector.shape_cast %683 : vector<1x256xi1> to vector<1x256xi1>
    %838 = vector.broadcast %837 : vector<1x256xi1> to vector<4x256xi1>
    %839 = vector.broadcast %cst_343 : f32 to vector<4x256xf32>
    %840 = arith.select %838, %836, %839 : vector<4x256xi1>, vector<4x256xf32>
    %c48_i32_344 = arith.constant 48 : i32
    %841 = tpu.dynamic_rotate %661 by %c48_i32_344 dim 1 : vector<4x256xf32>, i32 -> vector<4x256xf32>
    %cst_345 = arith.constant 0.000000e+00 : f32
    %842 = vector.shape_cast %702 : vector<1x256xi1> to vector<1x256xi1>
    %843 = vector.broadcast %842 : vector<1x256xi1> to vector<4x256xi1>
    %844 = vector.broadcast %cst_345 : f32 to vector<4x256xf32>
    %845 = arith.select %843, %841, %844 : vector<4x256xi1>, vector<4x256xf32>
    %c45_i32_346 = arith.constant 45 : i32
    %846 = tpu.dynamic_rotate %661 by %c45_i32_346 dim 1 : vector<4x256xf32>, i32 -> vector<4x256xf32>
    %cst_347 = arith.constant 0.000000e+00 : f32
    %847 = vector.shape_cast %721 : vector<1x256xi1> to vector<1x256xi1>
    %848 = vector.broadcast %847 : vector<1x256xi1> to vector<4x256xi1>
    %849 = vector.broadcast %cst_347 : f32 to vector<4x256xf32>
    %850 = arith.select %848, %846, %849 : vector<4x256xi1>, vector<4x256xf32>
    %c3_i32_348 = arith.constant 3 : i32
    %851 = tpu.dynamic_rotate %661 by %c3_i32_348 dim 1 : vector<4x256xf32>, i32 -> vector<4x256xf32>
    %cst_349 = arith.constant 0.000000e+00 : f32
    %852 = vector.shape_cast %740 : vector<1x256xi1> to vector<1x256xi1>
    %853 = vector.broadcast %852 : vector<1x256xi1> to vector<4x256xi1>
    %854 = vector.broadcast %cst_349 : f32 to vector<4x256xf32>
    %855 = arith.select %853, %851, %854 : vector<4x256xi1>, vector<4x256xf32>
    %cst_350 = arith.constant 0.000000e+00 : f32
    %856 = vector.shape_cast %759 : vector<1x256xi1> to vector<1x256xi1>
    %857 = vector.broadcast %856 : vector<1x256xi1> to vector<4x256xi1>
    %858 = vector.broadcast %cst_350 : f32 to vector<4x256xf32>
    %859 = arith.select %857, %661, %858 : vector<4x256xi1>, vector<4x256xf32>
    %c253_i32 = arith.constant 253 : i32
    %860 = tpu.dynamic_rotate %661 by %c253_i32 dim 1 : vector<4x256xf32>, i32 -> vector<4x256xf32>
    %cst_351 = arith.constant 0.000000e+00 : f32
    %861 = vector.shape_cast %778 : vector<1x256xi1> to vector<1x256xi1>
    %862 = vector.broadcast %861 : vector<1x256xi1> to vector<4x256xi1>
    %863 = vector.broadcast %cst_351 : f32 to vector<4x256xf32>
    %864 = arith.select %862, %860, %863 : vector<4x256xi1>, vector<4x256xf32>
    %c211_i32 = arith.constant 211 : i32
    %865 = tpu.dynamic_rotate %661 by %c211_i32 dim 1 : vector<4x256xf32>, i32 -> vector<4x256xf32>
    %cst_352 = arith.constant 0.000000e+00 : f32
    %866 = vector.shape_cast %797 : vector<1x256xi1> to vector<1x256xi1>
    %867 = vector.broadcast %866 : vector<1x256xi1> to vector<4x256xi1>
    %868 = vector.broadcast %cst_352 : f32 to vector<4x256xf32>
    %869 = arith.select %867, %865, %868 : vector<4x256xi1>, vector<4x256xf32>
    %c208_i32 = arith.constant 208 : i32
    %870 = tpu.dynamic_rotate %661 by %c208_i32 dim 1 : vector<4x256xf32>, i32 -> vector<4x256xf32>
    %cst_353 = arith.constant 0.000000e+00 : f32
    %871 = vector.shape_cast %816 : vector<1x256xi1> to vector<1x256xi1>
    %872 = vector.broadcast %871 : vector<1x256xi1> to vector<4x256xi1>
    %873 = vector.broadcast %cst_353 : f32 to vector<4x256xf32>
    %874 = arith.select %872, %870, %873 : vector<4x256xi1>, vector<4x256xf32>
    %c205_i32 = arith.constant 205 : i32
    %875 = tpu.dynamic_rotate %661 by %c205_i32 dim 1 : vector<4x256xf32>, i32 -> vector<4x256xf32>
    %cst_354 = arith.constant 0.000000e+00 : f32
    %876 = vector.shape_cast %835 : vector<1x256xi1> to vector<1x256xi1>
    %877 = vector.broadcast %876 : vector<1x256xi1> to vector<4x256xi1>
    %878 = vector.broadcast %cst_354 : f32 to vector<4x256xf32>
    %879 = arith.select %877, %875, %878 : vector<4x256xi1>, vector<4x256xf32>
    %880 = tpu.concatenate %840, %845, %850, %855, %859, %864, %869, %874, %879 in 0 : vector<4x256xf32>, vector<4x256xf32>, vector<4x256xf32>, vector<4x256xf32>, vector<4x256xf32>, vector<4x256xf32>, vector<4x256xf32>, vector<4x256xf32>, vector<4x256xf32> -> vector<36x256xf32>
    %cst_355 = arith.constant dense<0.000000e+00> : vector<4x256xf32>
    %881 = tpu.matmul %662, %880, %cst_355 {dimension_numbers = #tpu.dot_dimension_numbers<[1], [0], [0], [1], [0, 0, 1, 1], [], []>} : vector<4x36xf32>, vector<36x256xf32>, vector<4x256xf32> -> vector<4x256xf32>
    %882 = vector.broadcast %663 : vector<4x1xf32> to vector<4x256xf32>
    %883 = arith.mulf %881, %882 : vector<4x256xf32>
    %884 = vector.broadcast %664 : vector<4x1xf32> to vector<4x256xf32>
    %885 = arith.addf %883, %884 : vector<4x256xf32>
    %886 = tpu.concatenate %252, %541, %885 in 0 : vector<4x256xf32>, vector<4x256xf32>, vector<4x256xf32> -> vector<12x256xf32>
    %c0_356 = arith.constant 0 : index
    %c0_357 = arith.constant 0 : index
    %887 = vector.load %arg29[%c0_356, %c0_357] : memref<16x12xf32, #tpu.memory_space<vmem>>, vector<16x12xf32>
    %c0_358 = arith.constant 0 : index
    %c0_359 = arith.constant 0 : index
    %888 = vector.load %arg30[%c0_358, %c0_359] : memref<16x1xf32, #tpu.memory_space<vmem>>, vector<16x1xf32>
    %c0_360 = arith.constant 0 : index
    %c0_361 = arith.constant 0 : index
    %889 = vector.load %arg31[%c0_360, %c0_361] : memref<16x1xf32, #tpu.memory_space<vmem>>, vector<16x1xf32>
    %cst_362 = arith.constant dense<0.000000e+00> : vector<16x256xf32>
    %890 = tpu.matmul %887, %886, %cst_362 {dimension_numbers = #tpu.dot_dimension_numbers<[1], [0], [0], [1], [0, 0, 1, 1], [], []>} : vector<16x12xf32>, vector<12x256xf32>, vector<16x256xf32> -> vector<16x256xf32>
    %891 = vector.broadcast %888 : vector<16x1xf32> to vector<16x256xf32>
    %892 = arith.mulf %890, %891 : vector<16x256xf32>
    %893 = vector.broadcast %889 : vector<16x1xf32> to vector<16x256xf32>
    %894 = arith.addf %892, %893 : vector<16x256xf32>
    %c0_363 = arith.constant 0 : index
    %c0_364 = arith.constant 0 : index
    %895 = vector.load %arg32[%c0_363, %c0_364] : memref<16x16xf32, #tpu.memory_space<vmem>>, vector<16x16xf32>
    %c0_365 = arith.constant 0 : index
    %c0_366 = arith.constant 0 : index
    %896 = vector.load %arg33[%c0_365, %c0_366] : memref<16x1xf32, #tpu.memory_space<vmem>>, vector<16x1xf32>
    %c0_367 = arith.constant 0 : index
    %c0_368 = arith.constant 0 : index
    %897 = vector.load %arg34[%c0_367, %c0_368] : memref<16x1xf32, #tpu.memory_space<vmem>>, vector<16x1xf32>
    %cst_369 = arith.constant dense<0.000000e+00> : vector<16x256xf32>
    %898 = tpu.matmul %895, %1, %cst_369 {dimension_numbers = #tpu.dot_dimension_numbers<[1], [0], [0], [1], [0, 0, 1, 1], [], []>} : vector<16x16xf32>, vector<16x256xf32>, vector<16x256xf32> -> vector<16x256xf32>
    %899 = vector.broadcast %896 : vector<16x1xf32> to vector<16x256xf32>
    %900 = arith.mulf %898, %899 : vector<16x256xf32>
    %901 = vector.broadcast %897 : vector<16x1xf32> to vector<16x256xf32>
    %902 = arith.addf %900, %901 : vector<16x256xf32>
    %cst_370 = arith.constant 1.000000e-01 : f32
    %903 = vector.broadcast %cst_370 : f32 to vector<16x256xf32>
    %904 = arith.mulf %894, %903 : vector<16x256xf32>
    %905 = arith.addf %904, %902 : vector<16x256xf32>
    %cst_371 = arith.constant 0.000000e+00 : f32
    %906 = vector.broadcast %cst_371 : f32 to vector<16x256xf32>
    %907 = arith.maximumf %905, %906 : vector<16x256xf32>
    %c0_372 = arith.constant 0 : index
    %c0_373 = arith.constant 0 : index
    %c0_374 = arith.constant 0 : index
    %908 = vector.load %arg35[%c0_372, %c0_373, %c0_374] : memref<1x16x256xf32, #tpu.memory_space<vmem>>, vector<1x16x256xf32>
    %909 = vector.shape_cast %908 : vector<1x16x256xf32> to vector<16x256xf32>
    %910 = vector.shape_cast %907 : vector<16x256xf32> to vector<1x16x256xf32>
    tpu.vector_store %arg35[%c0_372, %c0_373, %c0_374], %910 {strides = array<i32>} : memref<1x16x256xf32, #tpu.memory_space<vmem>>, vector<1x16x256xf32>,
    return
  }
  func.func @transform_0(%arg0: i32) -> (i32, i32, i32) {
    %c0_i32 = arith.constant 0 : i32
    %c0_i32_0 = arith.constant 0 : i32
    %c0_i32_1 = arith.constant 0 : i32
    return %arg0, %c0_i32, %c0_i32_0 : i32, i32, i32
  }
  func.func @transform_1(%arg0: i32) -> (i32, i32) {
    %c0_i32 = arith.constant 0 : i32
    %c0_i32_0 = arith.constant 0 : i32
    %c0_i32_1 = arith.constant 0 : i32
    return %c0_i32, %c0_i32_0 : i32, i32
  }
  func.func @transform_2(%arg0: i32) -> (i32, i32) {
    %c0_i32 = arith.constant 0 : i32
    %c0_i32_0 = arith.constant 0 : i32
    %c0_i32_1 = arith.constant 0 : i32
    return %c0_i32, %c0_i32_0 : i32, i32
  }
  func.func @transform_3(%arg0: i32) -> (i32, i32) {
    %c0_i32 = arith.constant 0 : i32
    %c0_i32_0 = arith.constant 0 : i32
    %c0_i32_1 = arith.constant 0 : i32
    return %c0_i32, %c0_i32_0 : i32, i32
  }
  func.func @transform_4(%arg0: i32) -> (i32, i32) {
    %c0_i32 = arith.constant 0 : i32
    %c0_i32_0 = arith.constant 0 : i32
    %c0_i32_1 = arith.constant 0 : i32
    return %c0_i32, %c0_i32_0 : i32, i32
  }
  func.func @transform_5(%arg0: i32) -> (i32, i32) {
    %c0_i32 = arith.constant 0 : i32
    %c0_i32_0 = arith.constant 0 : i32
    %c0_i32_1 = arith.constant 0 : i32
    return %c0_i32, %c0_i32_0 : i32, i32
  }
  func.func @transform_6(%arg0: i32) -> (i32, i32) {
    %c0_i32 = arith.constant 0 : i32
    %c0_i32_0 = arith.constant 0 : i32
    %c0_i32_1 = arith.constant 0 : i32
    return %c0_i32, %c0_i32_0 : i32, i32
  }
  func.func @transform_7(%arg0: i32) -> (i32, i32) {
    %c0_i32 = arith.constant 0 : i32
    %c0_i32_0 = arith.constant 0 : i32
    %c0_i32_1 = arith.constant 0 : i32
    return %c0_i32, %c0_i32_0 : i32, i32
  }
  func.func @transform_8(%arg0: i32) -> (i32, i32) {
    %c0_i32 = arith.constant 0 : i32
    %c0_i32_0 = arith.constant 0 : i32
    %c0_i32_1 = arith.constant 0 : i32
    return %c0_i32, %c0_i32_0 : i32, i32
  }
  func.func @transform_9(%arg0: i32) -> (i32, i32) {
    %c0_i32 = arith.constant 0 : i32
    %c0_i32_0 = arith.constant 0 : i32
    %c0_i32_1 = arith.constant 0 : i32
    return %c0_i32, %c0_i32_0 : i32, i32
  }
  func.func @transform_10(%arg0: i32) -> (i32, i32) {
    %c0_i32 = arith.constant 0 : i32
    %c0_i32_0 = arith.constant 0 : i32
    %c0_i32_1 = arith.constant 0 : i32
    return %c0_i32, %c0_i32_0 : i32, i32
  }
  func.func @transform_11(%arg0: i32) -> (i32, i32) {
    %c0_i32 = arith.constant 0 : i32
    %c0_i32_0 = arith.constant 0 : i32
    %c0_i32_1 = arith.constant 0 : i32
    return %c0_i32, %c0_i32_0 : i32, i32
  }
  func.func @transform_12(%arg0: i32) -> (i32, i32) {
    %c0_i32 = arith.constant 0 : i32
    %c0_i32_0 = arith.constant 0 : i32
    %c0_i32_1 = arith.constant 0 : i32
    return %c0_i32, %c0_i32_0 : i32, i32
  }
  func.func @transform_13(%arg0: i32) -> (i32, i32) {
    %c0_i32 = arith.constant 0 : i32
    %c0_i32_0 = arith.constant 0 : i32
    %c0_i32_1 = arith.constant 0 : i32
    return %c0_i32, %c0_i32_0 : i32, i32
  }
  func.func @transform_14(%arg0: i32) -> (i32, i32) {
    %c0_i32 = arith.constant 0 : i32
    %c0_i32_0 = arith.constant 0 : i32
    %c0_i32_1 = arith.constant 0 : i32
    return %c0_i32, %c0_i32_0 : i32, i32
  }
  func.func @transform_15(%arg0: i32) -> (i32, i32) {
    %c0_i32 = arith.constant 0 : i32
    %c0_i32_0 = arith.constant 0 : i32
    %c0_i32_1 = arith.constant 0 : i32
    return %c0_i32, %c0_i32_0 : i32, i32
  }
  func.func @transform_16(%arg0: i32) -> (i32, i32) {
    %c0_i32 = arith.constant 0 : i32
    %c0_i32_0 = arith.constant 0 : i32
    %c0_i32_1 = arith.constant 0 : i32
    return %c0_i32, %c0_i32_0 : i32, i32
  }
  func.func @transform_17(%arg0: i32) -> (i32, i32) {
    %c0_i32 = arith.constant 0 : i32
    %c0_i32_0 = arith.constant 0 : i32
    %c0_i32_1 = arith.constant 0 : i32
    return %c0_i32, %c0_i32_0 : i32, i32
  }
  func.func @transform_18(%arg0: i32) -> (i32, i32) {
    %c0_i32 = arith.constant 0 : i32
    %c0_i32_0 = arith.constant 0 : i32
    %c0_i32_1 = arith.constant 0 : i32
    return %c0_i32, %c0_i32_0 : i32, i32
  }
  func.func @transform_19(%arg0: i32) -> (i32, i32) {
    %c0_i32 = arith.constant 0 : i32
    %c0_i32_0 = arith.constant 0 : i32
    %c0_i32_1 = arith.constant 0 : i32
    return %c0_i32, %c0_i32_0 : i32, i32
  }
  func.func @transform_20(%arg0: i32) -> (i32, i32) {
    %c0_i32 = arith.constant 0 : i32
    %c0_i32_0 = arith.constant 0 : i32
    %c0_i32_1 = arith.constant 0 : i32
    return %c0_i32, %c0_i32_0 : i32, i32
  }
  func.func @transform_21(%arg0: i32) -> (i32, i32) {
    %c0_i32 = arith.constant 0 : i32
    %c0_i32_0 = arith.constant 0 : i32
    %c0_i32_1 = arith.constant 0 : i32
    return %c0_i32, %c0_i32_0 : i32, i32
  }
  func.func @transform_22(%arg0: i32) -> (i32, i32) {
    %c0_i32 = arith.constant 0 : i32
    %c0_i32_0 = arith.constant 0 : i32
    %c0_i32_1 = arith.constant 0 : i32
    return %c0_i32, %c0_i32_0 : i32, i32
  }
  func.func @transform_23(%arg0: i32) -> (i32, i32) {
    %c0_i32 = arith.constant 0 : i32
    %c0_i32_0 = arith.constant 0 : i32
    %c0_i32_1 = arith.constant 0 : i32
    return %c0_i32, %c0_i32_0 : i32, i32
  }
  func.func @transform_24(%arg0: i32) -> (i32, i32) {
    %c0_i32 = arith.constant 0 : i32
    %c0_i32_0 = arith.constant 0 : i32
    %c0_i32_1 = arith.constant 0 : i32
    return %c0_i32, %c0_i32_0 : i32, i32
  }
  func.func @transform_25(%arg0: i32) -> (i32, i32) {
    %c0_i32 = arith.constant 0 : i32
    %c0_i32_0 = arith.constant 0 : i32
    %c0_i32_1 = arith.constant 0 : i32
    return %c0_i32, %c0_i32_0 : i32, i32
  }
  func.func @transform_26(%arg0: i32) -> (i32, i32) {
    %c0_i32 = arith.constant 0 : i32
    %c0_i32_0 = arith.constant 0 : i32
    %c0_i32_1 = arith.constant 0 : i32
    return %c0_i32, %c0_i32_0 : i32, i32
  }
  func.func @transform_27(%arg0: i32) -> (i32, i32) {
    %c0_i32 = arith.constant 0 : i32
    %c0_i32_0 = arith.constant 0 : i32
    %c0_i32_1 = arith.constant 0 : i32
    return %c0_i32, %c0_i32_0 : i32, i32
  }
  func.func @transform_28(%arg0: i32) -> (i32, i32) {
    %c0_i32 = arith.constant 0 : i32
    %c0_i32_0 = arith.constant 0 : i32
    %c0_i32_1 = arith.constant 0 : i32
    return %c0_i32, %c0_i32_0 : i32, i32
  }
  func.func @transform_29(%arg0: i32) -> (i32, i32) {
    %c0_i32 = arith.constant 0 : i32
    %c0_i32_0 = arith.constant 0 : i32
    %c0_i32_1 = arith.constant 0 : i32
    return %c0_i32, %c0_i32_0 : i32, i32
  }
  func.func @transform_30(%arg0: i32) -> (i32, i32) {
    %c0_i32 = arith.constant 0 : i32
    %c0_i32_0 = arith.constant 0 : i32
    %c0_i32_1 = arith.constant 0 : i32
    return %c0_i32, %c0_i32_0 : i32, i32
  }
  func.func @transform_31(%arg0: i32) -> (i32, i32) {
    %c0_i32 = arith.constant 0 : i32
    %c0_i32_0 = arith.constant 0 : i32
    %c0_i32_1 = arith.constant 0 : i32
    return %c0_i32, %c0_i32_0 : i32, i32
  }
  func.func @transform_32(%arg0: i32) -> (i32, i32) {
    %c0_i32 = arith.constant 0 : i32
    %c0_i32_0 = arith.constant 0 : i32
    %c0_i32_1 = arith.constant 0 : i32
    return %c0_i32, %c0_i32_0 : i32, i32
  }
  func.func @transform_33(%arg0: i32) -> (i32, i32) {
    %c0_i32 = arith.constant 0 : i32
    %c0_i32_0 = arith.constant 0 : i32
    %c0_i32_1 = arith.constant 0 : i32
    return %c0_i32, %c0_i32_0 : i32, i32
  }
  func.func @transform_34(%arg0: i32) -> (i32, i32, i32) {
    %c0_i32 = arith.constant 0 : i32
    %c0_i32_0 = arith.constant 0 : i32
    %c0_i32_1 = arith.constant 0 : i32
    return %arg0, %c0_i32, %c0_i32_0 : i32, i32, i32
  }
}

</mosaic_0001>

<bundles_post_ra>
// kernel: rfb3_forward.1
= control target key start
LH: loop header
LB: loop body
LE: loop exit
PB: predicated region body
PF: predicated region fallthrough
CT: control target
= control target key end

     0   :  { %s3380_s6 = smov 1   ;;  %s3381_s10 = smov 2   ;;  %s4513_s0 = inlined_call_operand.smem [shape: u32[35], index: -1, kind: input, shape index: {}] }
   0x1   :  { %s3447_s5 = sld [smem:[%s4513_s0]]   ;;  %s3382_s14 = smov 3  }
   0x2   :  { %s3452_s9 = sld [smem:[%s4513_s0 + %s3380_s6]]   ;;  %s3383_s18 = smov 4  }
   0x3   :  { %s3457_s13 = sld [smem:[%s4513_s0 + %s3381_s10]]   ;;  %s3384_s22 = smov 5  }
   0x4   :  { %s3462_s17 = sld [smem:[%s4513_s0 + %s3382_s14]]   ;;  %s3385_s26 = smov 6  }
   0x5   :  { %s3467_s21 = sld [smem:[%s4513_s0 + %s3383_s18]]   ;;  %s3386_s30 = smov 7  }
   0x6   :  { %s3472_s25 = sld [smem:[%s4513_s0 + %s3384_s22]]   ;;  %s3387_s4 = smov 8  }
   0x7   :  { %4554 = sst [smem:[#allocation2_spill]] %s3447_s5  ;;  %s3388_s10 = smov 9  }
   0x8   :  { %4555 = sst [smem:[#allocation3_spill]] %s3452_s9  ;;  %s3389_s15 = smov 10  }
   0x9   :  { %s3477_s29 = sld [smem:[%s4513_s0 + %s3385_s26]]   ;;  %s3390_s20 = smov 11  }
   0xa   :  { %s3482_s3 = sld [smem:[%s4513_s0 + %s3386_s30]]   ;;  %s3391_s26 = smov 12  }
   0xb   :  { %s3487_s8 = sld [smem:[%s4513_s0 + %s3387_s4]]   ;;  %s3392_s1 = smov 13  }
   0xc   :  { %4556 = sst [smem:[#allocation4_spill]] %s3472_s25  ;;  %s3393_s7 = smov 14  }
   0xd   :  { %s3492_s14 = sld [smem:[%s4513_s0 + %s3388_s10]]   ;;  %s3395_s22 = smov 16  }
   0xe   :  { %s3497_s19 = sld [smem:[%s4513_s0 + %s3389_s15]]   ;;  %s3394_s15 = smov 15  }
   0xf   :  { %4557 = sst [smem:[#allocation5_spill]] %s3477_s29  ;;  %s3396_s28 = smov 17  }
  0x10   :  { %4558 = sst [smem:[#allocation6_spill]] %s3482_s3 }
  0x11   :  { %4559 = sst [smem:[#allocation7_spill]] %s3487_s8 }
  0x12   :  { %s3502_s24 = sld [smem:[%s4513_s0 + %s3390_s20]]  }
  0x13   :  { %s3507_s30 = sld [smem:[%s4513_s0 + %s3391_s26]]  }
  0x14   :  { %s3512_s6 = sld [smem:[%s4513_s0 + %s3392_s1]]  }
  0x15   :  { %s3517_s12 = sld [smem:[%s4513_s0 + %s3393_s7]]   ;;  %s3397_s7 = smov 18  }
  0x16   :  { %s3522_s20 = sld [smem:[%s4513_s0 + %s3394_s15]]   ;;  %s3398_s15 = smov 19  }
  0x17   :  { %s3527_s27 = sld [smem:[%s4513_s0 + %s3395_s22]]   ;;  %s3399_s22 = smov 20  }
  0x18   :  { %s3532_s4 = sld [smem:[%s4513_s0 + %s3396_s28]]   ;;  %s3400_s28 = smov 21  }
  0x19   :  { %s3537_s29 = sld [smem:[%s4513_s0 + %s3397_s7]]   ;;  %s3401_s7 = smov 22  }
  0x1a   :  { %4560 = sst [smem:[#allocation8_spill]] %s3512_s6 }
  0x1b   :  { %4561 = sst [smem:[#allocation9_spill]] %s3517_s12 }
  0x1c   :  { %4562 = sst [smem:[#allocation10_spill]] %s3522_s20 }
  0x1d   :  { %s3542_s20 = sld [smem:[%s4513_s0 + %s3398_s15]]   ;;  %s3402_s15 = smov 23  }
  0x1e   :  { %4563 = sst [smem:[#allocation11_spill]] %s3532_s4 }
  0x1f   :  { %s3547_s12 = sld [smem:[%s4513_s0 + %s3399_s22]]   ;;  %s3403_s22 = smov 24  }
  0x20   :  { %s3552_s25 = sld [smem:[%s4513_s0 + %s3400_s28]]   ;;  %s3404_s28 = smov 25  }
  0x21   :  { %s3557_s6 = sld [smem:[%s4513_s0 + %s3401_s7]]   ;;  %s3405_s7 = smov 26  }
  0x23   :  { %4564 = sst [smem:[#allocation12_spill]] %s3542_s20 }
  0x24   :  { %s3562_s20 = sld [smem:[%s4513_s0 + %s3402_s15]]   ;;  %s3406_s15 = smov 27  }
  0x25   :  { %4565 = sst [smem:[#allocation13_spill]] %s3547_s12 }
  0x26   :  { %4566 = sst [smem:[#allocation14_spill]] %s3552_s25 }
  0x27   :  { %4567 = sst [smem:[#allocation15_spill]] %s3557_s6 }
  0x28   :  { %s3567_s12 = sld [smem:[%s4513_s0 + %s3403_s22]]   ;;  %s3407_s22 = smov 28  }
  0x29   :  { %s3572_s25 = sld [smem:[%s4513_s0 + %s3404_s28]]   ;;  %s3408_s28 = smov 29  }
  0x2a   :  { %4568 = sst [smem:[#allocation16_spill]] %s3562_s20 }
  0x2b   :  { %s3577_s6 = sld [smem:[%s4513_s0 + %s3405_s7]]   ;;  %s3409_s7 = smov 30  }
  0x2c   :  { %s3582_s20 = sld [smem:[%s4513_s0 + %s3406_s15]]   ;;  %s3410_s15 = smov 31  }
  0x2e   :  { %4569 = sst [smem:[#allocation17_spill]] %s3567_s12 }
  0x2f   :  { %4570 = sst [smem:[#allocation18_spill]] %s3572_s25 }
  0x30   :  { %s3587_s12 = sld [smem:[%s4513_s0 + %s3407_s22]]   ;;  %s3411_s22 = smov 32  }
  0x31   :  { %4571 = sst [smem:[#allocation19_spill]] %s3577_s6 }
  0x32   :  { %4572 = sst [smem:[#allocation20_spill]] %s3582_s20 }
  0x33   :  { %s3592_s25 = sld [smem:[%s4513_s0 + %s3408_s28]]   ;;  %s3412_s28 = smov 33  }
  0x34   :  { %s3597_s6 = sld [smem:[%s4513_s0 + %s3409_s7]]   ;;  %s3413_s7 = smov 34  }
  0x35   :  { %s3602_s20 = sld [smem:[%s4513_s0 + %s3410_s15]]   ;;  %s3619_s15 = smov 0  }
  0x36   :  { %4573 = sst [smem:[#allocation21_spill]] %s3587_s12 }
  0x37   :  { %s3607_s12 = sld [smem:[%s4513_s0 + %s3411_s22]]  }
  0x39   :  { %4574 = sst [smem:[#allocation22_spill]] %s3592_s25 }
  0x3a   :  { %4575 = sst [smem:[#allocation23_spill]] %s3597_s6 }
  0x3b   :  { %s3612_s25 = sld [smem:[%s4513_s0 + %s3412_s28]]  }
  0x3c   :  { %s3617_s6 = sld [smem:[%s4513_s0 + %s3413_s7]]  }
  0x3d LB: > { %s3035_s16 = sadd.s32 4294967295, %s3378_s15   ;;  %p3039_p0 = scmp.ge.s32.totalorder %s3378_s15, 1  ;;  %s3378_s15 = sphi %s3619_s15, %s79_s15  }
  0x3e   : > { %p947_p1 = scmp.lt.s32.totalorder %s3378_s15, 3 }
  0x40   : > { %p948_p2 = pnand %p3039_p0, %p947_p1 }
  0x41   : > { %s4576_s8 = sld [smem:[#allocation7_spill]] (!%p948_p2)  ;;  %p1033_p3 = scmp.lt.s32.totalorder (!%p948_p2), %s3035_s16, 1 }
  0x42   : > { %951 = sbr.rel (%p948_p2) target bundleno = 1513 (0x5e9), region = 156  ;;  %s4577_s5 = sld [smem:[#allocation2_spill]] (!%p948_p2) }
  0x43   : > { %s4578_s9 = sld [smem:[#allocation3_spill]] (!%p948_p2)  ;;  %s3415_s22 = smov (!%p948_p2), 111  }
  0x44   : > { %s4579_s3 = sld [smem:[#allocation6_spill]] (!%p948_p2)  ;;  %s3416_s23 = smov (!%p948_p2), 127  }
  0x45   : > { %s4534_s26 = smov (!%p948_p2), 112   ;;  %s4538_s28 = smov (!%p948_p2), 16  }
  0x46   : > { %s4532_s1 = smov (!%p948_p2), 1   ;;  %s4580_s4 = sld [smem:[#allocation11_spill]] (!%p948_p2) }
  0x47   : > { %v1075_v0 = vld [vmem:[%s3457_s13] sm:$0xf]  ;;  %v3414_v1 = vmov 0   ;;  %s4763_s16 = smov (!%p1033_p3, %s3035_s16), 1  ;;  %vm4517_vm0 = vcmask 130048   ;;  %s3420_s2 = smov 113   ;;  %v1047_v36 = vlaneseq }
  0x48   : > { %3155 = vset.pattern.permute.xlu0 %v3414_v1  ;;  %3156 = vset.pattern.permute.xlu1 %v3414_v1  ;;  %v1458_v2 = vld [vmem:[%s4576_s8] sm:$0x3]  ;;  %s4529_s0 = sshll.u32 %s4763_s16, 5  ;;  %s4530_s7 = smov 17   ;;  %vm4547_vm9 = vcmask 1043456  }
  0x49   : > { %1123 = vperm.xlu0 %3155, %v1075_v0   ;;  %1505 = vperm.xlu1 %3156, %v1458_v2   ;;  %s3635_s18 = scalar_lea.vmem %s4577_s5, %s4529_s0  ;;  %v1074_v7 = vld [vmem:[%s4578_s9] sm:$0xf]  ;;  %s4536_s10 = smov 15   ;;  %v3702_v37 = vand.u32 127, %v1047_v36 }
  0x4a   : > { %3227 = vset.pattern.permute.xlu2 %v3414_v1  ;;  %v3638_v3 = vld [vmem:[%s3635_s18 + $0x10] sm:$0xff]  ;;  %v3641_v4 = vld [vmem:[%s3635_s18 + $0x18] sm:$0xff]  ;;  %v3644_v5 = vld [vmem:[%s3635_s18] sm:$0xff]  ;;  %s3423_s11 = smov 94   ;;  %s3424_s0 = smov 96  }
  0x4b   : > { %1095 = vmatpush.msra.mxu2 %v3638_v3  ;;  %1115 = vmatpush.msra.mxu1 %v3641_v4  ;;  %v3649_v6 = vld [vmem:[%s3635_s18 + $0x8] sm:$0xff]  ;;  %v1457_v8 = vld [vmem:[%s4579_s3] sm:$0x3]  ;;  %v3705_v39 = vadd.s32 128, %v3702_v37  ;;  %v3711_v44 = vand.u32 15, %v3702_v37  ;;  %vm4520_vm1 = vcmp.lt.s32.totalorder %v3702_v37, 112 }
  0x4c   : > { %1477 = vmatpush.msra.mxu0 %v3638_v3  ;;  %v1076_v9 = vld [vmem:[%s3462_s17] sm:$0xf]  ;;  %vm4518_vm7 = vcmp.lt.s32.totalorder %v3702_v37, 111  ;;  %vm4521_vm11 = vcmp.lt.s32.totalorder %v3702_v37, 113  ;;  %vm4525_vm15 = vcmp.lt.s32.totalorder %v3702_v37, 127  ;;  %s4613_s3 = smov 17  }
  0x4d   : > { %1096 = vmatpush.msra.mxu2 %v3644_v5  ;;  %1116 = vmatpush.msra.mxu1 %v3649_v6  ;;  %v1459_v10 = vld [vmem:[%s3492_s14] sm:$0x3]  ;;  %v3708_v40 = vand.u32 15, %v3705_v39  ;;  %v3714_v45 = vadd.s32 16, %v3705_v39  ;;  %v1241_v47 = vadd.s32 17, %v3705_v39  ;;  %v1221_v49 = vadd.s32 15, %v3705_v39 }
  0x4e   : > { %1478 = vmatpush.msra.mxu0 %v3644_v5  ;;  %3044 = vmatmul.msk.f32.vlgmr.msra.gmra.mxu2 %vm4517_vm0, %v1074_v7  ;;  %v1520_v33 = vld [vmem:[%s3502_s24] sm:$0xf]  ;;  %v3726_v50 = vadd.s32 1, %v3711_v44  ;;  %v3733_v52 = vadd.s32 4294967295, %v3711_v44  ;;  %v1211_v61 = vadd.s32 1, %v3705_v39  ;;  %s4728_s5 = sld [smem:[#allocation23_spill]] }
  0x4f   : > { %3045 = vmatmul.msk.f32.vlgmr.msra.gmra.mxu1 %vm4517_vm0, %v1074_v7  ;;  %3050 = vmatmul.msk.f32.vlgmr.msra.gmra.mxu0 %vm4517_vm0, %v1457_v8  ;;  %v2005_v34 = vld [vmem:[%s4580_s4] sm:$0x3]  ;;  %v3717_v46 = vadd.s32 1, %v3708_v40  ;;  %v3722_v48 = vadd.s32 4294967295, %v3708_v40  ;;  %vm4519_vm2 = vcmp.lt.s32.totalorder %v3714_v45, 256  ;;  %vm1247_vm4 = vcmp.lt.s32.totalorder %v1241_v47, 256 }
  0x50   : > { %1497 = vmatpush.msrb.mxu1 %v3641_v4  ;;  %v2006_v35 = vld [vmem:[%s3537_s29] sm:$0x3]  ;;  %vm1227_vm6 = vcmp.lt.s32.totalorder %v1221_v49, 256  ;;  %vm4528_vm8 = vcmp.lt.s32.totalorder %v3726_v50, 16  ;;  %vm4527_vm12 = vcmp.ge.s32.totalorder %v3733_v52, 0  ;;  %vm1217_vm14 = vcmp.lt.s32.totalorder %v1211_v61, 256 }
  0x51   : > { %1130 = vperm.xlu0 %3155, %v1076_v9   ;;  %1512 = vperm.xlu1 %3156, %v1459_v10   ;;  %vm4523_vm3 = vcmp.lt.s32.totalorder %v3717_v46, 16  ;;  %vm4541_vm5 = vcmp.ge.s32.totalorder %v3722_v48, 0  ;;  %v4587_v49 = vmov 0  ;;  %s3436_s4 = smov 51   ;;  %s4729_s8 = sld [smem:[#allocation22_spill]] }
  0x52   : > { %1498 = vmatpush.msrb.mxu1 %v3649_v6  ;;  %vm3744_vm10 = vmand %vm4523_vm3, %vm1247_vm4  ;;  %s3438_s9 = smov 48  }
  0x53   : > { %vm3752_vm13 = vmand %vm4541_vm5, %vm1227_vm6 }
  0x54   : > { %vm3782_vm4 = vmand %vm4523_vm3, %vm1217_vm14  ;;  %vm4543_vm14 = vcmp.lt.s32.totalorder %v3702_v37, 15 }
  0x57   : > { %3051 = vmatmul.msk.f32.vlgmr.msrb.gmra.mxu1 %vm4517_vm0, %v1457_v8 }
  0xbb   : > { %v1124_v11 = vpop.permute.xlu0 %1123  ;;  %v1506_v12 = vpop.permute.xlu1 %1505 }
  0xc3   : > { %v1131_v15 = vpop.permute.xlu0 %1130  ;;  %v1513_v21 = vpop.permute.xlu1 %1512 }
  0xcc   : > { %v1118_v13 = vpop.f32.mrf.mxu1  ;;  %v1480_v16 = vpop.f32.mrf.mxu0 }
  0xcd   : > { %v1127_v14 = vmul.f32 %v1124_v11, %v1118_v13  ;;  %v1508_v19 = vmul.f32 %v1506_v12, %v1480_v16 }
  0xcf   : > { %v1134_v17 = vadd.f32 %v1131_v15, %v1127_v14  ;;  %v1515_v24 = vadd.f32 %v1513_v21, %v1508_v19 }
  0xd1   : > { %v3665_v18 = vmax.f32 %v1134_v17, 0.0  ;;  %v1098_v20 = vpop.f32.mrf.mxu2  ;;  %v3673_v27 = vmax.f32 %v1515_v24, 0.0 }
  0xd2   : > { %v1126_v22 = vmul.f32 %v1124_v11, %v1098_v20 }
  0xd3   : > { %1349 = vrot.lane.b32.xlu0 %v3665_v18, %s3415_s22 }
  0xd4   : > { %v1133_v23 = vadd.f32 %v1131_v15, %v1126_v22  ;;  %v1500_v28 = vpop.f32.mrf.mxu1 }
  0xd5   : > { %v1509_v29 = vmul.f32 %v1506_v12, %v1500_v28 }
  0xd6   : > { %v3669_v25 = vmax.f32 %v1133_v23, 0.0  ;;  %v1192_v23 = vadd.s32 4294967295, %v3702_v37 }
  0xd7   : > { %v1516_v30 = vadd.f32 %v1513_v21, %v1509_v29 }
  0xd8   : > { %v3162_v26 = vpack.i.bf16 %v3665_v18, %v3669_v25  ;;  %vm1194_vm6 = vcmp.ge.s32.totalorder %v1192_v23, 0 }
  0xd9   : > { %v3683_v31 = vmax.f32 %v1516_v30, 0.0  ;;  %v1182_v30 = vadd.s32 4294967281, %v3702_v37 }
  0xda   : > { %3163 = vrot.lane.b32.xlu1 %v3162_v26, %s3416_s23  ;;  %3158 = vrot.lane.b32.xlu2 %v3162_v26, %s4534_s26 }
  0xdb   : > { %1580 = vrot.lane.b32.xlu0 %v3673_v27, %s3415_s22  ;;  %v3192_v32 = vpack.i.bf16 %v3683_v31, %v3673_v27  ;;  %vm1184_vm0 = vcmp.ge.s32.totalorder %v1182_v30, 0 }
  0xe2   : > { %3178 = vrot.lane.b32.xlu1 %v3162_v26, %s4538_s28  ;;  %1347 = vrot.lane.b32.xlu2 %v3669_v25, %s3415_s22 }
  0xe3   : > { %3173 = vrot.lane.b32.xlu0 %v3162_v26, %s4532_s1 }
  0xea   : > { %3193 = vrot.lane.b32.xlu1 %v3192_v32, %s3416_s23  ;;  %3168 = vrot.lane.b32.xlu2 %v3162_v26, %s3420_s2 }
  0xeb   : > { %3188 = vrot.lane.b32.xlu0 %v3162_v26, %s4530_s7 }
  0xf2   : > { %3208 = vrot.lane.b32.xlu1 %v3192_v32, %s4534_s26  ;;  %3183 = vrot.lane.b32.xlu2 %v3162_v26, %s4536_s10  ;;  %s3427_s26 = smov 126  }
  0xf3   : > { %3203 = vrot.lane.b32.xlu0 %v3192_v32, %s4538_s28  ;;  %s4607_s28 = sld [smem:[#allocation14_spill]] }
  0xfa   : > { %1582 = vrot.lane.b32.xlu1 %v3683_v31, %s3415_s22  ;;  %3198 = vrot.lane.b32.xlu2 %v3192_v32, %s3420_s2 }
  0xfb   : > { %3223 = vrot.lane.b32.xlu0 %v3192_v32, %s4532_s1  ;;  %s3426_s1 = smov 98  }
 0x102   : > { %1690 = vperm.xlu1 %3156, %v1520_v33   ;;  %3213 = vrot.lane.b32.xlu2 %v3192_v32, %s4536_s10  ;;  %s3429_s10 = smov 30  }
 0x103   : > { %2052 = vperm.xlu0 %3155, %v2005_v34  }
 0x10a   : > { %2059 = vperm.xlu1 %3156, %v2006_v35   ;;  %3218 = vrot.lane.b32.xlu2 %v3192_v32, %s4530_s7  ;;  %s3425_s7 = smov 2  }
 0x134   : > { %v3159_v38 = vpop.permute.xlu2 %3158 }
 0x135   : > { %v3161_v41 = vunpack.i.h.bf16 %v3159_v38  ;;  %v3160_v42 = vunpack.i.l.bf16 %v3159_v38 }
 0x137   : > { %v1340_v51 = vsel %vm4520_vm1, %v3161_v41, %v3160_v42  ;;  %v1339_v53 = vsel %vm4520_vm1, %v3160_v42, %v3161_v41  ;;  %v3805_v42 = vadd.s32 4294967280, %v3702_v37  ;;  %vm4544_vm1 = vcmp.lt.s32.totalorder %v3702_v37, 16 }
 0x138   : > { %v1346_v54 = vsel %vm4519_vm2, %v1340_v51, 0.0  ;;  %v1380_v0 = vrot.slane %v1339_v53, 4  ;;  %vm3810_vm2 = vmand %vm4527_vm12, %vm1194_vm6  ;;  %v1148_v51 = vadd.s32 4294967279, %v3702_v37 }
 0x139   : > { %v1381_v1 = vrot.slane %v1346_v54, 4  ;;  %v4588_v49 = vsel %vm3810_vm2, 4294967295, %v4587_v49 }
 0x13a   : > { %vm1150_vm6 = vcmp.ge.s32.totalorder %v1148_v51, 0 }
 0x13c   : > { %v1348_v43 = vpop.permute.xlu2 %1347 }
 0x144   : > { %v3169_v55 = vpop.permute.xlu2 %3168 }
 0x145   : > { %v1350_v57 = vpop.permute.xlu0 %1349  ;;  %v3171_v58 = vunpack.i.h.bf16 %v3169_v55  ;;  %v3170_v59 = vunpack.i.l.bf16 %v3169_v55 }
 0x146   : > { %v1352_v62 = vsel %vm4518_vm7, %v1348_v43, %v1350_v57  ;;  %v1353_v63 = vsel %vm4518_vm7, %v1350_v57, %v1348_v43  ;;  %vm4522_vm7 = vcmp.lt.s32.totalorder %v3702_v37, 1 }
 0x147   : > { %v1358_v2 = vsel %vm4528_vm8, %v1352_v62, 0.0  ;;  %v1359_v7 = vsel %vm3744_vm10, %v1353_v63, 0.0  ;;  %v1326_v8 = vsel %vm4521_vm11, %v3170_v59, %v3171_v58  ;;  %v1327_v9 = vsel %vm4521_vm11, %v3171_v58, %v3170_v59  ;;  %vm3818_vm11 = vmand %vm4528_vm8, %vm1184_vm0 }
 0x148   : > { %3046 = vmatpush.msk.msrb.mxu2 %vm4547_vm9, %v1358_v2  ;;  %3048 = vmatpush.msk.msra.mxu3 %vm4547_vm9, %v1359_v7  ;;  %v1332_v10 = vsel %vm4527_vm12, %v1326_v8, 0.0  ;;  %v1333_v11 = vsel %vm3752_vm13, %v1327_v9, 0.0  ;;  %vm4524_vm0 = vcmp.ge.s32.totalorder %v3805_v42, 0 }
 0x149   : > { %v1391_v12 = vsel %vm4547_vm9, %v1332_v10, %v1380_v0  ;;  %v1392_v13 = vsel %vm4547_vm9, %v1333_v11, %v1381_v1 }
 0x14a   : > { %1415 = vmatpush.msrb.mxu2 %v1391_v12  ;;  %1435 = vmatpush.msra.mxu3 %v1392_v13 }
 0x14c   : > { %v3164_v14 = vpop.permute.xlu1 %3163  ;;  %v3184_v15 = vpop.permute.xlu2 %3183 }
 0x14d   : > { %v3778_v16 = vpop.permute.xlu0 %1580  ;;  %v3166_v17 = vunpack.i.h.bf16 %v3164_v14  ;;  %v3165_v19 = vunpack.i.l.bf16 %v3164_v14  ;;  %v3186_v34 = vunpack.i.h.bf16 %v3184_v15  ;;  %v3185_v35 = vunpack.i.l.bf16 %v3184_v15 }
 0x14f   : > { %v1313_v21 = vsel %vm4525_vm15, %v3165_v19, %v3166_v17  ;;  %v1314_v22 = vsel %vm4525_vm15, %v3166_v17, %v3165_v19  ;;  %v1282_v54 = vsel %vm4543_vm14, %v3186_v34, %v3185_v35  ;;  %v1281_v57 = vsel %vm4543_vm14, %v3185_v35, %v3186_v34  ;;  %v1137_v35 = vld [vmem:[%s3467_s21] sm:$0xf] }
 0x150   : > { %v1319_v24 = vsel %vm4528_vm8, %v1313_v21, 0.0  ;;  %v1320_v26 = vsel %vm3782_vm4, %v1314_v22, 0.0  ;;  %v1287_v1 = vsel %vm3818_vm11, %v1282_v54, 0.0  ;;  %v1288_v2 = vsel %vm4523_vm3, %v1281_v57, 0.0  ;;  %vm3850_vm3 = vmand %vm4527_vm12, %vm1150_vm6  ;;  %v1521_v22 = vld [vmem:[%s3507_s30] sm:$0xf] }
 0x151   : > { %v1374_v28 = vrot.slane %v1319_v24, 4  ;;  %v1375_v29 = vrot.slane %v1320_v26, 4  ;;  %1697 = vperm.xlu2 %3227, %v1521_v22   ;;  %vm4526_vm6 = vcmask 293888  }
 0x153   : > { %v1389_v32 = vsel %vm4547_vm9, %v3669_v25, %v1374_v28  ;;  %v1390_v33 = vsel %vm4547_vm9, %v3665_v18, %v1375_v29 }
 0x154   : > { %v3179_v36 = vpop.permute.xlu1 %3178  ;;  %v3800_v38 = vpop.permute.xlu2 %3198  ;;  %1416 = vmatpush.msrb.mxu2 %v1389_v32  ;;  %1436 = vmatpush.msra.mxu3 %v1390_v33 }
 0x155   : > { %v3174_v41 = vpop.permute.xlu0 %3173  ;;  %v3181_v18 = vunpack.i.h.bf16 %v3179_v36  ;;  %v3180_v47 = vunpack.i.l.bf16 %v3179_v36  ;;  %v3201_v23 = vunpack.i.h.bf16 %v3800_v38  ;;  %v3200_v24 = vunpack.i.l.bf16 %v3800_v38 }
 0x156   : > { %v3176_v25 = vunpack.i.h.bf16 %v3174_v41  ;;  %v3175_v43 = vunpack.i.l.bf16 %v3174_v41 }
 0x157   : > { %v1269_v0 = vsel %vm4544_vm1, %v3181_v18, %v3180_v47  ;;  %v1268_v21 = vsel %vm4544_vm1, %v3180_v47, %v3181_v18 }
 0x158   : > { %v1295_v55 = vsel %vm4522_vm7, %v3176_v25, %v3175_v43  ;;  %v1294_v58 = vsel %vm4522_vm7, %v3175_v43, %v3176_v25  ;;  %vm4542_vm7 = vcmp.lt.s32.totalorder %v3702_v37, 17  ;;  %v1274_v14 = vsel %vm4524_vm0, %v1269_v0, 0.0 }
 0x159   : > { %v1300_v59 = vsel %vm3810_vm2, %v1295_v55, 0.0  ;;  %v1301_v61 = vsel %vm4541_vm5, %v1294_v58, 0.0  ;;  %v1362_v29 = vrot.slane %v1274_v14, 4  ;;  %v1363_v34 = vrot.slane %v1268_v21, 4 }
 0x15a   : > { %v1368_v62 = vrot.slane %v1300_v59, 4  ;;  %v1369_v63 = vrot.slane %v1301_v61, 4  ;;  %vm4593_vm0 = vcmp.lt.s32.totalorder %v3702_v37, 113 }
 0x15b   : > { %v1568_v41 = vsel %vm4593_vm0, %v3200_v24, %v3201_v23 }
 0x15c   : > { %v3194_v7 = vpop.permute.xlu1 %3193  ;;  %v3841_v8 = vpop.permute.xlu2 %3213  ;;  %v1387_v9 = vsel %vm4547_vm9, %v1287_v1, %v1368_v62  ;;  %v1388_v10 = vsel %vm4547_vm9, %v1288_v2, %v1369_v63 }
 0x15d   : > { %v3189_v11 = vpop.permute.xlu0 %3188  ;;  %v3196_v12 = vunpack.i.h.bf16 %v3194_v7  ;;  %v3195_v13 = vunpack.i.l.bf16 %v3194_v7  ;;  %1417 = vmatpush.msrb.mxu2 %v1387_v9  ;;  %1437 = vmatpush.msra.mxu3 %v1388_v10  ;;  %v3216_v51 = vunpack.i.h.bf16 %v3841_v8  ;;  %v3215_v54 = vunpack.i.l.bf16 %v3841_v8 }
 0x15e   : > { %v3191_v15 = vunpack.i.h.bf16 %v3189_v11  ;;  %v3190_v17 = vunpack.i.l.bf16 %v3189_v11  ;;  %v1570_v7 = vsel %vm4527_vm12, %v1568_v41, 0.0  ;;  %vm4597_vm12 = vcmp.ge.s32.totalorder %v3805_v42, 0 }
 0x15f   : > { %v1560_v26 = vsel %vm4525_vm15, %v3195_v13, %v3196_v12  ;;  %v1561_v30 = vsel %vm4525_vm15, %v3196_v12, %v3195_v13  ;;  %vm4594_vm15 = vmmov %vm4593_vm0  ;;  %vm4595_vm0 = vcmp.lt.s32.totalorder %v3702_v37, 112  ;;  %v1542_v11 = vsel %vm4543_vm14, %v3215_v54, %v3216_v51 }
 0x160   : > { %v1256_v28 = vsel %vm4542_vm7, %v3191_v15, %v3190_v17  ;;  %v1255_v33 = vsel %vm4542_vm7, %v3190_v17, %v3191_v15  ;;  %v1562_v25 = vsel %vm4528_vm8, %v1560_v26, 0.0  ;;  %v1569_v18 = vsel %vm4594_vm15, %v3201_v23, %v3200_v24 }
 0x161   : > { %v1261_v32 = vsel %vm3850_vm3, %v1256_v28, 0.0  ;;  %v1262_v38 = vsel %vm4541_vm5, %v1255_v33, 0.0  ;;  %v1563_v47 = vsel %vm3782_vm4, %v1561_v30, 0.0  ;;  %v1608_v0 = vrot.slane %v1562_v25, 6 }
 0x162   : > { %v1385_v36 = vsel %vm4547_vm9, %v1261_v32, %v1362_v29  ;;  %v1386_v43 = vsel %vm4547_vm9, %v1262_v38, %v1363_v34  ;;  %vm4546_vm15 = vcmask 1041408   ;;  %v1571_v8 = vsel %vm3752_vm13, %v1569_v18, 0.0 }
 0x163   : > { %1418 = vmatpush.msrb.mxu2 %v1385_v36  ;;  %1438 = vmatpush.msra.mxu3 %v1386_v43  ;;  %v1609_v9 = vrot.slane %v1563_v47, 6  ;;  %vm4545_vm8 = vcmask 1045504   ;;  %v1614_v22 = vrot.slane %v1570_v7, 4  ;;  %v1543_v23 = vsel %vm4543_vm14, %v3216_v51, %v3215_v54 }
 0x164   : > { %v3209_v55 = vpop.permute.xlu1 %3208  ;;  %v3219_v57 = vpop.permute.xlu2 %3218  ;;  %3047 = vmatmul.msk.f32.vlgmr.msrb.gmra.mxu2 %vm4526_vm6, %v1137_v35  ;;  %3049 = vmatmul.msk.f32.vlgmr.msra.gmra.mxu3 %vm4526_vm6, %v1137_v35  ;;  %vm4596_vm6 = vmmov %vm4595_vm0  ;;  %v1632_v24 = vsel %vm4546_vm15, %v3673_v27, %v1608_v0  ;;  %v1615_v26 = vrot.slane %v1571_v8, 4  ;;  %v1544_v43 = vsel %vm3818_vm11, %v1543_v23, 0.0 }
 0x165   : > { %v3204_v58 = vpop.permute.xlu0 %3203  ;;  %v3211_v59 = vunpack.i.h.bf16 %v3209_v55  ;;  %v3210_v61 = vunpack.i.l.bf16 %v3209_v55  ;;  %v3221_v62 = vunpack.i.h.bf16 %v3219_v57  ;;  %v3220_v63 = vunpack.i.l.bf16 %v3219_v57 }
 0x166   : > { %v3206_v1 = vunpack.i.h.bf16 %v3204_v58  ;;  %v3205_v2 = vunpack.i.l.bf16 %v3204_v58  ;;  %v1633_v32 = vsel %vm4546_vm15, %v3683_v31, %v1609_v9  ;;  %v1634_v31 = vsel %vm4547_vm9, %v1632_v24, %v1614_v22 }
 0x167   : > { %v1577_v10 = vsel %vm4595_vm0, %v3211_v59, %v3210_v61  ;;  %v1576_v14 = vsel %vm4596_vm6, %v3210_v61, %v3211_v59  ;;  %v1526_v17 = vsel %vm4542_vm7, %v3220_v63, %v3221_v62  ;;  %vm4598_vm0 = vcmp.lt.s32.totalorder %v3714_v45, 256 }
 0x168   : > { %v1534_v12 = vsel %vm4544_vm1, %v3205_v2, %v3206_v1  ;;  %v1535_v13 = vsel %vm4544_vm1, %v3206_v1, %v3205_v2  ;;  %v1579_v21 = vsel %vm4598_vm0, %v1577_v10, 0.0  ;;  %vm4599_vm6 = vcmp.lt.s32.totalorder %v3717_v46, 16 }
 0x169   : > { %v1536_v15 = vsel %vm4597_vm12, %v1535_v13, 0.0  ;;  %v1545_v28 = vsel %vm4599_vm6, %v1542_v11, 0.0  ;;  %v1591_v29 = vrot.slane %v1534_v12, 6  ;;  %v1620_v30 = vrot.slane %v1576_v14, 2  ;;  %v1519_v12 = vld [vmem:[%s3497_s19] sm:$0xf] }
 0x16a   : > { %v1590_v33 = vrot.slane %v1536_v15, 6  ;;  %v1527_v34 = vsel %vm4542_vm7, %v3221_v62, %v3220_v63  ;;  %v1621_v36 = vrot.slane %v1579_v21, 2  ;;  %v1529_v38 = vsel %vm4541_vm5, %v1526_v17, 0.0  ;;  %v2004_v15 = vld [vmem:[%s3527_s27] sm:$0x3] }
 0x16b   : > { %vm4600_vm12 = vcmp.lt.s32.totalorder %v3702_v37, 111  ;;  %vm4602_vm6 = vcmp.lt.s32.totalorder %v3726_v50, 16  ;;  %v1528_v55 = vsel %vm3850_vm3, %v1527_v34, 0.0  ;;  %v1635_v57 = vsel %vm4547_vm9, %v1633_v32, %v1615_v26 }
 0x16c   : > { %v1583_v35 = vpop.permute.xlu1 %1582  ;;  %vm4601_vm0 = vmmov %vm4600_vm12  ;;  %v1626_v58 = vsel %vm4546_vm15, %v1529_v38, %v1591_v29  ;;  %v1637_v61 = vsel %vm4545_vm8, %v1635_v57, %v1621_v36  ;;  %v1625_v62 = vsel %vm4546_vm15, %v1528_v55, %v1590_v33  ;;  %v1596_v1 = vrot.slane %v1544_v43, 4 }
 0x16d   : > { %v3224_v41 = vpop.permute.xlu0 %3223  ;;  %v1584_v27 = vsel %vm4600_vm12, %v3778_v16, %v1583_v35  ;;  %v1585_v25 = vsel %vm4601_vm0, %v1583_v35, %v3778_v16  ;;  %v1636_v16 = vsel %vm4545_vm8, %v1634_v31, %v1620_v30  ;;  %vm4603_vm12 = vcmp.lt.s32.totalorder %v3702_v37, 1 }
 0x16e   : > { %v3226_v18 = vunpack.i.h.bf16 %v3224_v41  ;;  %v3225_v47 = vunpack.i.l.bf16 %v3224_v41  ;;  %v1586_v51 = vsel %vm4602_vm6, %v1584_v27, 0.0  ;;  %v1587_v54 = vsel %vm3744_vm10, %v1585_v25, 0.0  ;;  %vm4604_vm0 = vmmov %vm4603_vm12 }
 0x16f   : > { %3052 = vmatpush.msk.msra.mxu2 %vm4546_vm15, %v1586_v51  ;;  %3054 = vmatpush.msk.msrb.mxu3 %vm4546_vm15, %v1587_v54  ;;  %v1597_v7 = vrot.slane %v1545_v28, 4  ;;  %v1627_v10 = vsel %vm4547_vm9, %v1625_v62, %v1596_v1  ;;  %vm4540_vm6 = vcmask 146432   ;;  %v1794_v55 = vadd.s32 34, %v3705_v39 }
 0x170   : > { %v1551_v59 = vsel %vm4603_vm12, %v3226_v18, %v3225_v47  ;;  %v1550_v63 = vsel %vm4604_vm0, %v3225_v47, %v3226_v18  ;;  %vm4605_vm12 = vcmask 130048   ;;  %v2068_v18 = vld [vmem:[%s4607_s28] sm:$0x7]  ;;  %v3997_v57 = vadd.s32 2, %v3708_v40  ;;  %s4641_s28 = sld [smem:[#allocation8_spill]] }
 0x171   : > { %1662 = vmatpush.msra.mxu2 %v1636_v16  ;;  %1682 = vmatpush.msrb.mxu3 %v1637_v61  ;;  %v1552_v0 = vsel %vm3810_vm2, %v1551_v59, 0.0  ;;  %v1553_v2 = vsel %vm4541_vm5, %v1550_v63, 0.0  ;;  %v1628_v11 = vsel %vm4547_vm9, %v1626_v58, %v1597_v7  ;;  %vm4606_vm0 = vmmov %vm4605_vm12  ;;  %v4000_v58 = vadd.s32 2, %v3711_v44 }
 0x172   : > { %v1602_v8 = vrot.slane %v1552_v0, 2  ;;  %v1603_v9 = vrot.slane %v1553_v2, 2  ;;  %v1764_v59 = vadd.s32 2, %v3705_v39  ;;  %vm1900_vm5 = vcmp.lt.s32.totalorder %v3702_v37, 94 }
 0x173   : > { %vm1861_vm7 = vcmp.lt.s32.totalorder %v3702_v37, 126  ;;  %vm4548_vm1 = vcmp.lt.s32.totalorder %v4000_v58, 16  ;;  %v1784_v62 = vadd.s32 32, %v3705_v39 }
 0x174   : > { %v1630_v13 = vsel %vm4545_vm8, %v1627_v10, %v1602_v8  ;;  %v1631_v14 = vsel %vm4545_vm8, %v1628_v11, %v1603_v9  ;;  %v1691_v22 = vpop.permute.xlu1 %1690  ;;  %vm1770_vm8 = vcmp.lt.s32.totalorder %v1764_v59, 256  ;;  %v4016_v11 = vadd.s32 4294967294, %v3711_v44 }
 0x175   : > { %1663 = vmatpush.msra.mxu2 %v1630_v13  ;;  %1683 = vmatpush.msrb.mxu3 %v1631_v14  ;;  %v2053_v34 = vpop.permute.xlu0 %2052  ;;  %v1715_v59 = vadd.s32 4294967262, %v3702_v37 }
 0x176   : > { %3053 = vmatmul.msk.f32.vlgmr.msra.gmra.mxu2 %vm4540_vm6, %v1519_v12  ;;  %3055 = vmatmul.msk.f32.vlgmr.msrb.gmra.mxu3 %vm4540_vm6, %v1519_v12  ;;  %vm4552_vm6 = vcmp.lt.s32.totalorder %v3997_v57, 16  ;;  %v4019_v12 = vadd.s32 4294967264, %v3702_v37 }
 0x177   : > { %2024 = vmatpush.msrb.mxu2 %v3638_v3  ;;  %2044 = vmatpush.msra.mxu3 %v3641_v4  ;;  %vm4045_vm15 = vmand %vm4552_vm6, %vm1770_vm8 }
 0x179   : > { %2025 = vmatpush.msrb.mxu2 %v3644_v5  ;;  %2045 = vmatpush.msra.mxu3 %v3649_v6 }
 0x17c   : > { %v2060_v38 = vpop.permute.xlu1 %2059 }
 0x17e   : > { %3060 = vmatmul.msk.f32.vlgmr.msrb.gmra.mxu2 %vm4605_vm12, %v2004_v15  ;;  %3061 = vmatmul.msk.f32.vlgmr.msra.gmra.mxu3 %vm4606_vm0, %v2004_v15  ;;  %vm1800_vm12 = vcmp.lt.s32.totalorder %v1794_v55, 256  ;;  %vm4549_vm0 = vcmp.lt.s32.totalorder %v3702_v37, 96  ;;  %v4026_v15 = vadd.s32 4294967294, %v3708_v40 }
 0x17f   : > { %vm4009_vm14 = vmand %vm4552_vm6, %vm1800_vm12  ;;  %vm4619_vm12 = vcmp.lt.s32.totalorder %v4000_v58, 16 }
 0x180   : > { %vm1710_vm2 = vcmp.ge.s32.totalorder %v4026_v15, 0 }
 0x1ab   : > { %v1698_v23 = vpop.permute.xlu2 %1697 }
 0x1e7   : > { %v3962_v17 = vpop.f32.mrf.mxu2  ;;  %v3964_v21 = vpop.f32.mrf.mxu3 }
 0x1f9   : > { %v1665_v24 = vpop.f32.mrf.mxu2  ;;  %v1685_v26 = vpop.f32.mrf.mxu3 }
 0x1fa   : > { %v1693_v3 = vmul.f32 %v1691_v22, %v1665_v24  ;;  %v1694_v28 = vmul.f32 %v1691_v22, %v1685_v26  ;;  %v1774_v22 = vadd.s32 30, %v3705_v39  ;;  %v1753_v24 = vadd.s32 4294967294, %v3702_v37 }
 0x1fc   : > { %v1700_v4 = vadd.f32 %v1698_v23, %v1693_v3  ;;  %v1701_v29 = vadd.f32 %v1698_v23, %v1694_v28  ;;  %vm1755_vm8 = vcmp.ge.s32.totalorder %v1753_v24, 0 }
 0x1fe   : > { %v3966_v5 = vmax.f32 %v1700_v4, 0.0  ;;  %v3968_v6 = vmax.f32 %v1701_v29, 0.0 }
 0x200   : > { %1898 = vrot.lane.b32.xlu1 %v3968_v6, %s3423_s11  ;;  %1896 = vrot.lane.b32.xlu0 %v3966_v5, %s3423_s11  ;;  %v3228_v30 = vpack.i.bf16 %v3968_v6, %v3966_v5  ;;  %s3428_s11 = smov 34  }
 0x201   : > { %v2027_v32 = vpop.f32.mrf.mxu2  ;;  %v2047_v33 = vpop.f32.mrf.mxu3 }
 0x202   : > { %3229 = vrot.lane.b32.xlu2 %v3228_v30, %s3424_s0  ;;  %v2055_v35 = vmul.f32 %v2053_v34, %v2027_v32  ;;  %v2056_v36 = vmul.f32 %v2053_v34, %v2047_v33  ;;  %s4608_s0 = sld [smem:[#allocation13_spill]] }
 0x204   : > { %v2062_v41 = vadd.f32 %v2060_v38, %v2055_v35  ;;  %v2063_v27 = vadd.f32 %v2060_v38, %v2056_v36 }
 0x206   : > { %v3974_v25 = vmax.f32 %v2062_v41, 0.0  ;;  %v3976_v31 = vmax.f32 %v2063_v27, 0.0  ;;  %v1743_v41 = vadd.s32 4294967266, %v3702_v37 }
 0x208   : > { %3244 = vrot.lane.b32.xlu1 %v3228_v30, %s3425_s7  ;;  %3239 = vrot.lane.b32.xlu0 %v3228_v30, %s3426_s1  ;;  %s3430_s7 = smov 32   ;;  %v3268_v43 = vpack.i.bf16 %v3976_v31, %v3974_v25  ;;  %s4610_s1 = smov 15   ;;  %v2067_v47 = vld [vmem:[%s4608_s0] sm:$0x7] }
 0x209   : > { %s4673_s0 = sld [smem:[#allocation12_spill]] }
 0x20a   : > { %3234 = vrot.lane.b32.xlu2 %v3228_v30, %s3427_s26  ;;  %s4609_s26 = smov 16  }
 0x210   : > { %3259 = vrot.lane.b32.xlu1 %v3228_v30, %s3428_s11  ;;  %3254 = vrot.lane.b32.xlu0 %v3228_v30, %s3429_s10  ;;  %s4611_s10 = smov 112   ;;  %s4612_s11 = smov 1  }
 0x212   : > { %3249 = vrot.lane.b32.xlu2 %v3228_v30, %s3430_s7  ;;  %s4689_s7 = sld [smem:[#allocation17_spill]] }
 0x218   : > { %2127 = vrot.lane.b32.xlu1 %v3974_v25, %s3415_s22  ;;  %3269 = vrot.lane.b32.xlu0 %v3268_v43, %s3420_s2 }
 0x21a   : > { %3264 = vrot.lane.b32.xlu2 %v3268_v43, %s3416_s23 }
 0x220   : > { %3274 = vrot.lane.b32.xlu1 %v3268_v43, %s4609_s26  ;;  %3284 = vrot.lane.b32.xlu0 %v3268_v43, %s4610_s1 }
 0x222   : > { %3279 = vrot.lane.b32.xlu2 %v3268_v43, %s4611_s10 }
 0x228   : > { %3294 = vrot.lane.b32.xlu1 %v3268_v43, %s4612_s11  ;;  %3289 = vrot.lane.b32.xlu0 %v3268_v43, %s4613_s3 }
 0x22a   : > { %2129 = vrot.lane.b32.xlu2 %v3976_v31, %s3415_s22 }
 0x230   : > { %2241 = vperm.xlu0 %3155, %v2068_v18  }
 0x232   : > { %2234 = vperm.xlu2 %3227, %v2067_v47  }
 0x25c   : > { %v3230_v51 = vpop.permute.xlu2 %3229 }
 0x25d   : > { %v3232_v63 = vunpack.i.h.bf16 %v3230_v51  ;;  %v3231_v0 = vunpack.i.l.bf16 %v3230_v51 }
 0x25f   : > { %v1889_v26 = vsel %vm4549_vm0, %v3232_v63, %v3231_v0  ;;  %vm1874_vm0 = vcmp.lt.s32.totalorder %v3702_v37, 98 }
 0x264   : > { %v3235_v54 = vpop.permute.xlu2 %3234 }
 0x265   : > { %v3237_v1 = vunpack.i.h.bf16 %v3235_v54  ;;  %v3236_v2 = vunpack.i.l.bf16 %v3235_v54 }
 0x267   : > { %v1862_v3 = vsel %vm1861_vm7, %v3236_v2, %v3237_v1  ;;  %v1863_v28 = vsel %vm1861_vm7, %v3237_v1, %v3236_v2  ;;  %vm1780_vm7 = vcmp.lt.s32.totalorder %v1774_v22, 256 }
 0x268   : > { %v1868_v32 = vsel %vm4619_vm12, %v1862_v3, 0.0  ;;  %v1869_v38 = vsel %vm4045_vm15, %v1863_v28, 0.0  ;;  %vm4622_vm15 = vcmp.lt.s32.totalorder %v3702_v37, 2 }
 0x269   : > { %vm4625_vm12 = vmmov %vm4622_vm15 }
 0x26c   : > { %v3994_v16 = vpop.permute.xlu2 %3249 }
 0x26d   : > { %v3252_v33 = vunpack.i.h.bf16 %v3994_v16  ;;  %v3251_v34 = vunpack.i.l.bf16 %v3994_v16  ;;  %v1923_v16 = vrot.slane %v1868_v32, 4 }
 0x272   : > { %v1899_v7 = vpop.permute.xlu1 %1898  ;;  %v1897_v8 = vpop.permute.xlu0 %1896 }
 0x273   : > { %v1901_v9 = vsel %vm1900_vm5, %v1897_v8, %v1899_v7  ;;  %v1902_v10 = vsel %vm1900_vm5, %v1899_v7, %v1897_v8  ;;  %vm1790_vm5 = vcmp.lt.s32.totalorder %v1784_v62, 256 }
 0x274   : > { %v1908_v13 = vsel %vm4009_vm14, %v1902_v10, 0.0  ;;  %v1907_v14 = vsel %vm4548_vm1, %v1901_v9, 0.0  ;;  %v4029_v23 = vpop.permute.xlu2 %3264  ;;  %vm4553_vm1 = vcmp.ge.s32.totalorder %v4016_v11, 0  ;;  %vm4618_vm14 = vcmp.lt.s32.totalorder %v3702_v37, 96 }
 0x275   : > { %3056 = vmatpush.msk.msrb.mxu0 %vm4547_vm9, %v1907_v14  ;;  %3058 = vmatpush.msk.msra.mxu1 %vm4547_vm9, %v1908_v13  ;;  %v1888_v29 = vsel %vm4618_vm14, %v3231_v0, %v3232_v63  ;;  %v1895_v30 = vsel %vm1790_vm5, %v1889_v26, 0.0  ;;  %vm4065_vm5 = vmand %vm1710_vm2, %vm1780_vm7  ;;  %v3267_v61 = vunpack.i.h.bf16 %v4029_v23  ;;  %v3266_v62 = vunpack.i.l.bf16 %v4029_v23 }
 0x276   : > { %v1929_v51 = vrot.slane %v1888_v29, 4  ;;  %v1930_v55 = vrot.slane %v1895_v30, 4  ;;  %v1924_v0 = vrot.slane %v1869_v38, 4  ;;  %vm4083_vm14 = vmand %vm4553_vm1, %vm1755_vm8  ;;  %vm4626_vm7 = vcmask 1043456  }
 0x277   : > { %vm4628_vm6 = vmmov %vm4626_vm7  ;;  %vm1833_vm8 = vcmp.lt.s32.totalorder %v3702_v37, 30  ;;  %vm1807_vm9 = vcmp.lt.s32.totalorder %v3702_v37, 34 }
 0x27a   : > { %v3245_v35 = vpop.permute.xlu1 %3244  ;;  %v3240_v36 = vpop.permute.xlu0 %3239 }
 0x27b   : > { %v3247_v27 = vunpack.i.h.bf16 %v3245_v35  ;;  %v3246_v43 = vunpack.i.l.bf16 %v3245_v35  ;;  %v3242_v18 = vunpack.i.h.bf16 %v3240_v36  ;;  %v3241_v47 = vunpack.i.l.bf16 %v3240_v36 }
 0x27c   : > { %v4089_v10 = vpop.permute.xlu2 %3279 }
 0x27d   : > { %v1875_v63 = vsel %vm1874_vm0, %v3241_v47, %v3242_v18  ;;  %v1847_v1 = vsel %vm4622_vm15, %v3246_v43, %v3247_v27  ;;  %v1876_v7 = vsel %vm1874_vm0, %v3242_v18, %v3241_v47  ;;  %v1848_v9 = vsel %vm4625_vm12, %v3247_v27, %v3246_v43  ;;  %vm4629_vm12 = vmmov %vm4628_vm6 }
 0x27e   : > { %v1881_v2 = vsel %vm4553_vm1, %v1875_v63, 0.0  ;;  %v1882_v14 = vsel %vm4065_vm5, %v1876_v7, 0.0  ;;  %vm1745_vm15 = vcmp.ge.s32.totalorder %v1743_v41, 0  ;;  %vm4627_vm0 = vcmp.lt.s32.totalorder %v3702_v37, 32 }
 0x27f   : > { %v1939_v13 = vsel %vm4626_vm7, %v1881_v2, %v1929_v51  ;;  %v1822_v22 = vsel %vm4627_vm0, %v3252_v33, %v3251_v34  ;;  %v1940_v23 = vsel %vm4628_vm6, %v1882_v14, %v1930_v55  ;;  %vm1717_vm1 = vcmp.ge.s32.totalorder %v1715_v59, 0  ;;  %vm4630_vm7 = vmmov %vm4628_vm6 }
 0x280   : > { %1962 = vmatpush.msrb.mxu0 %v1939_v13  ;;  %1982 = vmatpush.msra.mxu1 %v1940_v23  ;;  %v1937_v24 = vsel %vm4629_vm12, %v3966_v5, %v1923_v16  ;;  %v1938_v26 = vsel %vm4630_vm7, %v3968_v6, %v1924_v0  ;;  %v1853_v3 = vsel %vm4083_vm14, %v1848_v9, 0.0  ;;  %v1854_v28 = vsel %vm1710_vm2, %v1847_v1, 0.0  ;;  %vm4631_vm6 = vmmov %vm4627_vm0  ;;  %v1704_v1 = vld [vmem:[%s4641_s28] sm:$0xf]  ;;  %s4690_s28 = sld [smem:[#allocation16_spill]] }
 0x281   : > { %v1821_v4 = vsel %vm4631_vm6, %v3251_v34, %v3252_v33  ;;  %vm4632_vm5 = vcmp.lt.s32.totalorder %v3702_v37, 127  ;;  %vm4634_vm12 = vcmp.lt.s32.totalorder %v4000_v58, 16  ;;  %vm4637_vm14 = vcmp.ge.s32.totalorder %v4019_v12, 0 }
 0x282   : > { %v2107_v29 = vsel %vm4632_vm5, %v3266_v62, %v3267_v61  ;;  %vm4633_vm0 = vmmov %vm4632_vm5  ;;  %v3260_v32 = vpop.permute.xlu1 %3259  ;;  %v3255_v5 = vpop.permute.xlu0 %3254  ;;  %1963 = vmatpush.msrb.mxu0 %v1937_v24  ;;  %v1827_v35 = vsel %vm4637_vm14, %v1822_v22, 0.0  ;;  %1983 = vmatpush.msra.mxu1 %v1938_v26  ;;  %vm4638_vm6 = vcmp.ge.s32.totalorder %v4016_v11, 0  ;;  %v3282_v58 = vunpack.i.h.bf16 %v4089_v10 }
 0x283   : > { %v2108_v30 = vsel %vm4633_vm0, %v3267_v61, %v3266_v62  ;;  %vm4116_vm7 = vmand %vm4634_vm12, %vm1745_vm15  ;;  %v3262_v33 = vunpack.i.h.bf16 %v3260_v32  ;;  %v3261_v34 = vunpack.i.l.bf16 %v3260_v32  ;;  %v3257_v36 = vunpack.i.h.bf16 %v3255_v5 }
 0x284   : > { %v3256_v38 = vunpack.i.l.bf16 %v3255_v5  ;;  %vm4125_vm5 = vmand %vm4638_vm6, %vm1717_vm1  ;;  %v3281_v41 = vunpack.i.l.bf16 %v4089_v10  ;;  %v1917_v43 = vrot.slane %v1853_v3, 4  ;;  %v1918_v12 = vrot.slane %v1854_v28, 4  ;;  %v2130_v7 = vpop.permute.xlu2 %2129 }
 0x285   : > { %v1809_v11 = vsel %vm1807_vm9, %v3262_v33, %v3261_v34  ;;  %v1808_v51 = vsel %vm1807_vm9, %v3261_v34, %v3262_v33  ;;  %vm4642_vm1 = vcmp.lt.s32.totalorder %v3997_v57, 16  ;;  %vm4643_vm15 = vcmask 1043456  }
 0x286   : > { %v1835_v18 = vsel %vm1833_vm8, %v3257_v36, %v3256_v38  ;;  %v1834_v47 = vsel %vm1833_vm8, %v3256_v38, %v3257_v36  ;;  %v1814_v16 = vsel %vm4125_vm5, %v1809_v11, 0.0  ;;  %v1815_v59 = vsel %vm1710_vm2, %v1808_v51, 0.0  ;;  %vm4644_vm8 = vmmov %vm4643_vm15 }
 0x287   : > { %v1840_v54 = vsel %vm4116_vm7, %v1835_v18, 0.0  ;;  %v1841_v55 = vsel %vm4642_vm1, %v1834_v47, 0.0  ;;  %v1911_v63 = vrot.slane %v1827_v35, 4  ;;  %v1912_v0 = vrot.slane %v1821_v4, 4  ;;  %vm4646_vm0 = vmmov %vm4644_vm8 }
 0x288   : > { %v1935_v61 = vsel %vm4643_vm15, %v1840_v54, %v1917_v43  ;;  %v1936_v62 = vsel %vm4644_vm8, %v1841_v55, %v1918_v12  ;;  %vm4645_vm9 = vcmp.lt.s32.totalorder %v3726_v50, 16  ;;  %v2110_v57 = vsel %vm3782_vm4, %v2108_v30, 0.0  ;;  %vm4647_vm12 = vmmov %vm4646_vm0 }
 0x289   : > { %1964 = vmatpush.msrb.mxu0 %v1935_v61  ;;  %1984 = vmatpush.msra.mxu1 %v1936_v62  ;;  %v2109_v2 = vsel %vm4645_vm9, %v2107_v29, 0.0  ;;  %v1933_v8 = vsel %vm4646_vm0, %v1814_v16, %v1911_v63  ;;  %v1934_v15 = vsel %vm4647_vm12, %v1815_v59, %v1912_v0  ;;  %vm4648_vm2 = vcmp.lt.s32.totalorder %v3702_v37, 112  ;;  %vm4653_vm1 = vmmov %vm4645_vm9 }
 0x28a   : > { %v2124_v9 = vsel %vm4648_vm2, %v3282_v58, %v3281_v41  ;;  %v2128_v10 = vpop.permute.xlu1 %2127  ;;  %v3270_v13 = vpop.permute.xlu0 %3269  ;;  %vm4649_vm7 = vcmp.lt.s32.totalorder %v3702_v37, 111  ;;  %vm4651_vm6 = vcmask 293888   ;;  %v2155_v26 = vrot.slane %v2109_v2, 6  ;;  %vm4654_vm15 = vmmov %vm4648_vm2 }
 0x28b   : > { %1965 = vmatpush.msrb.mxu0 %v1933_v8  ;;  %1985 = vmatpush.msra.mxu1 %v1934_v15  ;;  %v2131_v14 = vsel %vm4649_vm7, %v2128_v10, %v2130_v7  ;;  %vm4650_vm14 = vmmov %vm4649_vm7  ;;  %v3272_v23 = vunpack.i.h.bf16 %v3270_v13  ;;  %v3271_v24 = vunpack.i.l.bf16 %v3270_v13  ;;  %v2156_v3 = vrot.slane %v2110_v57, 6 }
 0x28c   : > { %v2132_v22 = vsel %vm4650_vm14, %v2130_v7, %v2128_v10  ;;  %3057 = vmatmul.msk.f32.vlgmr.msrb.gmra.mxu0 %vm4651_vm6, %v1704_v1  ;;  %vm4652_vm5 = vmmov %vm4651_vm6  ;;  %v2133_v28 = vsel %vm4653_vm1, %v2131_v14, 0.0  ;;  %v2123_v29 = vsel %vm4654_vm15, %v3281_v41, %v3282_v58  ;;  %vm4655_vm8 = vcmp.lt.s32.totalorder %v3702_v37, 113 }
 0x28d   : > { %3059 = vmatmul.msk.f32.vlgmr.msra.gmra.mxu1 %vm4652_vm5, %v1704_v1  ;;  %v2134_v4 = vsel %vm3744_vm10, %v2132_v22, 0.0  ;;  %v2115_v30 = vsel %vm4655_vm8, %v3271_v24, %v3272_v23  ;;  %vm4656_vm9 = vmmov %vm4655_vm8  ;;  %vm4657_vm0 = vcmask 1041408   ;;  %vm4659_vm2 = vcmp.lt.s32.totalorder %v3714_v45, 256 }
 0x28e   : > { %v2116_v32 = vsel %vm4656_vm9, %v3272_v23, %v3271_v24  ;;  %3062 = vmatpush.msk.msra.mxu0 %vm4657_vm0, %v2133_v28  ;;  %vm4658_vm12 = vmmov %vm4657_vm0  ;;  %v2126_v5 = vsel %vm4659_vm2, %v2124_v9, 0.0  ;;  %vm4660_vm7 = vcmp.ge.s32.totalorder %v3733_v52, 0  ;;  %v2167_v36 = vrot.slane %v2123_v29, 2 }
 0x28f   : > { %3064 = vmatpush.msk.msrb.mxu1 %vm4658_vm12, %v2134_v4  ;;  %v2117_v6 = vsel %vm4660_vm7, %v2115_v30, 0.0  ;;  %v2118_v35 = vsel %vm3752_vm13, %v2116_v32, 0.0  ;;  %vm4661_vm14 = vmmov %vm4657_vm0  ;;  %v2168_v27 = vrot.slane %v2126_v5, 2  ;;  %vm4663_vm5 = vcmask 1043456  }
 0x290   : > { %v2161_v33 = vrot.slane %v2117_v6, 4  ;;  %v2162_v34 = vrot.slane %v2118_v35, 4  ;;  %v2177_v38 = vsel %vm4661_vm14, %v3974_v25, %v2155_v26  ;;  %vm4662_vm6 = vmmov %vm4657_vm0  ;;  %vm4665_vm15 = vcmask 1045504  }
 0x291   : > { %v2178_v58 = vsel %vm4662_vm6, %v3976_v31, %v2156_v3  ;;  %vm4664_vm1 = vmmov %vm4663_vm5  ;;  %vm4667_vm9 = vcmp.lt.s32.totalorder %v3702_v37, 16  ;;  %vm4668_vm0 = vcmp.lt.s32.totalorder %v3702_v37, 15  ;;  %vm4671_vm7 = vcmp.ge.s32.totalorder %v3805_v42, 0 }
 0x292   : > { %v2179_v41 = vsel %vm4663_vm5, %v2177_v38, %v2161_v33  ;;  %v2180_v43 = vsel %vm4664_vm1, %v2178_v58, %v2162_v34  ;;  %v3275_v12 = vpop.permute.xlu1 %3274  ;;  %v3285_v18 = vpop.permute.xlu0 %3284  ;;  %vm4666_vm8 = vmmov %vm4665_vm15  ;;  %vm4672_vm14 = vcmp.lt.s32.totalorder %v3717_v46, 16  ;;  %vm4674_vm6 = vcmp.lt.s32.totalorder %v3702_v37, 1  ;;  %v2066_v34 = vld [vmem:[%s4673_s0] sm:$0x7]  ;;  %s4725_s0 = sld [smem:[#allocation5_spill]] }
 0x293   : > { %v2181_v47 = vsel %vm4665_vm15, %v2179_v41, %v2167_v36  ;;  %v2182_v11 = vsel %vm4666_vm8, %v2180_v43, %v2168_v27  ;;  %v3277_v51 = vunpack.i.h.bf16 %v3275_v12  ;;  %v3276_v54 = vunpack.i.l.bf16 %v3275_v12  ;;  %vm4669_vm12 = vmmov %vm4668_vm0  ;;  %v2235_v41 = vpop.permute.xlu2 %2234 }
 0x294   : > { %v3287_v55 = vunpack.i.h.bf16 %v3285_v18  ;;  %v3286_v16 = vunpack.i.l.bf16 %v3285_v18  ;;  %2206 = vmatpush.msra.mxu0 %v2181_v47  ;;  %2226 = vmatpush.msrb.mxu1 %v2182_v11  ;;  %vm4670_vm2 = vmmov %vm4667_vm9  ;;  %vm4676_vm1 = vcmp.lt.s32.totalorder %v3702_v37, 17  ;;  %vm4678_vm8 = vcmp.ge.s32.totalorder %v3722_v48, 0 }
 0x295   : > { %v2082_v25 = vsel %vm4667_vm9, %v3277_v51, %v3276_v54  ;;  %v2081_v61 = vsel %vm4670_vm2, %v3276_v54, %v3277_v51  ;;  %vm4675_vm5 = vmmov %vm4674_vm6  ;;  %vm4679_vm9 = vnez %v4588_v49 }
 0x296   : > { %v2089_v31 = vsel %vm4668_vm0, %v3286_v16, %v3287_v55  ;;  %v2090_v59 = vsel %vm4669_vm12, %v3287_v55, %v3286_v16  ;;  %v2083_v62 = vsel %vm4671_vm7, %v2082_v25, 0.0  ;;  %v2138_v10 = vrot.slane %v2081_v61, 6  ;;  %vm4677_vm15 = vmmov %vm4676_vm1 }
 0x297   : > { %v2091_v63 = vsel %vm3818_vm11, %v2090_v59, 0.0  ;;  %v2092_v0 = vsel %vm4672_vm14, %v2089_v31, 0.0  ;;  %v2137_v9 = vrot.slane %v2083_v62, 6  ;;  %vm4680_vm0 = vmmov %vm4678_vm8  ;;  %vm4681_vm12 = vcmask 1041408   ;;  %v2250_v31 = vld [vmem:[%s4689_s7] sm:$0xf] }
 0x298   : > { %v2143_v13 = vrot.slane %v2091_v63, 4  ;;  %v2144_v14 = vrot.slane %v2092_v0, 4  ;;  %vm4682_vm2 = vmmov %vm4681_vm12  ;;  %vm4683_vm7 = vcmask 1043456   ;;  %v2249_v59 = vld [vmem:[%s4690_s28] sm:$0xf]  ;;  %s4726_s7 = sld [smem:[#allocation20_spill]] }
 0x299   : > { %vm4684_vm14 = vmmov %vm4683_vm7  ;;  %s3435_s28 = smov 125  }
 0x29a   : > { %v3295_v1 = vpop.permute.xlu1 %3294  ;;  %v3290_v2 = vpop.permute.xlu0 %3289 }
 0x29b   : > { %v3297_v57 = vunpack.i.h.bf16 %v3295_v1  ;;  %v3296_v7 = vunpack.i.l.bf16 %v3295_v1  ;;  %v3292_v8 = vunpack.i.h.bf16 %v3290_v2  ;;  %v3291_v15 = vunpack.i.l.bf16 %v3290_v2 }
 0x29d   : > { %v2097_v22 = vsel %vm4674_vm6, %v3296_v7, %v3297_v57  ;;  %v2098_v23 = vsel %vm4675_vm5, %v3297_v57, %v3296_v7  ;;  %v2073_v24 = vsel %vm4676_vm1, %v3291_v15, %v3292_v8  ;;  %v2074_v26 = vsel %vm4677_vm15, %v3292_v8, %v3291_v15 }
 0x29e   : > { %v2075_v3 = vsel %vm3850_vm3, %v2074_v26, 0.0  ;;  %v2076_v28 = vsel %vm4678_vm8, %v2073_v24, 0.0  ;;  %v2099_v4 = vsel %vm4679_vm9, %v2098_v23, 0.0  ;;  %v2100_v29 = vsel %vm4680_vm0, %v2097_v22, 0.0 }
 0x29f   : > { %v2149_v30 = vrot.slane %v2099_v4, 2  ;;  %v2171_v32 = vsel %vm4681_vm12, %v2075_v3, %v2137_v9  ;;  %v2150_v5 = vrot.slane %v2100_v29, 2  ;;  %v2172_v6 = vsel %vm4682_vm2, %v2076_v28, %v2138_v10 }
 0x2a0   : > { %v2173_v35 = vsel %vm4683_vm7, %v2171_v32, %v2143_v13  ;;  %v2174_v33 = vsel %vm4684_vm14, %v2172_v6, %v2144_v14  ;;  %vm4685_vm6 = vcmask 1045504   ;;  %vm4687_vm1 = vcmask 146432  }
 0x2a1   : > { %v2175_v36 = vsel %vm4685_vm6, %v2173_v35, %v2149_v30  ;;  %vm4686_vm5 = vmmov %vm4685_vm6  ;;  %vm4691_vm8 = vcmp.lt.s32.totalorder %v3702_v37, 113  ;;  %vm4693_vm12 = vcmp.ge.s32.totalorder %v3733_v52, 0  ;;  %vm4694_vm2 = vcmp.lt.s32.totalorder %v3702_v37, 127 }
 0x2a2   : > { %v2176_v38 = vsel %vm4686_vm5, %v2174_v33, %v2150_v5  ;;  %2207 = vmatpush.msra.mxu0 %v2175_v36  ;;  %vm4688_vm15 = vmmov %vm4687_vm1  ;;  %v2242_v11 = vpop.permute.xlu0 %2241  ;;  %vm4696_vm14 = vcmp.lt.s32.totalorder %v3702_v37, 112  ;;  %vm4698_vm6 = vcmp.lt.s32.totalorder %v3702_v37, 15 }
 0x2a3   : > { %2227 = vmatpush.msrb.mxu1 %v2176_v38  ;;  %3063 = vmatmul.msk.f32.vlgmr.msra.gmra.mxu0 %vm4687_vm1, %v2066_v34  ;;  %vm4692_vm0 = vmmov %vm4691_vm8  ;;  %vm2374_vm1 = vcmask 1044480  }
 0x2a4   : > { %3065 = vmatmul.msk.f32.vlgmr.msrb.gmra.mxu1 %vm4688_vm15, %v2066_v34  ;;  %vm4695_vm7 = vmmov %vm4694_vm2 }
 0x2a5   : > { %vm4699_vm5 = vmmov %vm4698_vm6 }
 0x2a6   : > { %vm4700_vm15 = vmmov %vm4696_vm14 }
 0x309   : > { %v4229_v27 = vpop.f32.mrf.mxu0 }
 0x30a   : > { %v4231_v58 = vpop.f32.mrf.mxu1 }
 0x320   : > { %v2209_v43 = vpop.f32.mrf.mxu0 }
 0x321   : > { %v2229_v12 = vpop.f32.mrf.mxu1  ;;  %v2237_v18 = vmul.f32 %v2235_v41, %v2209_v43 }
 0x322   : > { %v2238_v47 = vmul.f32 %v2235_v41, %v2229_v12 }
 0x323   : > { %v2244_v51 = vadd.f32 %v2242_v11, %v2237_v18 }
 0x324   : > { %v2245_v54 = vadd.f32 %v2242_v11, %v2238_v47 }
 0x325   : > { %v4233_v55 = vmax.f32 %v2244_v51, 0.0 }
 0x326   : > { %v4235_v16 = vmax.f32 %v2245_v54, 0.0 }
 0x327   : > { %2309 = vrot.lane.b32.xlu0 %v4233_v55, %s3415_s22  ;;  %v2337_v4 = vrot.slane %v4233_v55, 4 }
 0x328   : > { %v3303_v25 = vpack.i.bf16 %v4235_v16, %v4233_v55  ;;  %v2338_v32 = vrot.slane %v4235_v16, 4 }
 0x32a   : > { %3304 = vrot.lane.b32.xlu2 %v3303_v25, %s3420_s2  ;;  %3299 = vrot.lane.b32.xlu1 %v3303_v25, %s3416_s23  ;;  %s4722_s23 = sld [smem:[#allocation4_spill]] }
 0x32b   : > { %s4723_s2 = sld [smem:[#allocation19_spill]] }
 0x32f   : > { %3309 = vrot.lane.b32.xlu0 %v3303_v25, %s4610_s1  ;;  %s4724_s1 = sld [smem:[#allocation9_spill]] }
 0x332   : > { %3319 = vrot.lane.b32.xlu2 %v3303_v25, %s4611_s10  ;;  %3314 = vrot.lane.b32.xlu1 %v3303_v25, %s4612_s11  ;;  %s3433_s10 = smov 3   ;;  %s3434_s11 = smov 83  }
 0x337   : > { %3329 = vrot.lane.b32.xlu0 %v3303_v25, %s4613_s3  ;;  %s4716_s3 = sld [smem:[#allocation15_spill]] }
 0x33a   : > { %3324 = vrot.lane.b32.xlu2 %v3303_v25, %s4609_s26  ;;  %2311 = vrot.lane.b32.xlu1 %v4235_v16, %s3415_s22  ;;  %s3431_s22 = smov 77   ;;  %s3432_s26 = smov 80  }
 0x33d   : > { %v2248_v19 = vld [vmem:[%s4716_s3] sm:$0xf]  ;;  %s4727_s3 = sld [smem:[#allocation10_spill]] }
 0x342   : > { %2436 = vperm.xlu2 %3227, %v2250_v31   ;;  %2429 = vperm.xlu1 %3156, %v2249_v59  }
 0x384   : > { %v3305_v61 = vpop.permute.xlu2 %3304 }
 0x385   : > { %v3307_v63 = vunpack.i.h.bf16 %v3305_v61  ;;  %v3306_v0 = vunpack.i.l.bf16 %v3305_v61 }
 0x387   : > { %v2297_v8 = vsel %vm4691_vm8, %v3306_v0, %v3307_v63  ;;  %v2298_v15 = vsel %vm4692_vm0, %v3307_v63, %v3306_v0  ;;  %vm4701_vm8 = vcmp.lt.s32.totalorder %v3702_v37, 16  ;;  %vm4702_vm0 = vcmp.lt.s32.totalorder %v3714_v45, 256 }
 0x388   : > { %v2299_v14 = vsel %vm4693_vm12, %v2297_v8, 0.0  ;;  %v2300_v22 = vsel %vm3752_vm13, %v2298_v15, 0.0  ;;  %vm4697_vm13 = vcmp.lt.s32.totalorder %v3726_v50, 16  ;;  %vm4703_vm12 = vcmp.lt.s32.totalorder %v3717_v46, 16 }
 0x389   : > { %v2349_v60 = vrot.slane %v2299_v14, 6  ;;  %v2350_v5 = vrot.slane %v2300_v22, 6 }
 0x38c   : > { %v3320_v62 = vpop.permute.xlu2 %3319 }
 0x38d   : > { %v3322_v9 = vunpack.i.h.bf16 %v3320_v62  ;;  %v3321_v10 = vunpack.i.l.bf16 %v3320_v62 }
 0x38f   : > { %v2306_v29 = vsel %vm4696_vm14, %v3322_v9, %v3321_v10  ;;  %v2305_v43 = vsel %vm4700_vm15, %v3321_v10, %v3322_v9  ;;  %vm4706_vm14 = vcmp.ge.s32.totalorder %v3722_v48, 0 }
 0x390   : > { %v2308_v20 = vsel %vm4702_vm0, %v2306_v29, 0.0  ;;  %v2355_v61 = vrot.slane %v2305_v43, 3 }
 0x391   : > { %v2356_v62 = vrot.slane %v2308_v20, 3 }
 0x394   : > { %v3325_v13 = vpop.permute.xlu2 %3324 }
 0x395   : > { %v3327_v26 = vunpack.i.h.bf16 %v3325_v13  ;;  %v3326_v3 = vunpack.i.l.bf16 %v3325_v13 }
 0x397   : > { %v2264_v12 = vsel %vm4701_vm8, %v3327_v26, %v3326_v3 }
 0x399   : > { %v4252_v1 = vpop.permute.xlu0 %2309 }
 0x39c   : > { %v3300_v2 = vpop.permute.xlu1 %3299 }
 0x39d   : > { %v3302_v57 = vunpack.i.h.bf16 %v3300_v2  ;;  %v3301_v7 = vunpack.i.l.bf16 %v3300_v2 }
 0x39f   : > { %v2289_v23 = vsel %vm4694_vm2, %v3301_v7, %v3302_v57  ;;  %v2290_v24 = vsel %vm4695_vm7, %v3302_v57, %v3301_v7  ;;  %vm4704_vm2 = vcmp.lt.s32.totalorder %v3702_v37, 1 }
 0x3a0   : > { %v2291_v6 = vsel %vm4697_vm13, %v2289_v23, 0.0  ;;  %v2292_v35 = vsel %vm3782_vm4, %v2290_v24, 0.0  ;;  %vm2364_vm4 = vcmask 1040384   ;;  %vm4705_vm7 = vmmov %vm4704_vm2  ;;  %vm2369_vm13 = vcmask 1046528  }
 0x3a1   : > { %v3310_v28 = vpop.permute.xlu0 %3309  ;;  %v2343_v54 = vrot.slane %v2291_v6, 1  ;;  %v2344_v55 = vrot.slane %v2292_v35, 1 }
 0x3a2   : > { %v3312_v30 = vunpack.i.h.bf16 %v3310_v28  ;;  %v3311_v52 = vunpack.i.l.bf16 %v3310_v28 }
 0x3a4   : > { %v3315_v33 = vpop.permute.xlu1 %3314  ;;  %v2271_v34 = vsel %vm4698_vm6, %v3311_v52, %v3312_v30  ;;  %v2272_v36 = vsel %vm4699_vm5, %v3312_v30, %v3311_v52  ;;  %vm4707_vm6 = vmmov %vm4701_vm8  ;;  %vm4708_vm5 = vcmp.ge.s32.totalorder %v3805_v42, 0  ;;  %vm4711_vm8 = vcmp.lt.s32.totalorder %v3702_v37, 17 }
 0x3a5   : > { %v3317_v38 = vunpack.i.h.bf16 %v3315_v33  ;;  %v3316_v41 = vunpack.i.l.bf16 %v3315_v33  ;;  %v2273_v18 = vsel %vm3818_vm11, %v2272_v36, 0.0  ;;  %v2274_v47 = vsel %vm4703_vm12, %v2271_v34, 0.0  ;;  %vm4712_vm0 = vmmov %vm4711_vm8  ;;  %v2437_v36 = vpop.permute.xlu2 %2436 }
 0x3a6   : > { %vm2359_vm11 = vcmask 1042432   ;;  %v2325_v46 = vrot.slane %v2273_v18, 2  ;;  %v2326_v31 = vrot.slane %v2274_v47, 2  ;;  %v2263_v63 = vsel %vm4707_vm6, %v3326_v3, %v3327_v26  ;;  %v1138_v18 = vld [vmem:[%s4722_s23] sm:$0xf] }
 0x3a7   : > { %v2279_v11 = vsel %vm4704_vm2, %v3316_v41, %v3317_v38  ;;  %v2280_v51 = vsel %vm4705_vm7, %v3317_v38, %v3316_v41  ;;  %v2265_v0 = vsel %vm4708_vm5, %v2264_v12, 0.0  ;;  %vm4713_vm12 = vcmp.lt.s32.totalorder %v3702_v37, 111  ;;  %v2444_v47 = vld [vmem:[%s4723_s2] sm:$0xf] }
 0x3a8   : > { %v2281_v16 = vsel %vm4679_vm9, %v2280_v51, 0.0  ;;  %v2282_v45 = vsel %vm4706_vm14, %v2279_v11, 0.0  ;;  %vm4709_vm9 = vcmask 1041408   ;;  %vm4714_vm2 = vmmov %vm4713_vm12  ;;  %v2319_v22 = vrot.slane %v2265_v0, 5  ;;  %v1705_v11 = vld [vmem:[%s4724_s1] sm:$0xf] }
 0x3a9   : > { %v2331_v25 = vrot.slane %v2281_v16, 7  ;;  %v2332_v53 = vrot.slane %v2282_v45, 7  ;;  %v3330_v59 = vpop.permute.xlu0 %3329  ;;  %v2372_v7 = vsel %vm4709_vm9, %v2343_v54, %v2349_v60  ;;  %vm4710_vm15 = vmmov %vm4709_vm9  ;;  %v2320_v23 = vrot.slane %v2263_v63, 5  ;;  %v1139_v51 = vld [vmem:[%s4725_s0] sm:$0xf]  ;;  %v2754_v45 = vld [vmem:[%s4729_s8 + $0x8] sm:$0xff] }
 0x3aa   : > { %v3332_v49 = vunpack.i.h.bf16 %v3330_v59  ;;  %v3331_v2 = vunpack.i.l.bf16 %v3330_v59  ;;  %v2373_v8 = vsel %vm4710_vm15, %v2344_v55, %v2350_v5  ;;  %vm4715_vm7 = vcmp.lt.s32.totalorder %v3726_v50, 16  ;;  %v2755_v16 = vld [vmem:[%s4728_s5] sm:$0xff]  ;;  %v2849_v59 = vld [vmem:[%s3612_s25 + $0x8] sm:$0xff] }
 0x3ab   : > { %v2365_v15 = vsel %vm2364_vm4, %v2325_v46, %v2331_v25  ;;  %v2366_v9 = vsel %vm2364_vm4, %v2326_v31, %v2332_v53  ;;  %vm4717_vm4 = vcmask 1043456   ;;  %vm4719_vm6 = vcmp.ge.s32.totalorder %v3722_v48, 0  ;;  %v2753_v25 = vld [vmem:[%s4729_s8] sm:$0xff]  ;;  %v2847_v53 = vld [vmem:[%s3607_s12 + $0x8] sm:$0xff] }
 0x3ac   : > { %v2312_v57 = vpop.permute.xlu1 %2311  ;;  %v2255_v10 = vsel %vm4711_vm8, %v3331_v2, %v3332_v49  ;;  %v2256_v13 = vsel %vm4712_vm0, %v3332_v49, %v3331_v2  ;;  %v2367_v3 = vsel %vm4717_vm4, %v2365_v15, %v2337_v4  ;;  %vm4718_vm14 = vmmov %vm4717_vm4  ;;  %v2375_v50 = vsel %vm2374_vm1, %v2372_v7, %v2355_v61  ;;  %v2848_v61 = vld [vmem:[%s3612_s25] sm:$0xff] }
 0x3ad   : > { %v2313_v42 = vsel %vm4713_vm12, %v4252_v1, %v2312_v57  ;;  %v2314_v14 = vsel %vm4714_vm2, %v2312_v57, %v4252_v1  ;;  %v2368_v28 = vsel %vm4718_vm14, %v2366_v9, %v2338_v32  ;;  %v2257_v1 = vsel %vm3850_vm3, %v2256_v13, 0.0  ;;  %vm4732_vm0 = vmmov %vm4717_vm4 }
 0x3ae   : > { %v2315_v24 = vsel %vm4715_vm7, %v2313_v42, 0.0  ;;  %v2316_v26 = vsel %vm3744_vm10, %v2314_v14, 0.0  ;;  %v2258_v29 = vsel %vm4719_vm6, %v2255_v10, 0.0  ;;  %v2376_v56 = vsel %vm2374_vm1, %v2373_v8, %v2356_v62  ;;  %vm4733_vm12 = vmmov %vm4732_vm0 }
 0x3af   : > { %3066 = vmatpush.msk.msra.mxu2 %vm2359_vm11, %v2315_v24  ;;  %3068 = vmatpush.msk.msrb.mxu3 %vm2359_vm11, %v2316_v26  ;;  %v2360_v30 = vsel %vm2359_vm11, %v2257_v1, %v2319_v22  ;;  %v2361_v52 = vsel %vm2359_vm11, %v2258_v29, %v2320_v23  ;;  %v2370_v4 = vsel %vm2369_vm13, %v2367_v3, %v2343_v54  ;;  %vm2377_vm3 = vcmask 220160   ;;  %v2445_v54 = vld [vmem:[%s4726_s7] sm:$0xf] }
 0x3b0   : > { %v2371_v32 = vsel %vm2369_vm13, %v2368_v28, %v2344_v55  ;;  %vm4720_vm10 = vcmask 1045504   ;;  %v1706_v55 = vld [vmem:[%s4727_s3] sm:$0xf]  ;;  %v4358_v62 = vadd.s32 3, %v3708_v40  ;;  %v2533_v63 = vadd.s32 51, %v3705_v39 }
 0x3b1   : > { %2400 = vmatpush.msra.mxu2 %v2375_v50  ;;  %2420 = vmatpush.msrb.mxu3 %v2376_v56  ;;  %v2362_v48 = vsel %vm4720_vm10, %v2360_v30, %v2325_v46  ;;  %vm4721_vm5 = vmmov %vm4720_vm10  ;;  %v2846_v46 = vld [vmem:[%s3607_s12] sm:$0xff]  ;;  %v4362_v49 = vadd.s32 3, %v3711_v44  ;;  %vm2639_vm13 = vcmp.lt.s32.totalorder %v3702_v37, 77  ;;  %v2523_v7 = vadd.s32 48, %v3705_v39 }
 0x3b2   : > { %v2363_v60 = vsel %vm4721_vm5, %v2361_v52, %v2326_v31  ;;  %v2756_v31 = vld [vmem:[%s4728_s5 + $0x8] sm:$0xff]  ;;  %vm2479_vm1 = vcmp.lt.s32.totalorder %v4358_v62, 16  ;;  %vm2539_vm11 = vcmp.lt.s32.totalorder %v2533_v63, 256  ;;  %v4375_v9 = vadd.s32 4294967293, %v3711_v44  ;;  %v3368_v52 = vld [vmem:[%s3635_s18 + $0x18] sm:$0xff] }
 0x3b3   : > { %2401 = vmatpush.msra.mxu2 %v2370_v4  ;;  %2421 = vmatpush.msrb.mxu3 %v2371_v32  ;;  %vm2478_vm9 = vcmp.lt.s32.totalorder %v4362_v49, 16  ;;  %vm4369_vm15 = vmand %vm2479_vm1, %vm2539_vm11  ;;  %vm2626_vm8 = vcmp.lt.s32.totalorder %v3702_v37, 80  ;;  %v2513_v14 = vadd.s32 45, %v3705_v39  ;;  %v4386_v44 = vadd.s32 4294967293, %v3708_v40 }
 0x3b4   : > { %v2430_v5 = vpop.permute.xlu1 %2429  ;;  %v2492_v26 = vadd.s32 4294967293, %v3702_v37  ;;  %vm2529_vm2 = vcmp.lt.s32.totalorder %v2523_v7, 256  ;;  %v2503_v3 = vadd.s32 3, %v3705_v39  ;;  %vm2585_vm7 = vcmp.lt.s32.totalorder %v3702_v37, 3 }
 0x3b5   : > { %2402 = vmatpush.msra.mxu2 %v2362_v48  ;;  %2422 = vmatpush.msrb.mxu3 %v2363_v60  ;;  %vm2448_vm4 = vcmp.ge.s32.totalorder %v4375_v9, 0  ;;  %vm2519_vm14 = vcmp.lt.s32.totalorder %v2513_v14, 256  ;;  %vm2449_vm6 = vcmp.ge.s32.totalorder %v4386_v44, 0  ;;  %vm2613_vm10 = vcmp.lt.s32.totalorder %v3702_v37, 83  ;;  %v3369_v44 = vld [vmem:[%s3635_s18 + $0x10] sm:$0xff] }
 0x3b6   : > { %3067 = vmatmul.msk.f32.vlgmr.msra.gmra.mxu2 %vm2377_vm3, %v2248_v19  ;;  %3069 = vmatmul.msk.f32.vlgmr.msrb.gmra.mxu3 %vm2377_vm3, %v2248_v19  ;;  %vm2494_vm3 = vcmp.ge.s32.totalorder %v2492_v26, 0  ;;  %vm2509_vm5 = vcmp.lt.s32.totalorder %v2503_v3, 256  ;;  %vm4400_vm11 = vmand %vm2449_vm6, %vm2519_vm14  ;;  %v2454_v4 = vadd.s32 4294967245, %v3702_v37  ;;  %v2482_v60 = vadd.s32 4294967251, %v3702_v37 }
 0x3b7   : > { %vm2572_vm14 = vcmp.lt.s32.totalorder %v3702_v37, 45 }
 0x439   : > { %v2404_v6 = vpop.f32.mrf.mxu2  ;;  %v2424_v35 = vpop.f32.mrf.mxu3 }
 0x43a   : > { %v2432_v33 = vmul.f32 %v2430_v5, %v2404_v6  ;;  %v2433_v34 = vmul.f32 %v2430_v5, %v2424_v35 }
 0x43c   : > { %v2439_v38 = vadd.f32 %v2437_v36, %v2432_v33  ;;  %v2440_v41 = vadd.f32 %v2437_v36, %v2433_v34 }
 0x43e   : > { %v4335_v43 = vmax.f32 %v2439_v38, 0.0  ;;  %v4337_v12 = vmax.f32 %v2440_v41, 0.0 }
 0x440   : > { %2637 = vrot.lane.b32.xlu2 %v4337_v12, %s3431_s22  ;;  %2635 = vrot.lane.b32.xlu1 %v4335_v43, %s3431_s22  ;;  %v3333_v20 = vpack.i.bf16 %v4337_v12, %v4335_v43  ;;  %s3437_s22 = smov 45  }
 0x442   : > { %3334 = vrot.lane.b32.xlu0 %v3333_v20, %s3432_s26 }
 0x448   : > { %3349 = vrot.lane.b32.xlu2 %v3333_v20, %s3433_s10  ;;  %3344 = vrot.lane.b32.xlu1 %v3333_v20, %s3434_s11 }
 0x44a   : > { %3339 = vrot.lane.b32.xlu0 %v3333_v20, %s3435_s28 }
 0x450   : > { %3364 = vrot.lane.b32.xlu2 %v3333_v20, %s3436_s4  ;;  %3359 = vrot.lane.b32.xlu1 %v3333_v20, %s3437_s22  ;;  %s4756_s4 = sld [smem:[#allocation21_spill]] }
 0x452   : > { %3354 = vrot.lane.b32.xlu0 %v3333_v20, %s3438_s9  ;;  %s4745_s9 = sld [smem:[#allocation18_spill]] }
 0x458   : > { %1445 = vperm.xlu2 %3227, %v1138_v18   ;;  %2731 = vperm.xlu1 %3156, %v2444_v47  }
 0x45a   : > { %1992 = vperm.xlu0 %3155, %v1705_v11  }
 0x460   : > { %1452 = vperm.xlu2 %3227, %v1139_v51   ;;  %2738 = vperm.xlu1 %3156, %v2445_v54  }
 0x462   : > { %1999 = vperm.xlu0 %3155, %v1706_v55  }
 0x468   : > { %2832 = vperm.xlu2 %3227, %v2755_v16   ;;  %2823 = vperm.xlu1 %3156, %v2754_v45  }
 0x46a   : > { %2818 = vperm.xlu0 %3155, %v2753_v25   ;;  %v2464_v25 = vadd.s32 4294967248, %v3702_v37 }
 0x470   : > { %2909 = vperm.xlu2 %3227, %v2847_v53   ;;  %2904 = vperm.xlu1 %3156, %v2846_v46  }
 0x472   : > { %2837 = vperm.xlu0 %3155, %v2756_v31  }
 0x478   : > { %2923 = vperm.xlu1 %3156, %v2849_v59  }
 0x47a   : > { %2918 = vperm.xlu0 %3155, %v2848_v61  }
 0x49a   : > { %v2638_v0 = vpop.permute.xlu2 %2637 }
 0x4a2   : > { %v3350_v22 = vpop.permute.xlu2 %3349 }
 0x4a3   : > { %v3352_v29 = vunpack.i.h.bf16 %v3350_v22  ;;  %v3351_v50 = vunpack.i.l.bf16 %v3350_v22 }
 0x4a5   : > { %v2586_v36 = vsel %vm2585_vm7, %v3351_v50, %v3352_v29  ;;  %v2587_v38 = vsel %vm2585_vm7, %v3352_v29, %v3351_v50  ;;  %vm2484_vm7 = vcmp.ge.s32.totalorder %v2482_v60, 0 }
 0x4a6   : > { %v2593_v59 = vsel %vm2449_vm6, %v2586_v36, 0.0 }
 0x4aa   : > { %v3365_v47 = vpop.permute.xlu2 %3364 }
 0x4ab   : > { %v3367_v61 = vunpack.i.h.bf16 %v3365_v47  ;;  %v3366_v63 = vunpack.i.l.bf16 %v3365_v47 }
 0x4b2   : > { %v2636_v57 = vpop.permute.xlu1 %2635 }
 0x4b3   : > { %v2640_v8 = vsel %vm2639_vm13, %v2636_v57, %v2638_v0  ;;  %v2641_v15 = vsel %vm2639_vm13, %v2638_v0, %v2636_v57  ;;  %vm2546_vm13 = vcmp.lt.s32.totalorder %v3702_v37, 51 }
 0x4b4   : > { %v2646_v10 = vsel %vm2478_vm9, %v2640_v8, 0.0  ;;  %v2647_v13 = vsel %vm4369_vm15, %v2641_v15, 0.0  ;;  %v3335_v42 = vpop.permute.xlu0 %3334  ;;  %vm2600_vm15 = vcmp.lt.s32.totalorder %v3702_v37, 125  ;;  %v2548_v26 = vsel %vm2546_vm13, %v3367_v61, %v3366_v63 }
 0x4b5   : > { %v3337_v23 = vunpack.i.h.bf16 %v3335_v42  ;;  %v3336_v24 = vunpack.i.l.bf16 %v3335_v42  ;;  %3070 = vmatpush.msk.msrb.mxu0 %vm4732_vm0, %v2646_v10  ;;  %3072 = vmatpush.msk.msra.mxu1 %vm4733_vm12, %v2647_v13  ;;  %vm4426_vm0 = vmand %vm2448_vm4, %vm2494_vm3  ;;  %vm2456_vm3 = vcmp.ge.s32.totalorder %v2454_v4, 0  ;;  %v2657_v42 = vrot.slane %v2593_v59, 4  ;;  %v3370_v4 = vld [vmem:[%s3635_s18 + $0x8] sm:$0xff] }
 0x4b6   : > { %v2592_v31 = vsel %vm4426_vm0, %v2587_v38, 0.0 }
 0x4b7   : > { %v2628_v28 = vsel %vm2626_vm8, %v3337_v23, %v3336_v24  ;;  %v2627_v1 = vsel %vm2626_vm8, %v3336_v24, %v3337_v23  ;;  %vm4411_vm8 = vmand %vm2479_vm1, %vm2509_vm5  ;;  %v2656_v13 = vrot.slane %v2592_v31, 4  ;;  %v2547_v24 = vsel %vm2546_vm13, %v3366_v63, %v3367_v61 }
 0x4b8   : > { %v2634_v40 = vsel %vm2529_vm2, %v2628_v28, 0.0  ;;  %v2668_v19 = vrot.slane %v2627_v1, 4  ;;  %vm4740_vm2 = vmmov %vm4733_vm12 }
 0x4b9   : > { %v2669_v48 = vrot.slane %v2634_v40, 4  ;;  %vm4742_vm5 = vmmov %vm4740_vm2 }
 0x4ba   : > { %v3345_v56 = vpop.permute.xlu1 %3344  ;;  %vm4747_vm0 = vmmov %vm4740_vm2 }
 0x4bb   : > { %v3347_v39 = vunpack.i.h.bf16 %v3345_v56  ;;  %v3346_v30 = vunpack.i.l.bf16 %v3345_v56  ;;  %v2443_v56 = vld [vmem:[%s4745_s9] sm:$0xf]  ;;  %vm4748_vm13 = vmmov %vm4747_vm0 }
 0x4bc   : > { %v3340_v32 = vpop.permute.xlu0 %3339 }
 0x4bd   : > { %v3342_v5 = vunpack.i.h.bf16 %v3340_v32  ;;  %v3341_v6 = vunpack.i.l.bf16 %v3340_v32  ;;  %v2614_v35 = vsel %vm2613_vm10, %v3346_v30, %v3347_v39  ;;  %v2615_v33 = vsel %vm2613_vm10, %v3347_v39, %v3346_v30  ;;  %vm4741_vm10 = vmmov %vm4740_vm2  ;;  %v3371_v32 = vld [vmem:[%s3635_s18] sm:$0xff]  ;;  %s4761_s18 = sshll.u32 %s4763_s16, 5 }
 0x4be   : > { %v2620_v41 = vsel %vm2448_vm4, %v2614_v35, 0.0  ;;  %v2621_v20 = vsel %vm4400_vm11, %v2615_v33, 0.0  ;;  %vm4453_vm11 = vmand %vm2478_vm9, %vm2484_vm7  ;;  %s1042_s23 = scalar_lea.vmem %s3617_s6, %s4761_s18 }
 0x4bf   : > { %v2601_v11 = vsel %vm2600_vm15, %v3341_v6, %v3342_v5  ;;  %v2602_v51 = vsel %vm2600_vm15, %v3342_v5, %v3341_v6  ;;  %v2678_v54 = vsel %vm4733_vm12, %v2620_v41, %v2668_v19  ;;  %v2679_v55 = vsel %vm4740_vm2, %v2621_v20, %v2669_v48  ;;  %vm4749_vm12 = vmmov %vm4747_vm0  ;;  %v2844_v19 = vld [vmem:[%s3602_s20] sm:$0xff]  ;;  %v2845_v48 = vld [vmem:[%s3602_s20 + $0x8] sm:$0xff]  ;;  %v1446_v5 = vpop.permute.xlu2 %1445 }
 0x4c0   : > { %2701 = vmatpush.msrb.mxu0 %v2678_v54  ;;  %2721 = vmatpush.msra.mxu1 %v2679_v55  ;;  %v2607_v16 = vsel %vm2478_vm9, %v2601_v11, 0.0  ;;  %v2608_v45 = vsel %vm4411_vm8, %v2602_v51, 0.0  ;;  %vm2559_vm15 = vcmp.lt.s32.totalorder %v3702_v37, 48  ;;  %vm2466_vm8 = vcmp.ge.s32.totalorder %v2464_v25, 0  ;;  %vm4746_vm9 = vmmov %vm4740_vm2 }
 0x4c1   : > { %v2662_v53 = vrot.slane %v2607_v16, 4  ;;  %v2663_v46 = vrot.slane %v2608_v45, 4  ;;  %v2554_v37 = vsel %vm2449_vm6, %v2547_v24, 0.0  ;;  %vm4752_vm6 = vcmask 130048  }
 0x4c2   : > { %v3360_v0 = vpop.permute.xlu1 %3359  ;;  %vm4753_vm7 = vmmov %vm4752_vm6  ;;  %v1449_v11 = vmul.f32 %v1446_v5, %v3964_v21  ;;  %v1448_v16 = vmul.f32 %v1446_v5, %v3962_v17  ;;  %v2752_v17 = vld [vmem:[%s4756_s4 + $0x8] sm:$0xff] }
 0x4c3   : > { %v3362_v2 = vunpack.i.h.bf16 %v3360_v0  ;;  %v3361_v57 = vunpack.i.l.bf16 %v3360_v0  ;;  %v2676_v7 = vsel %vm4741_vm10, %v4335_v43, %v2662_v53  ;;  %v2677_v8 = vsel %vm4742_vm5, %v4337_v12, %v2663_v46  ;;  %vm4757_vm10 = vmmov %vm4747_vm0  ;;  %v2751_v46 = vld [vmem:[%s4756_s4] sm:$0xff] }
 0x4c4   : > { %v3355_v10 = vpop.permute.xlu0 %3354  ;;  %2702 = vmatpush.msrb.mxu0 %v2676_v7  ;;  %2722 = vmatpush.msra.mxu1 %v2677_v8  ;;  %vm2757_vm5 = vcmask 97280  }
 0x4c5   : > { %v3357_v14 = vunpack.i.h.bf16 %v3355_v10  ;;  %v3356_v43 = vunpack.i.l.bf16 %v3355_v10  ;;  %v2574_v12 = vsel %vm2572_vm14, %v3362_v2, %v3361_v57  ;;  %v2573_v49 = vsel %vm2572_vm14, %v3361_v57, %v3362_v2  ;;  %vm4754_vm14 = vmmov %vm4752_vm6 }
 0x4c6   : > { %v2579_v22 = vsel %vm4453_vm11, %v2574_v12, 0.0  ;;  %v2580_v23 = vsel %vm2479_vm1, %v2573_v49, 0.0  ;;  %vm2458_vm1 = vmand %vm2448_vm4, %vm2456_vm3  ;;  %vm4750_vm4 = vcmask 293888  }
 0x4c7   : > { %v2560_v3 = vsel %vm2559_vm15, %v3356_v43, %v3357_v14  ;;  %v2561_v28 = vsel %vm2559_vm15, %v3357_v14, %v3356_v43  ;;  %v2674_v1 = vsel %vm4746_vm9, %v2579_v22, %v2656_v13  ;;  %v2675_v40 = vsel %vm4747_vm0, %v2580_v23, %v2657_v42  ;;  %vm4751_vm2 = vmmov %vm4750_vm4  ;;  %v1453_v20 = vpop.permute.xlu2 %1452 }
 0x4c8   : > { %2703 = vmatpush.msrb.mxu0 %v2674_v1  ;;  %2723 = vmatpush.msra.mxu1 %v2675_v40  ;;  %v2651_v62 = vrot.slane %v2560_v3, 4  ;;  %v2566_v29 = vsel %vm2466_vm8, %v2561_v28, 0.0  ;;  %v2553_v30 = vsel %vm2458_vm1, %v2548_v26, 0.0  ;;  %vm4755_vm3 = vmmov %vm4752_vm6 }
 0x4c9   : > { %v2650_v50 = vrot.slane %v2566_v29, 4  ;;  %vm4758_vm11 = vmmov %vm4747_vm0 }
 0x4ca   : > { %v2673_v39 = vsel %vm4748_vm13, %v2554_v37, %v2651_v62  ;;  %v2732_v6 = vpop.permute.xlu1 %2731  ;;  %vm4759_vm15 = vmmov %vm4747_vm0 }
 0x4cb   : > { %2724 = vmatpush.msra.mxu1 %v2673_v39  ;;  %v2672_v9 = vsel %vm4749_vm12, %v2553_v30, %v2650_v50  ;;  %vm4760_vm8 = vmmov %vm4747_vm0 }
 0x4cc   : > { %2704 = vmatpush.msrb.mxu0 %v2672_v9  ;;  %3073 = vmatmul.msk.f32.vlgmr.msra.gmra.mxu1 %vm4750_vm4, %v2443_v56  ;;  %v1993_v60 = vpop.permute.xlu0 %1992 }
 0x4cd   : > { %3071 = vmatmul.msk.f32.vlgmr.msrb.gmra.mxu0 %vm4751_vm2, %v2443_v56  ;;  %2893 = vmatpush.msrb.mxu1 %v3368_v52  ;;  %v1996_v33 = vmul.f32 %v1993_v60, %v4231_v58  ;;  %v1995_v34 = vmul.f32 %v1993_v60, %v4229_v27  ;;  %v1456_v58 = vadd.f32 %v1453_v20, %v1449_v11 }
 0x4ce   : > { %2870 = vmatpush.msra.mxu0 %v3369_v44  ;;  %v1455_v27 = vadd.f32 %v1453_v20, %v1448_v16 }
 0x4cf   : > { %2894 = vmatpush.msrb.mxu1 %v3370_v4  ;;  %v2833_v57 = vpop.permute.xlu2 %2832 }
 0x4d0   : > { %2871 = vmatpush.msra.mxu0 %v3371_v32 }
 0x4d2   : > { %v2739_v51 = vpop.permute.xlu1 %2738 }
 0x4d4   : > { %3082 = vmatmul.msk.f32.vlgmr.msrb.gmra.mxu1 %vm4752_vm6, %v2844_v19  ;;  %v2000_v35 = vpop.permute.xlu0 %1999 }
 0x4d5   : > { %3080 = vmatmul.msk.f32.vlgmr.msra.gmra.mxu0 %vm4753_vm7, %v2844_v19  ;;  %v2003_v36 = vadd.f32 %v2000_v35, %v1996_v33  ;;  %v2002_v38 = vadd.f32 %v2000_v35, %v1995_v34 }
 0x4d7   : > { %v2746_v54 = vrot.slane %v2003_v36, 4  ;;  %v2745_v45 = vrot.slane %v2002_v38, 4  ;;  %v2910_v40 = vpop.permute.xlu2 %2909 }
 0x4d9   : > { %v2750_v31 = vsel %vm4759_vm15, %v1456_v58, %v2746_v54  ;;  %v2749_v21 = vsel %vm4760_vm8, %v1455_v27, %v2745_v45 }
 0x4da   : > { %v2824_v61 = vpop.permute.xlu1 %2823 }
 0x4dc   : > { %3083 = vmatmul.msk.f32.gmra.mxu1 %vm4754_vm14, %v2845_v48  ;;  %v2819_v59 = vpop.permute.xlu0 %2818 }
 0x4dd   : > { %3081 = vmatmul.msk.f32.gmra.mxu0 %vm4755_vm3, %v2845_v48 }
 0x4e2   : > { %v2905_v7 = vpop.permute.xlu1 %2904 }
 0x4e4   : > { %v2838_v63 = vpop.permute.xlu0 %2837 }
 0x4ea   : > { %v2924_v4 = vpop.permute.xlu1 %2923 }
 0x4ec   : > { %v2919_v12 = vpop.permute.xlu0 %2918 }
 0x549   : > { %v2726_v41 = vpop.f32.mrf.mxu1 }
 0x54a   : > { %v2735_v18 = vmul.f32 %v2732_v6, %v2726_v41  ;;  %v2706_v47 = vpop.f32.mrf.mxu0 }
 0x54b   : > { %v2734_v55 = vmul.f32 %v2732_v6, %v2706_v47 }
 0x54c   : > { %v2742_v25 = vadd.f32 %v2739_v51, %v2735_v18 }
 0x54d   : > { %v2741_v53 = vadd.f32 %v2739_v51, %v2734_v55 }
 0x54e   : > { %3077 = vmatpush.msk.msra.mxu3 %vm4757_vm10, %v2742_v25 }
 0x54f   : > { %3074 = vmatpush.msk.msrb.mxu2 %vm4758_vm11, %v2741_v53 }
 0x550   : > { %2808 = vmatpush.msra.mxu3 %v2750_v31 }
 0x551   : > { %2785 = vmatpush.msrb.mxu2 %v2749_v21  ;;  %3078 = vmatmul.msk.f32.vlgmr.msra.gmra.mxu3 %vm2757_vm5, %v2751_v46  ;;  %v2896_v0 = vpop.f32.mrf.mxu1 }
 0x552   : > { %3075 = vmatmul.msk.f32.vlgmr.msrb.gmra.mxu2 %vm2757_vm5, %v2751_v46  ;;  %v2873_v2 = vpop.f32.mrf.mxu0  ;;  %v2913_v15 = vmul.f32 %v2905_v7, %v2896_v0 }
 0x553   : > { %v2912_v42 = vmul.f32 %v2905_v7, %v2873_v2 }
 0x554   : > { %v2927_v22 = vadd.f32 %v2919_v12, %v2913_v15 }
 0x555   : > { %v2926_v24 = vadd.f32 %v2919_v12, %v2912_v42 }
 0x559   : > { %3079 = vmatmul.msk.f32.gmra.mxu3 %vm2757_vm5, %v2752_v17  ;;  %v2899_v26 = vpop.f32.mrf.mxu1 }
 0x55a   : > { %3076 = vmatmul.msk.f32.gmra.mxu2 %vm2757_vm5, %v2752_v17  ;;  %v2876_v28 = vpop.f32.mrf.mxu0  ;;  %v2915_v37 = vmul.f32 %v2910_v40, %v2899_v26 }
 0x55b   : > { %v2914_v30 = vmul.f32 %v2910_v40, %v2876_v28 }
 0x55c   : > { %v2929_v19 = vadd.f32 %v2924_v4, %v2915_v37 }
 0x55d   : > { %v2928_v60 = vadd.f32 %v2924_v4, %v2914_v30 }
 0x5d4   : > { %v2810_v8 = vpop.f32.mrf.mxu3 }
 0x5d5   : > { %v2827_v10 = vmul.f32 %v2819_v59, %v2810_v8  ;;  %v2787_v13 = vpop.f32.mrf.mxu2 }
 0x5d6   : > { %v2826_v14 = vmul.f32 %v2819_v59, %v2787_v13 }
 0x5d7   : > { %v2841_v43 = vadd.f32 %v2833_v57, %v2827_v10 }
 0x5d8   : > { %v2840_v49 = vadd.f32 %v2833_v57, %v2826_v14 }
 0x5d9   : > { %v2931_v23 = vmul.f32 0.1, %v2841_v43 }
 0x5da   : > { %v2930_v3 = vmul.f32 0.1, %v2840_v49 }
 0x5db   : > { %v2935_v1 = vadd.f32 %v2931_v23, %v2927_v22 }
 0x5dc   : > { %v2934_v62 = vadd.f32 %v2930_v3, %v2926_v24  ;;  %v2813_v29 = vpop.f32.mrf.mxu3 }
 0x5dd   : > { %v2939_v50 = vmax.f32 %v2935_v1, 0.0  ;;  %v2829_v56 = vmul.f32 %v2824_v61, %v2813_v29  ;;  %v2790_v39 = vpop.f32.mrf.mxu2 }
 0x5de   : > { %v2938_v9 = vmax.f32 %v2934_v62, 0.0  ;;  %v2828_v52 = vmul.f32 %v2824_v61, %v2790_v39 }
 0x5df   : > { %2943 = vst [vmem:[%s1042_s23 + $0x8] sm:$0xff] %v2939_v50  ;;  %v2843_v44 = vadd.f32 %v2838_v63, %v2829_v56 }
 0x5e0   : > { %2942 = vst [vmem:[%s1042_s23] sm:$0xff] %v2938_v9  ;;  %v2842_v32 = vadd.f32 %v2838_v63, %v2828_v52 }
 0x5e1   : > { %v2933_v48 = vmul.f32 0.1, %v2843_v44 }
 0x5e2   : > { %v2932_v5 = vmul.f32 0.1, %v2842_v32 }
 0x5e3   : > { %v2937_v6 = vadd.f32 %v2933_v48, %v2929_v19 }
 0x5e4   : > { %v2936_v35 = vadd.f32 %v2932_v5, %v2928_v60 }
 0x5e5   : > { %v2941_v33 = vmax.f32 %v2937_v6, 0.0 }
 0x5e6   : > { %v2940_v34 = vmax.f32 %v2936_v35, 0.0 }
 0x5e7   : > { %2945 = vst [vmem:[%s1042_s23 + $0x18] sm:$0xff] %v2941_v33 }
 0x5e8   : > { %2944 = vst [vmem:[%s1042_s23 + $0x10] sm:$0xff] %v2940_v34 }
 0x5e9 PF: > { %s79_s15 = sadd.s32 1, %s3378_s15  }
 0x5ea   : > { %p76_p4 = scmp.ge.s32.totalorder %s79_s15, 4  }
 0x5ec   :  { %78 = sbr.rel (!%p76_p4) target bundleno = 61 (0x3d), region = 220 }

</bundles_post_ra>
